<compile_context>
chip_gen: v6e
topology: v6e:2x2x1
jax: 0.10.0
libtpu: 0.0.40
codegen_flags: <defaults>
</compile_context>

<pallas_src>
import jax
import jax.numpy as jnp
from jax.experimental import pallas as pl
from jax.experimental.pallas import tpu as pltpu


def _round_up(x, m):
    return ((x + m - 1) // m) * m


def _cdiv(a, b):
    return -(-a // b)


def _fit_rows(a, target):
    """Pad or truncate axis 1 of (B, rows, C) to `target` rows (pad = zeros;
    truncation only ever removes all-zero trailing pad rows)."""
    cur = a.shape[1]
    if cur == target:
        return a
    if cur < target:
        return jnp.pad(a, ((0, 0), (0, target - cur), (0, 0)))
    return a[:, :target, :]


# ----------------------------------------------------------------------------
# Fused Pallas kernel: 3x3 conv (9 shifted matmuls) + bias + ReLU + masked GAP
# ----------------------------------------------------------------------------
def _make_conv_pool_kernel(tm, offs, cmid_pad, single):
    """tm: output rows per step; offs: static row offsets of the 9 taps into
    the flattened padded image; single: True -> grid=(B,), no accumulator."""

    def tap_conv_pool(x_ref, w_ref, b_ref, pw):
        # x_ref: (rows >= max(offs)+tm, Cin) bf16   flattened padded image
        # w_ref: (9, Cin, Cmid_pad)          bf16   per-tap conv weights
        # b_ref: (1, Cmid_pad)               f32    conv bias
        # pw:    (tm, 1)                     f32    pooling weights (1/HW or 0)
        feat = jnp.zeros((tm, cmid_pad), jnp.float32)
        for t, off in enumerate(offs):                    # static 9-tap loop
            xt = x_ref[pl.ds(off, tm), :]                 # (tm, Cin) bf16
            feat = feat + jnp.dot(xt, w_ref[t],
                                  preferred_element_type=jnp.float32)
        feat = jnp.maximum(feat + b_ref[...], 0.0)
        # masked global-average-pool contribution; pw zeroes the junk right-pad
        # column and tail padding rows and already folds in 1/(H*W).
        return jnp.sum(feat * pw, axis=0, keepdims=True)  # (1, Cmid_pad) f32

    if single:
        # One step per batch element: no scratch, no pl.when, no grid reduction.
        def kernel(x_ref, w_ref, b_ref, pw_ref, emb_ref):
            emb_ref[...] = tap_conv_pool(x_ref, w_ref, b_ref, pw_ref[...])
        return kernel

    def kernel(xm_ref, xh_ref, w_ref, b_ref, pw_ref, emb_ref, acc_ref, buf_ref):
        s = pl.program_id(1)

        @pl.when(s == 0)
        def _():
            acc_ref[...] = jnp.zeros_like(acc_ref)

        # Stitch tile + next-tile halo into one contiguous VMEM window
        # (cheap: 2*tm*Cin bf16), then the tap slices are static offsets.
        buf_ref[pl.ds(0, tm), :] = xm_ref[...]
        buf_ref[pl.ds(tm, tm), :] = xh_ref[...]
        acc_ref[...] += tap_conv_pool(buf_ref, w_ref, b_ref, pw_ref[...])

        @pl.when(s == pl.num_programs(1) - 1)
        def _():
            emb_ref[...] = acc_ref[...]

    return kernel


# ----------------------------------------------------------------------------
# Parameters (spectral norm applied offline, weights packed for the kernel)
# ----------------------------------------------------------------------------
def _spectral_normalize(w2d, n_iter=30):
    u = jnp.ones((w2d.shape[0],), jnp.float32) / jnp.sqrt(w2d.shape[0])
    v = jnp.zeros((w2d.shape[1],), jnp.float32)
    for _ in range(n_iter):
        v = w2d.T @ u
        v = v / (jnp.linalg.norm(v) + 1e-12)
        u = w2d @ v
        u = u / (jnp.linalg.norm(u) + 1e-12)
    sigma = u @ (w2d @ v)
    return w2d / sigma


def init_params(key, c_in, in_features, out_features, lane=128):
    k1, k2, k3, k4 = jax.random.split(key, 4)
    w_conv = jax.random.normal(k1, (in_features, c_in, 3, 3), jnp.float32) * 0.1
    b_conv = jax.random.normal(k2, (in_features,), jnp.float32) * 0.01
    w_fc = jax.random.normal(k3, (out_features, in_features), jnp.float32) * 0.1
    b_fc = jax.random.normal(k4, (out_features,), jnp.float32) * 0.01

    # spectral norm on every Conv2d / Linear (as in _add_spectral_norm)
    w_conv_sn = _spectral_normalize(w_conv.reshape(in_features, -1)).reshape(
        in_features, c_in, 3, 3)
    w_fc_sn = _spectral_normalize(w_fc)

    cmid_pad = _round_up(in_features, lane)
    # per-tap conv weights, (9, Cin, Cmid_pad) bf16, t = di*3 + dj
    w_taps = jnp.stack([w_conv_sn[:, :, di, dj].T                 # (Cin, Cmid)
                        for di in range(3) for dj in range(3)], axis=0)
    w_taps = jnp.pad(w_taps, ((0, 0), (0, 0), (0, cmid_pad - in_features)))
    b_conv_p = jnp.pad(b_conv, (0, cmid_pad - in_features)).reshape(1, cmid_pad)

    return dict(
        w_taps=w_taps.astype(jnp.bfloat16),       # (9, Cin, Cmid_pad) bf16
        b_conv=b_conv_p.astype(jnp.float32),      # (1, Cmid_pad) f32
        w_fc=w_fc_sn,                             # (Cout, Cmid) f32 (wrapper fc)
        b_fc=b_fc,                                # (Cout,) f32
        w_conv_sn=w_conv_sn,                      # f32, for the reference check
    )


# ----------------------------------------------------------------------------
# Forward pass
# ----------------------------------------------------------------------------
def simple_lip_net_forward(x_nchw, params, in_features, out_features,
                           out_embed=False, tile_rows=1024):
    B, C, H, W = x_nchw.shape
    Wp = W + 1                      # one zero column on the right
    r_out = H * Wp                  # flattened conv-output rows (incl. junk col)
    cmid_pad = params["w_taps"].shape[2]
    tile_rows = max(16, _round_up(tile_rows, 16))

    # NCHW -> NHWC, cast to bf16 ONCE, zero-pad (2 rows top/bottom, 1 col
    # right), flatten spatially.  This replaces the old materialized im2col.
    x = jnp.transpose(x_nchw, (0, 2, 3, 1)).astype(jnp.bfloat16)
    xpad = jnp.pad(x, ((0, 0), (2, 2), (0, 1), (0, 0)))      # (B, H+4, W+1, C)
    x_flat = xpad.reshape(B, (H + 4) * Wp, C)

    # Static tap offsets: output flat row r=i*Wp+j needs input flat row
    # r + (di+1)*Wp + dj - 1  (= padded pixel (i+di+1, j+dj-1)); the left/right
    # borders land on the zero right-pad column of the adjacent padded row.
    offs = [(di + 1) * Wp + dj - 1 for di in range(3) for dj in range(3)]
    max_off = max(offs)

    single = r_out <= tile_rows
    if single:
        # Whole image in one step per batch element (demo path).
        tm = _round_up(r_out, 16)
        rows_in = _round_up(max((H + 4) * Wp, max_off + tm), 16)
        x_flat = _fit_rows(x_flat, rows_in)
        n_chunks = 1
        grid = (B,)
        in_specs = [
            pl.BlockSpec((None, rows_in, C), lambda b: (b, 0, 0)),      # image
            pl.BlockSpec((9, C, cmid_pad), lambda b: (0, 0, 0)),        # w_taps
            pl.BlockSpec((1, cmid_pad), lambda b: (0, 0)),              # bias
            pl.BlockSpec((tm, 1), lambda b: (0, 0)),                    # pool w
        ]
        out_specs = pl.BlockSpec((None, 1, cmid_pad), lambda b: (b, 0, 0))
        scratch = ()
        dims = ("parallel",)
        x_operands = (x_flat,)
    else:
        # Chunked spatial reduction with a next-tile halo read.
        tm = _round_up(max(tile_rows, max_off), 16)
        n_chunks = _cdiv(r_out, tm)
        x_flat = _fit_rows(x_flat, (n_chunks + 1) * tm)
        grid = (B, n_chunks)
        in_specs = [
            pl.BlockSpec((None, tm, C), lambda b, s: (b, s, 0)),        # tile
            pl.BlockSpec((None, tm, C), lambda b, s: (b, s + 1, 0)),    # halo
            pl.BlockSpec((9, C, cmid_pad), lambda b, s: (0, 0, 0)),     # w_taps
            pl.BlockSpec((1, cmid_pad), lambda b, s: (0, 0)),           # bias
            pl.BlockSpec((tm, 1), lambda b, s: (s, 0)),                 # pool w
        ]
        out_specs = pl.BlockSpec((None, 1, cmid_pad), lambda b, s: (b, 0, 0))
        scratch = (
            pltpu.VMEM((1, cmid_pad), jnp.float32),      # pool accumulator
            pltpu.VMEM((2 * tm, C), jnp.bfloat16),       # tile + halo window
        )
        dims = ("parallel", "arbitrary")
        x_operands = (x_flat, x_flat)

    # Pooling weights: 1/(H*W) for real pixels, 0 for the junk right-pad
    # column and tail padding rows (replaces the old per-step iota+where mask).
    idx = jnp.arange(n_chunks * tm, dtype=jnp.int32)
    real = (idx < r_out) & (idx % Wp != W)
    pool_w = jnp.where(real, 1.0 / (H * W), 0.0).astype(jnp.float32)
    pool_w = pool_w.reshape(n_chunks * tm, 1)

    flops = 2 * B * n_chunks * tm * (9 * C) * cmid_pad
    bytes_accessed = (x_flat.size * 2 * len(x_operands)
                      + params["w_taps"].size * 2
                      + pool_w.size * 4 + cmid_pad * 4
                      + B * cmid_pad * 4)
    cost = pl.CostEstimate(flops=int(flops), transcendentals=0,
                           bytes_accessed=int(bytes_accessed))

    kernel = _make_conv_pool_kernel(tm, offs, cmid_pad, single)
    emb_pad = pl.pallas_call(
        kernel,
        out_shape=jax.ShapeDtypeStruct((B, 1, cmid_pad), jnp.float32),
        grid=grid,
        in_specs=in_specs,
        out_specs=out_specs,
        scratch_shapes=scratch,
        compiler_params=pltpu.CompilerParams(
            dimension_semantics=dims,
            vmem_limit_bytes=32 * 1024 * 1024),
        cost_estimate=cost,
    )(*x_operands, params["w_taps"], params["b_conv"], pool_w)

    embedding = emb_pad[:, 0, :in_features]                       # (B, Cmid) f32
    # Final (spectrally normalized) fc as one batched matmul in the wrapper.
    out = embedding @ params["w_fc"].T + params["b_fc"]
    if out_embed:
        return out, embedding
    return out


# ----------------------------------------------------------------------------
if __name__ == "__main__":
    B, Cin, H, W = 2, 4, 16, 16
    in_features, out_features = 32, 10

    key = jax.random.PRNGKey(0)
    kx, kp = jax.random.split(key)
    x = jax.random.normal(kx, (B, Cin, H, W), jnp.float32)   # NCHW like PyTorch
    params = init_params(kp, Cin, in_features, out_features)

    fwd = jax.jit(lambda xx, pp: simple_lip_net_forward(
        xx, pp, in_features, out_features, out_embed=True))
    out, emb = fwd(x, params)
    jax.block_until_ready((out, emb))

    # pure-JAX f32 reference (same spectrally-normalized weights)
    x_nhwc = jnp.transpose(x, (0, 2, 3, 1))
    xp = jnp.pad(x_nhwc, ((0, 0), (1, 1), (1, 1), (0, 0)))
    w_sn = params["w_conv_sn"]                               # (Cmid, Cin, 3, 3)
    feat = jnp.zeros((B, H, W, in_features), jnp.float32) + params["b_conv"][0, :in_features]
    for di in range(3):
        for dj in range(3):
            shifted = xp[:, di:di + H, dj:dj + W, :]         # (B, H, W, Cin)
            feat = feat + jnp.einsum("bhwc,co->bhwo", shifted,
                                     w_sn[:, :, di, dj].T)
    feat = jnp.maximum(feat, 0.0)
    emb_ref = feat.mean(axis=(1, 2))
    out_ref = emb_ref @ params["w_fc"].T + params["b_fc"]

    assert out.shape == (B, out_features)
    assert emb.shape == (B, in_features)
    assert bool(jnp.all(jnp.isfinite(out))) and bool(jnp.all(jnp.isfinite(emb)))
    assert jnp.allclose(emb, emb_ref, atol=2e-2, rtol=5e-2), \
        float(jnp.max(jnp.abs(emb - emb_ref)))
    assert jnp.allclose(out, out_ref, atol=2e-2, rtol=5e-2), \
        float(jnp.max(jnp.abs(out - out_ref)))
    print("KERNEL_OK")
</pallas_src>

<mosaic_0001>
module attributes {stable_mosaic.version = 11 : i64} {
  func.func @kernel(%arg0: i32, %arg1: memref<1x352x4xbf16, #tpu.memory_space<vmem>>, %arg2: memref<9x4x128xbf16, #tpu.memory_space<vmem>>, %arg3: memref<1x128xf32, #tpu.memory_space<vmem>>, %arg4: memref<272x1xf32, #tpu.memory_space<vmem>>, %arg5: memref<1x1x128xf32, #tpu.memory_space<vmem>>) attributes {dimension_semantics = [#tpu.dimension_semantics<parallel>], iteration_bounds = array<i64: 2>, scalar_prefetch = 0 : i64, scratch_operands = 0 : i64, tpu.core_type = #tpu.core_type<tc>, window_params = [{transform_indices = @transform_0, window_bounds = array<i64: 1, 352, 4>}, {pipeline_mode = #tpu.pipeline_mode<synchronous>, transform_indices = @transform_1, window_bounds = array<i64: 9, 4, 128>}, {pipeline_mode = #tpu.pipeline_mode<synchronous>, transform_indices = @transform_2, window_bounds = array<i64: 1, 128>}, {pipeline_mode = #tpu.pipeline_mode<synchronous>, transform_indices = @transform_3, window_bounds = array<i64: 272, 1>}, {transform_indices = @transform_4, window_bounds = array<i64: 1, 1, 128>}]} {
    %c0 = arith.constant 0 : index
    %c0_0 = arith.constant 0 : index
    %0 = vector.load %arg4[%c0, %c0_0] : memref<272x1xf32, #tpu.memory_space<vmem>>, vector<272x1xf32>
    %cst = arith.constant 0.000000e+00 : f32
    %1 = vector.broadcast %cst : f32 to vector<272x128xf32>
    %c0_1 = arith.constant 0 : index
    %c16 = arith.constant 16 : index
    %c0_2 = arith.constant 0 : index
    %2 = vector.load %arg1[%c0_1, %c16, %c0_2] : memref<1x352x4xbf16, #tpu.memory_space<vmem>>, vector<1x272x4xbf16>
    %3 = vector.shape_cast %2 : vector<1x272x4xbf16> to vector<272x4xbf16>
    %c0_3 = arith.constant 0 : index
    %c0_4 = arith.constant 0 : index
    %c0_5 = arith.constant 0 : index
    %4 = vector.load %arg2[%c0_3, %c0_4, %c0_5] : memref<9x4x128xbf16, #tpu.memory_space<vmem>>, vector<1x4x128xbf16>
    %5 = vector.shape_cast %4 : vector<1x4x128xbf16> to vector<4x128xbf16>
    %cst_6 = arith.constant dense<0.000000e+00> : vector<272x128xf32>
    %6 = tpu.matmul %3, %5, %cst_6 {dimension_numbers = #tpu.dot_dimension_numbers<[1], [0], [0], [1], [0, 0, 1, 1], [], []>} : vector<272x4xbf16>, vector<4x128xbf16>, vector<272x128xf32> -> vector<272x128xf32>
    %7 = arith.addf %1, %6 : vector<272x128xf32>
    %c0_7 = arith.constant 0 : index
    %c17 = arith.constant 17 : index
    %c0_8 = arith.constant 0 : index
    %8 = vector.load %arg1[%c0_7, %c17, %c0_8] : memref<1x352x4xbf16, #tpu.memory_space<vmem>>, vector<1x272x4xbf16>
    %9 = vector.shape_cast %8 : vector<1x272x4xbf16> to vector<272x4xbf16>
    %c1 = arith.constant 1 : index
    %c0_9 = arith.constant 0 : index
    %c0_10 = arith.constant 0 : index
    %10 = vector.load %arg2[%c1, %c0_9, %c0_10] : memref<9x4x128xbf16, #tpu.memory_space<vmem>>, vector<1x4x128xbf16>
    %11 = vector.shape_cast %10 : vector<1x4x128xbf16> to vector<4x128xbf16>
    %cst_11 = arith.constant dense<0.000000e+00> : vector<272x128xf32>
    %12 = tpu.matmul %9, %11, %cst_11 {dimension_numbers = #tpu.dot_dimension_numbers<[1], [0], [0], [1], [0, 0, 1, 1], [], []>} : vector<272x4xbf16>, vector<4x128xbf16>, vector<272x128xf32> -> vector<272x128xf32>
    %13 = arith.addf %7, %12 : vector<272x128xf32>
    %c0_12 = arith.constant 0 : index
    %c18 = arith.constant 18 : index
    %c0_13 = arith.constant 0 : index
    %14 = vector.load %arg1[%c0_12, %c18, %c0_13] : memref<1x352x4xbf16, #tpu.memory_space<vmem>>, vector<1x272x4xbf16>
    %15 = vector.shape_cast %14 : vector<1x272x4xbf16> to vector<272x4xbf16>
    %c2 = arith.constant 2 : index
    %c0_14 = arith.constant 0 : index
    %c0_15 = arith.constant 0 : index
    %16 = vector.load %arg2[%c2, %c0_14, %c0_15] : memref<9x4x128xbf16, #tpu.memory_space<vmem>>, vector<1x4x128xbf16>
    %17 = vector.shape_cast %16 : vector<1x4x128xbf16> to vector<4x128xbf16>
    %cst_16 = arith.constant dense<0.000000e+00> : vector<272x128xf32>
    %18 = tpu.matmul %15, %17, %cst_16 {dimension_numbers = #tpu.dot_dimension_numbers<[1], [0], [0], [1], [0, 0, 1, 1], [], []>} : vector<272x4xbf16>, vector<4x128xbf16>, vector<272x128xf32> -> vector<272x128xf32>
    %19 = arith.addf %13, %18 : vector<272x128xf32>
    %c0_17 = arith.constant 0 : index
    %c33 = arith.constant 33 : index
    %c0_18 = arith.constant 0 : index
    %20 = vector.load %arg1[%c0_17, %c33, %c0_18] : memref<1x352x4xbf16, #tpu.memory_space<vmem>>, vector<1x272x4xbf16>
    %21 = vector.shape_cast %20 : vector<1x272x4xbf16> to vector<272x4xbf16>
    %c3 = arith.constant 3 : index
    %c0_19 = arith.constant 0 : index
    %c0_20 = arith.constant 0 : index
    %22 = vector.load %arg2[%c3, %c0_19, %c0_20] : memref<9x4x128xbf16, #tpu.memory_space<vmem>>, vector<1x4x128xbf16>
    %23 = vector.shape_cast %22 : vector<1x4x128xbf16> to vector<4x128xbf16>
    %cst_21 = arith.constant dense<0.000000e+00> : vector<272x128xf32>
    %24 = tpu.matmul %21, %23, %cst_21 {dimension_numbers = #tpu.dot_dimension_numbers<[1], [0], [0], [1], [0, 0, 1, 1], [], []>} : vector<272x4xbf16>, vector<4x128xbf16>, vector<272x128xf32> -> vector<272x128xf32>
    %25 = arith.addf %19, %24 : vector<272x128xf32>
    %c0_22 = arith.constant 0 : index
    %c34 = arith.constant 34 : index
    %c0_23 = arith.constant 0 : index
    %26 = vector.load %arg1[%c0_22, %c34, %c0_23] : memref<1x352x4xbf16, #tpu.memory_space<vmem>>, vector<1x272x4xbf16>
    %27 = vector.shape_cast %26 : vector<1x272x4xbf16> to vector<272x4xbf16>
    %c4 = arith.constant 4 : index
    %c0_24 = arith.constant 0 : index
    %c0_25 = arith.constant 0 : index
    %28 = vector.load %arg2[%c4, %c0_24, %c0_25] : memref<9x4x128xbf16, #tpu.memory_space<vmem>>, vector<1x4x128xbf16>
    %29 = vector.shape_cast %28 : vector<1x4x128xbf16> to vector<4x128xbf16>
    %cst_26 = arith.constant dense<0.000000e+00> : vector<272x128xf32>
    %30 = tpu.matmul %27, %29, %cst_26 {dimension_numbers = #tpu.dot_dimension_numbers<[1], [0], [0], [1], [0, 0, 1, 1], [], []>} : vector<272x4xbf16>, vector<4x128xbf16>, vector<272x128xf32> -> vector<272x128xf32>
    %31 = arith.addf %25, %30 : vector<272x128xf32>
    %c0_27 = arith.constant 0 : index
    %c35 = arith.constant 35 : index
    %c0_28 = arith.constant 0 : index
    %32 = vector.load %arg1[%c0_27, %c35, %c0_28] : memref<1x352x4xbf16, #tpu.memory_space<vmem>>, vector<1x272x4xbf16>
    %33 = vector.shape_cast %32 : vector<1x272x4xbf16> to vector<272x4xbf16>
    %c5 = arith.constant 5 : index
    %c0_29 = arith.constant 0 : index
    %c0_30 = arith.constant 0 : index
    %34 = vector.load %arg2[%c5, %c0_29, %c0_30] : memref<9x4x128xbf16, #tpu.memory_space<vmem>>, vector<1x4x128xbf16>
    %35 = vector.shape_cast %34 : vector<1x4x128xbf16> to vector<4x128xbf16>
    %cst_31 = arith.constant dense<0.000000e+00> : vector<272x128xf32>
    %36 = tpu.matmul %33, %35, %cst_31 {dimension_numbers = #tpu.dot_dimension_numbers<[1], [0], [0], [1], [0, 0, 1, 1], [], []>} : vector<272x4xbf16>, vector<4x128xbf16>, vector<272x128xf32> -> vector<272x128xf32>
    %37 = arith.addf %31, %36 : vector<272x128xf32>
    %c0_32 = arith.constant 0 : index
    %c50 = arith.constant 50 : index
    %c0_33 = arith.constant 0 : index
    %38 = vector.load %arg1[%c0_32, %c50, %c0_33] : memref<1x352x4xbf16, #tpu.memory_space<vmem>>, vector<1x272x4xbf16>
    %39 = vector.shape_cast %38 : vector<1x272x4xbf16> to vector<272x4xbf16>
    %c6 = arith.constant 6 : index
    %c0_34 = arith.constant 0 : index
    %c0_35 = arith.constant 0 : index
    %40 = vector.load %arg2[%c6, %c0_34, %c0_35] : memref<9x4x128xbf16, #tpu.memory_space<vmem>>, vector<1x4x128xbf16>
    %41 = vector.shape_cast %40 : vector<1x4x128xbf16> to vector<4x128xbf16>
    %cst_36 = arith.constant dense<0.000000e+00> : vector<272x128xf32>
    %42 = tpu.matmul %39, %41, %cst_36 {dimension_numbers = #tpu.dot_dimension_numbers<[1], [0], [0], [1], [0, 0, 1, 1], [], []>} : vector<272x4xbf16>, vector<4x128xbf16>, vector<272x128xf32> -> vector<272x128xf32>
    %43 = arith.addf %37, %42 : vector<272x128xf32>
    %c0_37 = arith.constant 0 : index
    %c51 = arith.constant 51 : index
    %c0_38 = arith.constant 0 : index
    %44 = vector.load %arg1[%c0_37, %c51, %c0_38] : memref<1x352x4xbf16, #tpu.memory_space<vmem>>, vector<1x272x4xbf16>
    %45 = vector.shape_cast %44 : vector<1x272x4xbf16> to vector<272x4xbf16>
    %c7 = arith.constant 7 : index
    %c0_39 = arith.constant 0 : index
    %c0_40 = arith.constant 0 : index
    %46 = vector.load %arg2[%c7, %c0_39, %c0_40] : memref<9x4x128xbf16, #tpu.memory_space<vmem>>, vector<1x4x128xbf16>
    %47 = vector.shape_cast %46 : vector<1x4x128xbf16> to vector<4x128xbf16>
    %cst_41 = arith.constant dense<0.000000e+00> : vector<272x128xf32>
    %48 = tpu.matmul %45, %47, %cst_41 {dimension_numbers = #tpu.dot_dimension_numbers<[1], [0], [0], [1], [0, 0, 1, 1], [], []>} : vector<272x4xbf16>, vector<4x128xbf16>, vector<272x128xf32> -> vector<272x128xf32>
    %49 = arith.addf %43, %48 : vector<272x128xf32>
    %c0_42 = arith.constant 0 : index
    %c52 = arith.constant 52 : index
    %c0_43 = arith.constant 0 : index
    %50 = vector.load %arg1[%c0_42, %c52, %c0_43] : memref<1x352x4xbf16, #tpu.memory_space<vmem>>, vector<1x272x4xbf16>
    %51 = vector.shape_cast %50 : vector<1x272x4xbf16> to vector<272x4xbf16>
    %c8 = arith.constant 8 : index
    %c0_44 = arith.constant 0 : index
    %c0_45 = arith.constant 0 : index
    %52 = vector.load %arg2[%c8, %c0_44, %c0_45] : memref<9x4x128xbf16, #tpu.memory_space<vmem>>, vector<1x4x128xbf16>
    %53 = vector.shape_cast %52 : vector<1x4x128xbf16> to vector<4x128xbf16>
    %cst_46 = arith.constant dense<0.000000e+00> : vector<272x128xf32>
    %54 = tpu.matmul %51, %53, %cst_46 {dimension_numbers = #tpu.dot_dimension_numbers<[1], [0], [0], [1], [0, 0, 1, 1], [], []>} : vector<272x4xbf16>, vector<4x128xbf16>, vector<272x128xf32> -> vector<272x128xf32>
    %55 = arith.addf %49, %54 : vector<272x128xf32>
    %c0_47 = arith.constant 0 : index
    %c0_48 = arith.constant 0 : index
    %56 = vector.load %arg3[%c0_47, %c0_48] : memref<1x128xf32, #tpu.memory_space<vmem>>, vector<1x128xf32>
    %57 = vector.broadcast %56 : vector<1x128xf32> to vector<272x128xf32>
    %58 = arith.addf %55, %57 : vector<272x128xf32>
    %cst_49 = arith.constant 0.000000e+00 : f32
    %59 = vector.broadcast %cst_49 : f32 to vector<272x128xf32>
    %60 = arith.maximumf %58, %59 : vector<272x128xf32>
    %61 = vector.broadcast %0 : vector<272x1xf32> to vector<272x128xf32>
    %62 = arith.mulf %60, %61 : vector<272x128xf32>
    %cst_50 = arith.constant dense<0.000000e+00> : vector<128xf32>
    %63 = vector.multi_reduction <add>, %62, %cst_50 [0] : vector<272x128xf32> to vector<128xf32>
    %64 = vector.shape_cast %63 : vector<128xf32> to vector<1x128xf32>
    %c0_51 = arith.constant 0 : index
    %c0_52 = arith.constant 0 : index
    %c0_53 = arith.constant 0 : index
    %65 = vector.load %arg5[%c0_51, %c0_52, %c0_53] : memref<1x1x128xf32, #tpu.memory_space<vmem>>, vector<1x1x128xf32>
    %66 = vector.shape_cast %65 : vector<1x1x128xf32> to vector<1x128xf32>
    %67 = vector.shape_cast %64 : vector<1x128xf32> to vector<1x1x128xf32>
    tpu.vector_store %arg5[%c0_51, %c0_52, %c0_53], %67 {strides = array<i32>} : memref<1x1x128xf32, #tpu.memory_space<vmem>>, vector<1x1x128xf32>,
    return
  }
  func.func @transform_0(%arg0: i32) -> (i32, i32, i32) {
    %c0_i32 = arith.constant 0 : i32
    %c0_i32_0 = arith.constant 0 : i32
    %c0_i32_1 = arith.constant 0 : i32
    return %arg0, %c0_i32, %c0_i32_0 : i32, i32, i32
  }
  func.func @transform_1(%arg0: i32) -> (i32, i32, i32) {
    %c0_i32 = arith.constant 0 : i32
    %c0_i32_0 = arith.constant 0 : i32
    %c0_i32_1 = arith.constant 0 : i32
    %c0_i32_2 = arith.constant 0 : i32
    return %c0_i32, %c0_i32_0, %c0_i32_1 : i32, i32, i32
  }
  func.func @transform_2(%arg0: i32) -> (i32, i32) {
    %c0_i32 = arith.constant 0 : i32
    %c0_i32_0 = arith.constant 0 : i32
    %c0_i32_1 = arith.constant 0 : i32
    return %c0_i32, %c0_i32_0 : i32, i32
  }
  func.func @transform_3(%arg0: i32) -> (i32, i32) {
    %c0_i32 = arith.constant 0 : i32
    %c0_i32_0 = arith.constant 0 : i32
    %c0_i32_1 = arith.constant 0 : i32
    return %c0_i32, %c0_i32_0 : i32, i32
  }
  func.func @transform_4(%arg0: i32) -> (i32, i32, i32) {
    %c0_i32 = arith.constant 0 : i32
    %c0_i32_0 = arith.constant 0 : i32
    %c0_i32_1 = arith.constant 0 : i32
    return %arg0, %c0_i32, %c0_i32_0 : i32, i32, i32
  }
}

</mosaic_0001>

<bundles_post_ra>
// kernel: _lambda_.1
= control target key start
LH: loop header
LB: loop body
LE: loop exit
PB: predicated region body
PF: predicated region fallthrough
CT: control target
= control target key end

     0   :  { %s5029_s15 = smov 0   ;;  %s6733_s0 = inlined_call_operand.vmem [shape: bf16[2,352,4], index: 0, kind: input, shape index: {}]   ;;  %s6734_s1 = inlined_call_operand.vmem [shape: bf16[9,4,128], index: 1, kind: input, shape index: {}]   ;;  %s6735_s2 = inlined_call_operand.vmem [shape: f32[1,128], index: 2, kind: input, shape index: {}]   ;;  %s6736_s3 = inlined_call_operand.vmem [shape: f32[272,1], index: 3, kind: input, shape index: {}]   ;;  %s6737_s4 = inlined_call_operand.vmem [shape: f32[2,1,128], index: 4, kind: output, shape index: {}]  }
   0x1 LB: > { %s3897_s16 = sadd.s32 4294967295, %s4999_s15   ;;  %p3901_p0 = scmp.ge.s32.totalorder %s4999_s15, 1  ;;  %s4999_s15 = sphi %s5029_s15, %s14_s15  }
   0x2   : > { %p162_p1 = scmp.lt.s32.totalorder %s4999_s15, 3 }
   0x4   : > { %p163_p2 = pnand %p3901_p0, %p162_p1 }
   0x6   : > { %166 = sbr.rel (%p163_p2) target bundleno = 855 (0x357), region = 36 }
   0xb   : > { %v3903_v0 = vld [vmem:[%s6734_s1 + $0x2] sm:$0x3]  ;;  %vm548_vm0 = vcmask 1041408   ;;  %p186_p3 = scmp.lt.s32.totalorder %s3897_s16, 1  ;;  %v6751_v1 = vmov 0.0   ;;  %vm5002_vm1 = vmmov 0  }
   0xc   : > { %4288 = vmatprep.subr.bf16.mxu0 %v6751_v1  ;;  %4918 = vmatprep.subr.bf16.mxu1 %v6751_v1  ;;  %v550_v2 = vsel %vm548_vm0, %v3903_v0, 0  ;;  %vm355_vm2 = vsmask.f32 7424  ;;  %v3956_v12 = vld [vmem:[%s6734_s1 + $0x4] sm:$0x3]  ;;  %vm496_vm3 = vcmask 31744  }
   0xd   : > { %4289 = vmatpush3.bf16.msra.mxu0 %v550_v2  ;;  %4919 = vmatpush3.bf16.msra.mxu1 %v550_v2  ;;  %s6844_s16 = smov (!%p186_p3, %s3897_s16), 1  ;;  %v263_v20 = vld [vmem:[%s6734_s1] sm:$0x3]  ;;  %v1021_v26 = vsel %vm548_vm0, %v3956_v12, 0  ;;  %vm933_vm4 = vcmask 1046528   ;;  %vm3238_vm6 = vcmask 1045504  }
   0xe   : > { %4290 = vmatprep.mubr.msk.bf16.mxu0 %vm5002_vm1, %v6751_v1  ;;  %4326 = vmatprep.mubr.msk.bf16.mxu1 %vm5002_vm1, %v6751_v1  ;;  %s4920_s19 = smul.u32 176, %s6844_s16  ;;  %v756_v31 = vsel %vm548_vm0, %v263_v20, 0  ;;  %vm2052_vm5 = vsmask.f32 6400  ;;  %s193_s17 = scalar_lea.vmem %s6737_s4, %s6844_s16 }
   0xf   : > { %4428 = vmatprep.subr.bf16.mxu0 %v6751_v1  ;;  %4358 = vmatprep.subr.bf16.mxu1 %v6751_v1 }
  0x10   : > { %s5055_s22 = scalar_lea.vmem %s6733_s0, %s4920_s19 }
  0x11   : > { %v229_v3 = vld [vmem:[%s5055_s22 + $0x8] sm:$0xf]  ;;  %v5059_v4 = vld [vmem:[%s5055_s22 + $0xc] sm:$0xf]  ;;  %v5065_v6 = vld [vmem:[%s5055_s22 + $0x10] sm:$0xff]  }
  0x12   : > { %v5062_v5 = vcombine.low %v229_v3, %v5059_v4  ;;  %v364_v9 = vshll.u32 %v5065_v6, 16  ;;  %v5071_v10 = vld [vmem:[%s5055_s22 + $0x50] sm:$0xff]   ;;  %v5074_v11 = vld [vmem:[%s5055_s22 + $0x58] sm:$0xff]   ;;  %v5083_v14 = vld [vmem:[%s5055_s22 + $0x60] sm:$0xff]   ;;  %v368_v21 = vshrl.u32 %v5065_v6, 16 }
  0x13   : > { %v5080_v13 = vld [vmem:[%s5055_s22 + $0x18] sm:$0xff]   ;;  %v428_v17 = vshll.u32 %v5071_v10, 16  ;;  %v432_v18 = vshrl.u32 %v5071_v10, 16  ;;  %v436_v19 = vshll.u32 %v5074_v11, 16  ;;  %v440_v29 = vshrl.u32 %v5074_v11, 16  ;;  %v5106_v35 = vld [vmem:[%s5055_s22 + $0x20] sm:$0xff]  }
  0x14   : > { %v357_v7 = vshrl.u32 %v5062_v5, 16  ;;  %v359_v8 = vshll.u32 %v5062_v5, 16  ;;  %v366_v16 = vrot.slane %v364_v9, 1  ;;  %v372_v24 = vshll.u32 %v5080_v13, 16  ;;  %v5113_v38 = vld [vmem:[%s5055_s22 + $0x68] sm:$0xff]   ;;  %v5129_v48 = vld [vmem:[%s5055_s22 + $0x70] sm:$0xff]  }
  0x15   : > { %v5092_v23 = vrot.slane %v428_v17, 1  ;;  %v438_v25 = vrot.slane %v436_v19, 1  ;;  %v444_v30 = vshll.u32 %v5083_v14, 16  ;;  %v376_v40 = vshrl.u32 %v5080_v13, 16  ;;  %v5124_v45 = vld [vmem:[%s5055_s22 + $0x28] sm:$0xff]   ;;  %v5133_v49 = vld [vmem:[%s5055_s22 + $0x30] sm:$0xff]  }
  0x16   : > { %v361_v15 = vrot.slane %v359_v8, 1  ;;  %v370_v33 = vor.u32 %v368_v21, %v366_v16  ;;  %v374_v34 = vrot.slane %v372_v24, 1  ;;  %v380_v41 = vshll.u32 %v5106_v35, 16  ;;  %v5139_v53 = vld [vmem:[%s5055_s22 + $0x78] sm:$0xff]   ;;  %v5158_v8 = vld [vmem:[%s5055_s22 + $0x80] sm:$0xff]  }
  0x17   : > { %v434_v28 = vor.u32 %v432_v18, %v5092_v23  ;;  %v442_v36 = vor.u32 %v440_v29, %v438_v25  ;;  %v446_v37 = vrot.slane %v444_v30, 1  ;;  %v448_v43 = vshrl.u32 %v5083_v14, 16  ;;  %v5145_v57 = vld [vmem:[%s5055_s22 + $0x38] sm:$0xff]   ;;  %v5166_v18 = vld [vmem:[%s5055_s22 + $0x40] sm:$0xff]  }
  0x18   : > { %v362_v22 = vor.u32 %v361_v15, %v357_v7  ;;  %v375_v39 = vsel %vm355_vm2, %v370_v33, %v374_v34  ;;  %v452_v44 = vshll.u32 %v5113_v38, 16  ;;  %v378_v46 = vor.u32 %v376_v40, %v374_v34 }
  0x19   : > { %v439_v32 = vsel %vm355_vm2, %v434_v28, %v438_v25  ;;  %v447_v42 = vsel %vm355_vm2, %v442_v36, %v446_v37  ;;  %v382_v47 = vrot.slane %v380_v41, 1  ;;  %v450_v50 = vor.u32 %v448_v43, %v446_v37  ;;  %v5179_v28 = vld [vmem:[%s5055_s22 + $0x88] sm:$0xff]  }
  0x1a   : > { %v367_v27 = vsel %vm355_vm2, %v362_v22, %v366_v16  ;;  %4327 = vmatmul.mubr.msk.bf16.vlgmr.msra.gmra.mxu1 %vm496_vm3, %v439_v32  ;;  %v454_v51 = vrot.slane %v452_v44, 1  ;;  %v388_v52 = vshll.u32 %v5124_v45, 16  ;;  %v384_v55 = vshrl.u32 %v5106_v35, 16 }
  0x1b   : > { %4291 = vmatmul.mubr.msk.bf16.vlgmr.msra.gmra.mxu0 %vm496_vm3, %v367_v27  ;;  %4359 = vmatpush3.bf16.msra.mxu1 %v756_v31  ;;  %v383_v54 = vsel %vm355_vm2, %v378_v46, %v382_v47  ;;  %v460_v56 = vshll.u32 %v5129_v48, 16  ;;  %v396_v58 = vshll.u32 %v5133_v49, 16  ;;  %v456_v60 = vshrl.u32 %v5113_v38, 16  ;;  %v5204_v46 = vld [vmem:[%s5055_s22 + $0x90] ss:$0 sps:$4 sm:$0x11]  }
  0x1c   : > { %4429 = vmatpush3.bf16.msra.mxu0 %v1021_v26  ;;  %4294 = vmatprep.mubr.msk.bf16.mxu0 %vm5002_vm1, %v6751_v1  ;;  %v455_v59 = vsel %vm355_vm2, %v450_v50, %v454_v51  ;;  %v392_v61 = vshrl.u32 %v5124_v45, 16  ;;  %v390_v62 = vrot.slane %v388_v52, 1  ;;  %v468_v63 = vshll.u32 %v5139_v53, 16 }
  0x1d   : > { %4568 = vmatprep.subr.bf16.mxu0 %v6751_v1  ;;  %4330 = vmatprep.mubr.msk.bf16.mxu1 %vm5002_vm1, %v6751_v1  ;;  %v386_v0 = vor.u32 %v384_v55, %v382_v47  ;;  %v462_v2 = vrot.slane %v460_v56, 1  ;;  %v464_v3 = vshrl.u32 %v5129_v48, 16  ;;  %v404_v7 = vshll.u32 %v5145_v57, 16 }
  0x1e   : > { %4498 = vmatprep.subr.bf16.mxu1 %v6751_v1  ;;  %v398_v9 = vrot.slane %v396_v58, 1  ;;  %v400_v12 = vshrl.u32 %v5133_v49, 16  ;;  %v458_v15 = vor.u32 %v456_v60, %v454_v51  ;;  %v470_v16 = vrot.slane %v468_v63, 1 }
  0x1f   : > { %v472_v17 = vshrl.u32 %v5139_v53, 16  ;;  %v408_v19 = vshrl.u32 %v5145_v57, 16  ;;  %v391_v20 = vsel %vm355_vm2, %v386_v0, %v390_v62  ;;  %v406_v21 = vrot.slane %v404_v7, 1  ;;  %v3975_v7 = vld [vmem:[%s6734_s1 + $0x6] sm:$0x3] }
  0x20   : > { %v476_v22 = vshll.u32 %v5158_v8, 16  ;;  %v463_v24 = vsel %vm355_vm2, %v458_v15, %v462_v2  ;;  %v412_v25 = vshll.u32 %v5166_v18, 16  ;;  %v480_v26 = vshrl.u32 %v5158_v8, 16 }
  0x21   : > { %v394_v27 = vor.u32 %v392_v61, %v390_v62  ;;  %v466_v29 = vor.u32 %v464_v3, %v462_v2  ;;  %v484_v33 = vshll.u32 %v5179_v28, 16  ;;  %v402_v34 = vor.u32 %v400_v12, %v398_v9  ;;  %v927_v2 = vld [vmem:[%s5055_s22 + $0x8] sm:$0xe] }
  0x22   : > { %4331 = vmatmul.mubr.msk.bf16.gmra.mxu1 %vm496_vm3, %v447_v42  ;;  %v478_v32 = vrot.slane %v476_v22, 1  ;;  %v474_v36 = vor.u32 %v472_v17, %v470_v16  ;;  %v410_v40 = vor.u32 %v408_v19, %v406_v21  ;;  %v414_v41 = vrot.slane %v412_v25, 1  ;;  %v5198_v42 = vld [vmem:[%s5055_s22 + $0x48] sm:$0xff]   ;;  %v5259_v19 = vld [vmem:[%s5055_s22 + $0x18] sm:$0xff]  }
  0x23   : > { %4295 = vmatmul.mubr.msk.bf16.gmra.mxu0 %vm496_vm3, %v375_v39  ;;  %4334 = vmatprep.mubr.msk.bf16.mxu1 %vm5002_vm1, %v6751_v1  ;;  %v399_v30 = vsel %vm355_vm2, %v394_v27, %v398_v9  ;;  %v471_v31 = vsel %vm355_vm2, %v466_v29, %v470_v16  ;;  %v407_v37 = vsel %vm355_vm2, %v402_v34, %v406_v21  ;;  %v486_v44 = vrot.slane %v484_v33, 1 }
  0x24   : > { %4298 = vmatprep.mubr.msk.bf16.mxu0 %vm5002_vm1, %v6751_v1  ;;  %v479_v39 = vsel %vm355_vm2, %v474_v36, %v478_v32  ;;  %v482_v43 = vor.u32 %v480_v26, %v478_v32  ;;  %v415_v47 = vsel %vm355_vm2, %v410_v40, %v414_v41  ;;  %v416_v50 = vshrl.u32 %v5166_v18, 16 }
  0x25   : > { %v420_v51 = vshll.u32 %v5198_v42, 16  ;;  %v492_v55 = vshll.u32 %v5204_v46, 16  ;;  %v424_v62 = vshrl.u32 %v5198_v42, 16  ;;  %v3957_v9 = vcombine.low %v927_v2, %v5059_v4  ;;  %v4011_v4 = vld [vmem:[%s6734_s1 + $0x8] sm:$0x3] }
  0x26   : > { %v487_v52 = vsel %vm355_vm2, %v482_v43, %v486_v44  ;;  %v418_v56 = vor.u32 %v416_v50, %v414_v41  ;;  %v1543_v12 = vsel %vm548_vm0, %v3975_v7, 0  ;;  %v935_v16 = vrot.slane %v5065_v6, 1 }
  0x27   : > { %v422_v58 = vrot.slane %v420_v51, 1  ;;  %v494_v60 = vrot.slane %v492_v55, 1  ;;  %v934_v15 = vrot.slane %v3957_v9, 1  ;;  %v1841_v17 = vsel %vm548_vm0, %v4011_v4, 0 }
  0x28   : > { %v1359_v21 = vshll.u32 %v5259_v19, 16  ;;  %v1363_v22 = vshrl.u32 %v5259_v19, 16  ;;  %v947_v32 = vrot.slane %v5166_v18, 1  ;;  %v949_v33 = vrot.slane %v5198_v42, 1 }
  0x29   : > { %v423_v61 = vsel %vm355_vm2, %v418_v56, %v422_v58  ;;  %v426_v0 = vor.u32 %v424_v62, %v422_v58  ;;  %v951_v34 = vrot.slane %v5071_v10, 1  ;;  %v953_v36 = vrot.slane %v5074_v11, 1 }
  0x2a   : > { %4335 = vmatmul.mubr.msk.bf16.gmra.mxu1 %vm496_vm3, %v455_v59  ;;  %v2062_v25 = vrot.slane %v1359_v21, 2  ;;  %v957_v40 = vrot.slane %v5113_v38, 1  ;;  %v959_v41 = vrot.slane %v5129_v48, 1  ;;  %v963_v43 = vrot.slane %v5158_v8, 1 }
  0x2b   : > { %4299 = vmatmul.mubr.msk.bf16.gmra.mxu0 %vm496_vm3, %v383_v54  ;;  %4338 = vmatprep.mubr.msk.bf16.mxu1 %vm5002_vm1, %v6751_v1  ;;  %v488_v54 = vshrl.u32 %v5179_v28, 16  ;;  %v431_v3 = vsel %vm355_vm2, %v426_v0, %v5092_v23  ;;  %v936_v23 = vsel %vm933_vm4, %v934_v15, %v935_v16  ;;  %v965_v51 = vrot.slane %v5179_v28, 1 }
  0x2c   : > { %4302 = vmatprep.mubr.msk.bf16.mxu0 %vm5002_vm1, %v6751_v1  ;;  %v967_v58 = vrot.slane %v5204_v46, 1  ;;  %v1361_v62 = vrot.slane %v1359_v21, 1 }
  0x2d   : > { %v490_v59 = vor.u32 %v488_v54, %v486_v44  ;;  %v1226_v44 = vld [vmem:[%s5055_s22 + $0x10] sm:$0xf] }
  0x2e   : > { %v968_v46 = vsel %vm933_vm4, %v965_v51, %v967_v58 }
  0x2f   : > { %v495_v63 = vsel %vm355_vm2, %v490_v59, %v494_v60  ;;  %v1748_v60 = vld [vmem:[%s5055_s22 + $0x10] sm:$0xe] }
  0x32   : > { %4339 = vmatmul.mubr.msk.bf16.gmra.mxu1 %vm496_vm3, %v463_v24  ;;  %v2061_v24 = vrot.slane %v1363_v22, 1 }
  0x33   : > { %4303 = vmatmul.mubr.msk.bf16.gmra.mxu0 %vm496_vm3, %v391_v20  ;;  %4342 = vmatprep.mubr.msk.bf16.mxu1 %vm5002_vm1, %v6751_v1 }
  0x34   : > { %4306 = vmatprep.mubr.msk.bf16.mxu0 %vm5002_vm1, %v6751_v1  ;;  %v5276_v26 = vor.u32 %v2062_v25, %v2061_v24  ;;  %v4049_v25 = vld [vmem:[%s6734_s1 + $0xc] sm:$0x3] }
  0x3a   : > { %4343 = vmatmul.mubr.msk.bf16.gmra.mxu1 %vm496_vm3, %v471_v31  ;;  %v945_v31 = vrot.slane %v5145_v57, 1 }
  0x3b   : > { %4307 = vmatmul.mubr.msk.bf16.gmra.mxu0 %vm496_vm3, %v399_v30  ;;  %4346 = vmatprep.mubr.msk.bf16.mxu1 %vm5002_vm1, %v6751_v1  ;;  %v943_v30 = vrot.slane %v5133_v49, 1 }
  0x3c   : > { %4310 = vmatprep.mubr.msk.bf16.mxu0 %vm5002_vm1, %v6751_v1 }
  0x42   : > { %4347 = vmatmul.mubr.msk.bf16.gmra.mxu1 %vm496_vm3, %v479_v39  ;;  %v955_v39 = vrot.slane %v5083_v14, 1 }
  0x43   : > { %4311 = vmatmul.mubr.msk.bf16.gmra.mxu0 %vm496_vm3, %v407_v37  ;;  %4350 = vmatprep.mubr.msk.bf16.mxu1 %vm5002_vm1, %v6751_v1  ;;  %v954_v37 = vsel %vm933_vm4, %v951_v34, %v953_v36 }
  0x44   : > { %4314 = vmatprep.mubr.msk.bf16.mxu0 %vm5002_vm1, %v6751_v1 }
  0x4a   : > { %4351 = vmatmul.mubr.msk.bf16.gmra.mxu1 %vm496_vm3, %v487_v52  ;;  %v966_v52 = vsel %vm933_vm4, %v963_v43, %v965_v51 }
  0x4b   : > { %4315 = vmatmul.mubr.msk.bf16.gmra.mxu0 %vm496_vm3, %v415_v47  ;;  %4354 = vmatprep.mubr.msk.bf16.mxu1 %vm5002_vm1, %v6751_v1 }
  0x4c   : > { %4318 = vmatprep.mubr.msk.bf16.mxu0 %vm5002_vm1, %v6751_v1 }
  0x52   : > { %4355 = vmatmul.mubr.msk.bf16.gmra.mxu1 %vm496_vm3, %v495_v63  ;;  %v5414_v63 = vld [vmem:[%s5055_s22 + $0x20] sm:$0xff]  }
  0x53   : > { %4319 = vmatmul.mubr.msk.bf16.gmra.mxu0 %vm496_vm3, %v423_v61  ;;  %4360 = vmatprep.mubr.msk.bf16.mxu1 %vm5002_vm1, %v6751_v1  ;;  %v1367_v15 = vshll.u32 %v5414_v63, 16 }
  0x54   : > { %4322 = vmatprep.mubr.msk.bf16.mxu0 %vm5002_vm1, %v6751_v1 }
  0x55   : > { %v1369_v24 = vrot.slane %v1367_v15, 1 }
  0x5a   : > { %4361 = vmatmul.mubr.msk.bf16.vlgmr.msra.gmra.mxu1 %vm496_vm3, %v5062_v5  ;;  %v937_v5 = vrot.slane %v5080_v13, 1 }
  0x5b   : > { %4323 = vmatmul.mubr.msk.bf16.gmra.mxu0 %vm496_vm3, %v431_v3  ;;  %4499 = vmatpush3.bf16.msra.mxu1 %v1543_v12 }
  0x5c   : > { %4430 = vmatprep.mubr.msk.bf16.mxu0 %vm5002_vm1, %v6751_v1  ;;  %4364 = vmatprep.mubr.msk.bf16.mxu1 %vm5002_vm1, %v6751_v1  ;;  %v938_v20 = vsel %vm933_vm4, %v935_v16, %v937_v5 }
  0x5d   : > { %4638 = vmatprep.subr.bf16.mxu1 %v6751_v1 }
  0x62   : > { %4365 = vmatmul.mubr.msk.bf16.gmra.mxu1 %vm496_vm3, %v5065_v6  ;;  %v939_v6 = vrot.slane %v5106_v35, 1 }
  0x63   : > { %4431 = vmatmul.mubr.msk.bf16.vlgmr.msra.gmra.mxu0 %vm496_vm3, %v936_v23  ;;  %4368 = vmatprep.mubr.msk.bf16.mxu1 %vm5002_vm1, %v6751_v1 }
  0x64   : > { %4569 = vmatpush3.bf16.msra.mxu0 %v1841_v17  ;;  %4434 = vmatprep.mubr.msk.bf16.mxu0 %vm5002_vm1, %v6751_v1  ;;  %v940_v27 = vsel %vm933_vm4, %v937_v5, %v939_v6  ;;  %v1755_v5 = vrot.slane %v5259_v19, 1  ;;  %v2603_v19 = vsel %vm548_vm0, %v4049_v25, 0 }
  0x65   : > { %4708 = vmatprep.subr.bf16.mxu0 %v6751_v1 }
  0x6a   : > { %4369 = vmatmul.mubr.msk.bf16.gmra.mxu1 %vm496_vm3, %v5080_v13  ;;  %v941_v13 = vrot.slane %v5124_v45, 1 }
  0x6b   : > { %4435 = vmatmul.mubr.msk.bf16.gmra.mxu0 %vm496_vm3, %v938_v20  ;;  %4372 = vmatprep.mubr.msk.bf16.mxu1 %vm5002_vm1, %v6751_v1 }
  0x6c   : > { %4438 = vmatprep.mubr.msk.bf16.mxu0 %vm5002_vm1, %v6751_v1  ;;  %v942_v29 = vsel %vm933_vm4, %v939_v6, %v941_v13  ;;  %v1365_v6 = vor.u32 %v1363_v22, %v1361_v62 }
  0x6e   : > { %v1370_v22 = vsel %vm355_vm2, %v1365_v6, %v1369_v24 }
  0x72   : > { %4373 = vmatmul.mubr.msk.bf16.gmra.mxu1 %vm496_vm3, %v5106_v35  ;;  %v944_v35 = vsel %vm933_vm4, %v941_v13, %v943_v30 }
  0x73   : > { %4439 = vmatmul.mubr.msk.bf16.gmra.mxu0 %vm496_vm3, %v940_v27  ;;  %4376 = vmatprep.mubr.msk.bf16.mxu1 %vm5002_vm1, %v6751_v1  ;;  %v5447_v27 = vld [vmem:[%s5055_s22 + $0x28] sm:$0xff]  }
  0x74   : > { %4442 = vmatprep.mubr.msk.bf16.mxu0 %vm5002_vm1, %v6751_v1 }
  0x7a   : > { %4377 = vmatmul.mubr.msk.bf16.gmra.mxu1 %vm496_vm3, %v5124_v45  ;;  %v946_v45 = vsel %vm933_vm4, %v943_v30, %v945_v31 }
  0x7b   : > { %4443 = vmatmul.mubr.msk.bf16.gmra.mxu0 %vm496_vm3, %v942_v29  ;;  %4380 = vmatprep.mubr.msk.bf16.mxu1 %vm5002_vm1, %v6751_v1 }
  0x7c   : > { %4446 = vmatprep.mubr.msk.bf16.mxu0 %vm5002_vm1, %v6751_v1 }
  0x82   : > { %4381 = vmatmul.mubr.msk.bf16.gmra.mxu1 %vm496_vm3, %v5133_v49  ;;  %v948_v49 = vsel %vm933_vm4, %v945_v31, %v947_v32 }
  0x83   : > { %4447 = vmatmul.mubr.msk.bf16.gmra.mxu0 %vm496_vm3, %v944_v35  ;;  %4384 = vmatprep.mubr.msk.bf16.mxu1 %vm5002_vm1, %v6751_v1 }
  0x84   : > { %4450 = vmatprep.mubr.msk.bf16.mxu0 %vm5002_vm1, %v6751_v1 }
  0x8a   : > { %4385 = vmatmul.mubr.msk.bf16.gmra.mxu1 %vm496_vm3, %v5145_v57  ;;  %v950_v57 = vsel %vm933_vm4, %v947_v32, %v949_v33  ;;  %v1375_v32 = vshll.u32 %v5447_v27, 16 }
  0x8b   : > { %4451 = vmatmul.mubr.msk.bf16.gmra.mxu0 %vm496_vm3, %v946_v45  ;;  %4388 = vmatprep.mubr.msk.bf16.mxu1 %vm5002_vm1, %v6751_v1  ;;  %v1371_v45 = vshrl.u32 %v5414_v63, 16 }
  0x8c   : > { %4454 = vmatprep.mubr.msk.bf16.mxu0 %vm5002_vm1, %v6751_v1 }
  0x92   : > { %4389 = vmatmul.mubr.msk.bf16.gmra.mxu1 %vm496_vm3, %v5166_v18  ;;  %v952_v18 = vsel %vm933_vm4, %v949_v33, %v951_v34 }
  0x93   : > { %4455 = vmatmul.mubr.msk.bf16.gmra.mxu0 %vm496_vm3, %v948_v49  ;;  %4392 = vmatprep.mubr.msk.bf16.mxu1 %vm5002_vm1, %v6751_v1 }
  0x94   : > { %4458 = vmatprep.mubr.msk.bf16.mxu0 %vm5002_vm1, %v6751_v1 }
  0x9a   : > { %4393 = vmatmul.mubr.msk.bf16.gmra.mxu1 %vm496_vm3, %v5198_v42  ;;  %v961_v42 = vrot.slane %v5139_v53, 1 }
  0x9b   : > { %4459 = vmatmul.mubr.msk.bf16.gmra.mxu0 %vm496_vm3, %v950_v57  ;;  %4396 = vmatprep.mubr.msk.bf16.mxu1 %vm5002_vm1, %v6751_v1  ;;  %v1757_v57 = vrot.slane %v5414_v63, 1 }
  0x9c   : > { %4462 = vmatprep.mubr.msk.bf16.mxu0 %vm5002_vm1, %v6751_v1  ;;  %v964_v47 = vsel %vm933_vm4, %v961_v42, %v963_v43 }
  0xa2   : > { %4397 = vmatmul.mubr.msk.bf16.gmra.mxu1 %vm496_vm3, %v5071_v10  ;;  %v956_v10 = vsel %vm933_vm4, %v953_v36, %v955_v39  ;;  %v2066_v36 = vrot.slane %v1367_v15, 2 }
  0xa3   : > { %4463 = vmatmul.mubr.msk.bf16.gmra.mxu0 %vm496_vm3, %v952_v18  ;;  %4400 = vmatprep.mubr.msk.bf16.mxu1 %vm5002_vm1, %v6751_v1 }
  0xa4   : > { %4466 = vmatprep.mubr.msk.bf16.mxu0 %vm5002_vm1, %v6751_v1 }
  0xaa   : > { %4401 = vmatmul.mubr.msk.bf16.gmra.mxu1 %vm496_vm3, %v5074_v11  ;;  %v958_v11 = vsel %vm933_vm4, %v955_v39, %v957_v40  ;;  %v1377_v39 = vrot.slane %v1375_v32, 1 }
  0xab   : > { %4467 = vmatmul.mubr.msk.bf16.gmra.mxu0 %vm496_vm3, %v954_v37  ;;  %4404 = vmatprep.mubr.msk.bf16.mxu1 %vm5002_vm1, %v6751_v1  ;;  %v1373_v37 = vor.u32 %v1371_v45, %v1369_v24 }
  0xac   : > { %4470 = vmatprep.mubr.msk.bf16.mxu0 %vm5002_vm1, %v6751_v1 }
  0xad   : > { %v1378_v43 = vsel %vm355_vm2, %v1373_v37, %v1377_v39 }
  0xb2   : > { %4405 = vmatmul.mubr.msk.bf16.gmra.mxu1 %vm496_vm3, %v5083_v14  ;;  %v960_v14 = vsel %vm933_vm4, %v957_v40, %v959_v41  ;;  %v5472_v40 = vld [vmem:[%s5055_s22 + $0x30] sm:$0xff]  }
  0xb3   : > { %4471 = vmatmul.mubr.msk.bf16.gmra.mxu0 %vm496_vm3, %v956_v10  ;;  %4408 = vmatprep.mubr.msk.bf16.mxu1 %vm5002_vm1, %v6751_v1  ;;  %v2065_v10 = vrot.slane %v1371_v45, 1  ;;  %v6748_v15 = vshrl.u32 %v5472_v40, 16 }
  0xb4   : > { %4474 = vmatprep.mubr.msk.bf16.mxu0 %vm5002_vm1, %v6751_v1 }
  0xba   : > { %4409 = vmatmul.mubr.msk.bf16.gmra.mxu1 %vm496_vm3, %v5113_v38  ;;  %v962_v38 = vsel %vm933_vm4, %v959_v41, %v961_v42 }
  0xbb   : > { %4475 = vmatmul.mubr.msk.bf16.gmra.mxu0 %vm496_vm3, %v958_v11  ;;  %4412 = vmatprep.mubr.msk.bf16.mxu1 %vm5002_vm1, %v6751_v1 }
  0xbc   : > { %4478 = vmatprep.mubr.msk.bf16.mxu0 %vm5002_vm1, %v6751_v1 }
  0xc2   : > { %4413 = vmatmul.mubr.msk.bf16.gmra.mxu1 %vm496_vm3, %v5129_v48  ;;  %v1227_v48 = vld [vmem:[%s5055_s22 + $0x14] sm:$0xf] }
  0xc3   : > { %4479 = vmatmul.mubr.msk.bf16.gmra.mxu0 %vm496_vm3, %v960_v14  ;;  %4416 = vmatprep.mubr.msk.bf16.mxu1 %vm5002_vm1, %v6751_v1  ;;  %v3976_v50 = vcombine.low %v1226_v44, %v1227_v48  ;;  %v5422_v3 = vcombine.low %v1748_v60, %v1227_v48  ;;  %v1758_v14 = vsel %vm933_vm4, %v1755_v5, %v1757_v57  ;;  %v1379_v44 = vshrl.u32 %v5447_v27, 16 }
  0xc4   : > { %4482 = vmatprep.mubr.msk.bf16.mxu0 %vm5002_vm1, %v6751_v1  ;;  %v6747_v48 = vshll.u32 %v5472_v40, 16 }
  0xc5   : > { %v1352_v54 = vshrl.u32 %v3976_v50, 16  ;;  %v1754_v17 = vrot.slane %v5422_v3, 1  ;;  %v1381_v58 = vor.u32 %v1379_v44, %v1377_v39 }
  0xc6   : > { %v1385_v60 = vrot.slane %v6747_v48, 1 }
  0xc7   : > { %v1756_v30 = vsel %vm933_vm4, %v1754_v17, %v1755_v5 }
  0xca   : > { %4417 = vmatmul.mubr.msk.bf16.gmra.mxu1 %vm496_vm3, %v5139_v53  ;;  %v1354_v53 = vshll.u32 %v3976_v50, 16 }
  0xcb   : > { %4483 = vmatmul.mubr.msk.bf16.gmra.mxu0 %vm496_vm3, %v962_v38  ;;  %4420 = vmatprep.mubr.msk.bf16.mxu1 %vm5002_vm1, %v6751_v1 }
  0xcc   : > { %4486 = vmatprep.mubr.msk.bf16.mxu0 %vm5002_vm1, %v6751_v1  ;;  %v1356_v55 = vrot.slane %v1354_v53, 1  ;;  %v1759_v53 = vrot.slane %v5447_v27, 1  ;;  %v1389_v27 = vor.u32 %v6748_v15, %v1385_v60 }
  0xce   : > { %v1357_v61 = vor.u32 %v1356_v55, %v1352_v54 }
  0xd0   : > { %v1362_v12 = vsel %vm355_vm2, %v1357_v61, %v1361_v62  ;;  %v5500_v61 = vld [vmem:[%s5055_s22 + $0x38] sm:$0xff]  }
  0xd1   : > { %v1763_v39 = vrot.slane %v5500_v61, 1 }
  0xd2   : > { %4421 = vmatmul.mubr.msk.bf16.gmra.mxu1 %vm496_vm3, %v5158_v8 }
  0xd3   : > { %4487 = vmatmul.mubr.msk.bf16.gmra.mxu0 %vm496_vm3, %v964_v47  ;;  %4424 = vmatprep.mubr.msk.bf16.mxu1 %vm5002_vm1, %v6751_v1  ;;  %v2067_v47 = vor.u32 %v2066_v36, %v2065_v10 }
  0xd4   : > { %4490 = vmatprep.mubr.msk.bf16.mxu0 %vm5002_vm1, %v6751_v1 }
  0xda   : > { %v5404_v59 = vpop.f32.mrf.mxu1  ;;  %4425 = vmatmul.mubr.msk.bf16.gmra.mxu1 %vm496_vm3, %v5179_v28  ;;  %v4030_v28 = vld [vmem:[%s6734_s1 + $0xa] sm:$0x3] }
  0xdb   : > { %v5398_v56 = vpop.f32.mrf.mxu0  ;;  %4491 = vmatmul.mubr.msk.bf16.gmra.mxu0 %vm496_vm3, %v966_v52  ;;  %4500 = vmatprep.mubr.msk.bf16.mxu1 %vm5002_vm1, %v6751_v1  ;;  %v2186_v23 = vsel %vm548_vm0, %v4030_v28, 0  ;;  %v5490_v52 = vsel %vm2052_vm5, %v5276_v26, %v2067_v47 }
  0xdc   : > { %4494 = vmatprep.mubr.msk.bf16.mxu0 %vm5002_vm1, %v6751_v1  ;;  %v4328_v0 = vpop.f32.mrf.mxu1 }
  0xdd   : > { %v4292_v8 = vpop.f32.mrf.mxu0  ;;  %v1760_v0 = vsel %vm933_vm4, %v1757_v57, %v1759_v53  ;;  %v6744_v57 = vshrl.u32 %v5500_v61, 16 }
  0xde   : > { %v5424_v7 = vpop.f32.mrf.mxu1  ;;  %v2070_v8 = vrot.slane %v1375_v32, 2 }
  0xdf   : > { %v5416_v2 = vpop.f32.mrf.mxu0 }
  0xe0   : > { %v4329_v16 = vpop.f32.mrf.mxu1 }
  0xe1   : > { %v4293_v9 = vpop.f32.mrf.mxu0  ;;  %v6743_v16 = vshll.u32 %v5500_v61, 16 }
  0xe2   : > { %v5436_v20 = vpop.f32.mrf.mxu1  ;;  %4501 = vmatmul.mubr.msk.bf16.vlgmr.msra.gmra.mxu1 %vm496_vm3, %v1362_v12  ;;  %v1386_v12 = vsel %vm355_vm2, %v1381_v58, %v1385_v60 }
  0xe3   : > { %v5428_v4 = vpop.f32.mrf.mxu0  ;;  %4495 = vmatmul.mubr.msk.bf16.gmra.mxu0 %vm496_vm3, %v968_v46  ;;  %4639 = vmatpush3.bf16.msra.mxu1 %v2186_v23  ;;  %v2069_v46 = vrot.slane %v1379_v44, 1 }
  0xe4   : > { %4570 = vmatprep.mubr.msk.bf16.mxu0 %vm5002_vm1, %v6751_v1  ;;  %4504 = vmatprep.mubr.msk.bf16.mxu1 %vm5002_vm1, %v6751_v1  ;;  %v4332_v13 = vpop.f32.mrf.mxu1 }
  0xe5   : > { %v4296_v21 = vpop.f32.mrf.mxu0  ;;  %4778 = vmatprep.subr.bf16.mxu1 %v6751_v1  ;;  %v5510_v23 = vor.u32 %v2070_v8, %v2069_v46  ;;  %v1393_v13 = vrot.slane %v6743_v16, 1 }
  0xe6   : > { %v5453_v35 = vpop.f32.mrf.mxu1  ;;  %v1761_v21 = vrot.slane %v5472_v40, 1 }
  0xe7   : > { %v5449_v29 = vpop.f32.mrf.mxu0  ;;  %v5520_v6 = vsel %vm2052_vm5, %v2067_v47, %v5510_v23 }
  0xe8   : > { %v4333_v49 = vpop.f32.mrf.mxu1 }
  0xe9   : > { %v4297_v31 = vpop.f32.mrf.mxu0  ;;  %v1394_v49 = vsel %vm355_vm2, %v1389_v27, %v1393_v13 }
  0xea   : > { %v5465_v34 = vpop.f32.mrf.mxu1  ;;  %4505 = vmatmul.mubr.msk.bf16.gmra.mxu1 %vm496_vm3, %v1370_v22  ;;  %v1762_v22 = vsel %vm933_vm4, %v1759_v53, %v1761_v21 }
  0xeb   : > { %v5459_v33 = vpop.f32.mrf.mxu0  ;;  %4571 = vmatmul.mubr.msk.bf16.vlgmr.msra.gmra.mxu0 %vm496_vm3, %v1756_v30  ;;  %4508 = vmatprep.mubr.msk.bf16.mxu1 %vm5002_vm1, %v6751_v1  ;;  %v5532_v30 = vld [vmem:[%s5055_s22 + $0x40] sm:$0xff]  }
  0xec   : > { %4709 = vmatpush3.bf16.msra.mxu0 %v2603_v19  ;;  %4574 = vmatprep.mubr.msk.bf16.mxu0 %vm5002_vm1, %v6751_v1  ;;  %v4336_v11 = vpop.f32.mrf.mxu1  ;;  %v6742_v8 = vshrl.u32 %v5532_v30, 16  ;;  %v1765_v46 = vrot.slane %v5532_v30, 1 }
  0xed   : > { %v4300_v18 = vpop.f32.mrf.mxu0  ;;  %4848 = vmatprep.subr.bf16.mxu0 %v6751_v1 }
  0xee   : > { %v5477_v42 = vpop.f32.mrf.mxu1  ;;  %v6741_v18 = vshll.u32 %v5532_v30, 16 }
  0xef   : > { %v5474_v41 = vpop.f32.mrf.mxu0 }
  0xf0   : > { %v4337_v50 = vpop.f32.mrf.mxu1 }
  0xf1   : > { %v4301_v38 = vpop.f32.mrf.mxu0  ;;  %v1764_v50 = vsel %vm933_vm4, %v1761_v21, %v1763_v39 }
  0xf2   : > { %v5492_v54 = vpop.f32.mrf.mxu1  ;;  %4509 = vmatmul.mubr.msk.bf16.gmra.mxu1 %vm496_vm3, %v1378_v43  ;;  %v1401_v38 = vrot.slane %v6741_v18, 1  ;;  %v5558_v43 = vld [vmem:[%s5055_s22 + $0x48] sm:$0xff]  }
  0xf3   : > { %v5482_v51 = vpop.f32.mrf.mxu0  ;;  %4575 = vmatmul.mubr.msk.bf16.gmra.mxu0 %vm496_vm3, %v1758_v14  ;;  %4512 = vmatprep.mubr.msk.bf16.mxu1 %vm5002_vm1, %v6751_v1  ;;  %v1397_v14 = vor.u32 %v6744_v57, %v1393_v13  ;;  %v6738_v60 = vshll.u32 %v5558_v43, 16 }
  0xf4   : > { %4578 = vmatprep.mubr.msk.bf16.mxu0 %vm5002_vm1, %v6751_v1  ;;  %v4340_v62 = vpop.f32.mrf.mxu1 }
  0xf5   : > { %v4304_v55 = vpop.f32.mrf.mxu0  ;;  %v1402_v58 = vsel %vm355_vm2, %v1397_v14, %v1401_v38  ;;  %v1409_v21 = vrot.slane %v6738_v60, 1 }
  0xf6   : > { %v5505_v28 = vpop.f32.mrf.mxu1 }
  0xf7   : > { %v5502_v63 = vpop.f32.mrf.mxu0 }
  0xf8   : > { %v4341_v17 = vpop.f32.mrf.mxu1 }
  0xf9   : > { %v4305_v9 = vpop.f32.mrf.mxu0  ;;  %v1405_v17 = vor.u32 %v6742_v8, %v1401_v38 }
  0xfa   : > { %v5522_v24 = vpop.f32.mrf.mxu1  ;;  %4513 = vmatmul.mubr.msk.bf16.gmra.mxu1 %vm496_vm3, %v1386_v12 }
  0xfb   : > { %v5512_v5 = vpop.f32.mrf.mxu0  ;;  %4579 = vmatmul.mubr.msk.bf16.gmra.mxu0 %vm496_vm3, %v1760_v0  ;;  %4516 = vmatprep.mubr.msk.bf16.mxu1 %vm5002_vm1, %v6751_v1 }
  0xfc   : > { %4582 = vmatprep.mubr.msk.bf16.mxu0 %vm5002_vm1, %v6751_v1  ;;  %v4344_v31 = vpop.f32.mrf.mxu1 }
  0xfd   : > { %v4308_v25 = vpop.f32.mrf.mxu0  ;;  %v1766_v31 = vsel %vm933_vm4, %v1763_v39, %v1765_v46  ;;  %v1767_v39 = vrot.slane %v5558_v43, 1 }
  0xfe   : > { %v5537_v45 = vpop.f32.mrf.mxu1  ;;  %v5584_v25 = vld [vmem:[%s5055_s22 + $0x50] sm:$0xff]  }
  0xff   : > { %v5534_v19 = vpop.f32.mrf.mxu0 }
 0x100   : > { %v4345_v36 = vpop.f32.mrf.mxu1 }
 0x101   : > { %v4309_v32 = vpop.f32.mrf.mxu0  ;;  %v6740_v36 = vshrl.u32 %v5558_v43, 16 }
 0x102   : > { %v5548_v10 = vpop.f32.mrf.mxu1  ;;  %4517 = vmatmul.mubr.msk.bf16.gmra.mxu1 %vm496_vm3, %v1394_v49  ;;  %v1410_v49 = vsel %vm355_vm2, %v1405_v17, %v1409_v21 }
 0x103   : > { %v5542_v37 = vpop.f32.mrf.mxu0  ;;  %4583 = vmatmul.mubr.msk.bf16.gmra.mxu0 %vm496_vm3, %v1762_v22  ;;  %4520 = vmatprep.mubr.msk.bf16.mxu1 %vm5002_vm1, %v6751_v1 }
 0x104   : > { %4586 = vmatprep.mubr.msk.bf16.mxu0 %vm5002_vm1, %v6751_v1  ;;  %v4348_v44 = vpop.f32.mrf.mxu1 }
 0x105   : > { %v4312_v11 = vpop.f32.mrf.mxu0 }
 0x106   : > { %v5563_v53 = vpop.f32.mrf.mxu1  ;;  %v6739_v11 = vshll.u32 %v5584_v25, 16 }
 0x107   : > { %v5560_v47 = vpop.f32.mrf.mxu0 }
 0x108   : > { %v4349_v62 = vpop.f32.mrf.mxu1 }
 0x109   : > { %v4313_v55 = vpop.f32.mrf.mxu0  ;;  %v5610_v62 = vld [vmem:[%s5055_s22 + $0x58] sm:$0xff]  }
 0x10a   : > { %v5574_v9 = vpop.f32.mrf.mxu1  ;;  %4521 = vmatmul.mubr.msk.bf16.gmra.mxu1 %vm496_vm3, %v1402_v58  ;;  %v1413_v55 = vor.u32 %v6740_v36, %v1409_v21  ;;  %v1417_v58 = vrot.slane %v6739_v11, 1  ;;  %v6746_v21 = vshll.u32 %v5610_v62, 16  ;;  %v5634_v11 = vld [vmem:[%s5055_s22 + $0x60] sm:$0xff]   ;;  %v6749_v57 = vshrl.u32 %v5610_v62, 16 }
 0x10b   : > { %v5568_v0 = vpop.f32.mrf.mxu0  ;;  %4587 = vmatmul.mubr.msk.bf16.gmra.mxu0 %vm496_vm3, %v1764_v50  ;;  %4524 = vmatprep.mubr.msk.bf16.mxu1 %vm5002_vm1, %v6751_v1  ;;  %6774 = vst [vmem:[#allocation2_spill] sm:$0xff] %v5634_v11 }
 0x10c   : > { %4590 = vmatprep.mubr.msk.bf16.mxu0 %vm5002_vm1, %v6751_v1  ;;  %v4352_v27 = vpop.f32.mrf.mxu1 }
 0x10d   : > { %v4316_v12 = vpop.f32.mrf.mxu0  ;;  %v1768_v27 = vsel %vm933_vm4, %v1765_v46, %v1767_v39  ;;  %v1769_v46 = vrot.slane %v5584_v25, 1 }
 0x10e   : > { %v5589_v22 = vpop.f32.mrf.mxu1 }
 0x10f   : > { %v5586_v13 = vpop.f32.mrf.mxu0  ;;  %v1770_v18 = vsel %vm933_vm4, %v1767_v39, %v1769_v46 }
 0x110   : > { %v4353_v14 = vpop.f32.mrf.mxu1 }
 0x111   : > { %v4317_v32 = vpop.f32.mrf.mxu0  ;;  %v6745_v14 = vshrl.u32 %v5584_v25, 16 }
 0x112   : > { %v5600_v44 = vpop.f32.mrf.mxu1  ;;  %4525 = vmatmul.mubr.msk.bf16.gmra.mxu1 %vm496_vm3, %v1410_v49  ;;  %v1418_v49 = vsel %vm355_vm2, %v1413_v55, %v1417_v58 }
 0x113   : > { %v5594_v38 = vpop.f32.mrf.mxu0  ;;  %4591 = vmatmul.mubr.msk.bf16.gmra.mxu0 %vm496_vm3, %v1766_v31  ;;  %4528 = vmatprep.mubr.msk.bf16.mxu1 %vm5002_vm1, %v6751_v1  ;;  %v1421_v55 = vor.u32 %v6745_v14, %v1417_v58  ;;  %v6750_v58 = vshll.u32 %v5634_v11, 16 }
 0x114   : > { %4594 = vmatprep.mubr.msk.bf16.mxu0 %vm5002_vm1, %v6751_v1  ;;  %v4356_v12 = vpop.f32.mrf.mxu1 }
 0x115   : > { %v4320_v50 = vpop.f32.mrf.mxu0 }
 0x116   : > { %v5615_v31 = vpop.f32.mrf.mxu1 }
 0x117   : > { %v5612_v17 = vpop.f32.mrf.mxu0 }
 0x118   : > { %v4357_v50 = vpop.f32.mrf.mxu1 }
 0x119   : > { %v4321_v32 = vpop.f32.mrf.mxu0  ;;  %v1425_v50 = vrot.slane %v6746_v21, 1 }
 0x11a   : > { %v792_v12 = vpop.f32.mrf.mxu1  ;;  %4529 = vmatmul.mubr.msk.bf16.gmra.mxu1 %vm496_vm3, %v1418_v49 }
 0x11b   : > { %v5620_v60 = vpop.f32.mrf.mxu0  ;;  %4595 = vmatmul.mubr.msk.bf16.gmra.mxu0 %vm496_vm3, %v1768_v27  ;;  %4532 = vmatprep.mubr.msk.bf16.mxu1 %vm5002_vm1, %v6751_v1  ;;  %v793_v49 = vadd.f32 %v792_v12, %v5398_v56 }
 0x11c   : > { %4598 = vmatprep.mubr.msk.bf16.mxu0 %vm5002_vm1, %v6751_v1  ;;  %v4362_v27 = vpop.f32.mrf.mxu1 }
 0x11d   : > { %v4324_v32 = vpop.f32.mrf.mxu0 }
 0x11e   : > { %v795_v8 = vpop.f32.mrf.mxu1  ;;  %v1426_v32 = vsel %vm355_vm2, %v1421_v55, %v1425_v50 }
 0x11f   : > { %v5636_v36 = vpop.f32.mrf.mxu0  ;;  %v796_v12 = vadd.f32 %v795_v8, %v5416_v2 }
 0x120   : > { %v4363_v14 = vpop.f32.mrf.mxu1 }
 0x121   : > { %v4325_v16 = vpop.f32.mrf.mxu0  ;;  %v1429_v14 = vor.u32 %v6749_v57, %v1425_v50  ;;  %v6753_v50 = vshrl.u32 %v5634_v11, 16 }
 0x122   : > { %v1771_v16 = vrot.slane %v5610_v62, 1  ;;  %v800_v39 = vpop.f32.mrf.mxu1  ;;  %4533 = vmatmul.mubr.msk.bf16.gmra.mxu1 %vm496_vm3, %v1426_v32 }
 0x123   : > { %v1057_v21 = vpop.f32.mrf.mxu0  ;;  %4599 = vmatmul.mubr.msk.bf16.gmra.mxu0 %vm496_vm3, %v1770_v18  ;;  %4536 = vmatprep.mubr.msk.bf16.mxu1 %vm5002_vm1, %v6751_v1  ;;  %v1433_v18 = vrot.slane %v6750_v58, 1  ;;  %v801_v2 = vadd.f32 %v800_v39, %v5428_v4 }
 0x124   : > { %v5644_v27 = vadd.f32 %v1057_v21, %v793_v49  ;;  %4602 = vmatprep.mubr.msk.bf16.mxu0 %vm5002_vm1, %v6751_v1  ;;  %v5658_v21 = vld [vmem:[%s5055_s22 + $0x68] sm:$0xff]   ;;  %v4366_v55 = vpop.f32.mrf.mxu1  ;;  %v1772_v32 = vsel %vm933_vm4, %v1769_v46, %v1771_v16 }
 0x125   : > { %v4432_v56 = vpop.f32.mrf.mxu0  ;;  %v1434_v8 = vsel %vm355_vm2, %v1429_v14, %v1433_v18  ;;  %v6754_v57 = vshll.u32 %v5658_v21, 16  ;;  %v5682_v14 = vld [vmem:[%s5055_s22 + $0x70] sm:$0xff]  }
 0x126   : > { %v803_v56 = vpop.f32.mrf.mxu1 }
 0x127   : > { %v1060_v49 = vpop.f32.mrf.mxu0  ;;  %v804_v39 = vadd.f32 %v803_v56, %v5449_v29 }
 0x128   : > { %v5660_v48 = vadd.f32 %v1060_v49, %v796_v12  ;;  %v4367_v58 = vpop.f32.mrf.mxu1  ;;  %v6776_v12 = vmov 0.0  }
 0x129   : > { %v4433_v15 = vpop.f32.mrf.mxu0  ;;  %v1437_v58 = vor.u32 %v6753_v50, %v1433_v18  ;;  %v6757_v18 = vshrl.u32 %v5658_v21, 16  ;;  %v6758_v50 = vshll.u32 %v5682_v14, 16 }
 0x12a   : > { %v1773_v15 = vrot.slane %v5634_v11, 1  ;;  %v808_v46 = vpop.f32.mrf.mxu1  ;;  %4537 = vmatmul.mubr.msk.bf16.gmra.mxu1 %vm496_vm3, %v1434_v8 }
 0x12b   : > { %v1065_v1 = vpop.f32.mrf.mxu0  ;;  %4603 = vmatmul.mubr.msk.bf16.gmra.mxu0 %vm496_vm3, %v1772_v32  ;;  %4540 = vmatprep.mubr.msk.bf16.mxu1 %vm5002_vm1, %v6776_v12  ;;  %v809_v29 = vadd.f32 %v808_v46, %v5459_v33 }
 0x12c   : > { %v5668_v55 = vadd.f32 %v1065_v1, %v801_v2  ;;  %4606 = vmatprep.mubr.msk.bf16.mxu0 %vm5002_vm1, %v6776_v12  ;;  %v1441_v1 = vrot.slane %v6754_v57, 1  ;;  %v4370_v49 = vpop.f32.mrf.mxu1  ;;  %v1774_v8 = vsel %vm933_vm4, %v1771_v16, %v1773_v15  ;;  %v1775_v16 = vrot.slane %v5658_v21, 1 }
 0x12d   : > { %v4436_v4 = vpop.f32.mrf.mxu0 }
 0x12e   : > { %6775 = vst [vmem:[#allocation3_spill] sm:$0xff] %v5668_v55  ;;  %v811_v4 = vpop.f32.mrf.mxu1  ;;  %v1442_v56 = vsel %vm355_vm2, %v1437_v58, %v1441_v1 }
 0x12f   : > { %v1068_v32 = vpop.f32.mrf.mxu0  ;;  %v812_v46 = vadd.f32 %v811_v4, %v5474_v41 }
 0x130   : > { %v5684_v2 = vadd.f32 %v1068_v32, %v804_v39  ;;  %v4371_v57 = vpop.f32.mrf.mxu1  ;;  %v5706_v39 = vld [vmem:[%s5055_s22 + $0x78] sm:$0xff]  }
 0x131   : > { %v4437_v55 = vpop.f32.mrf.mxu0  ;;  %v1445_v57 = vor.u32 %v6757_v18, %v1441_v1  ;;  %v6759_v1 = vshrl.u32 %v5682_v14, 16  ;;  %v6760_v18 = vshll.u32 %v5706_v39, 16 }
 0x132   : > { %v816_v55 = vpop.f32.mrf.mxu1  ;;  %4541 = vmatmul.mubr.msk.bf16.gmra.mxu1 %vm496_vm3, %v1442_v56 }
 0x133   : > { %v1073_v11 = vpop.f32.mrf.mxu0  ;;  %4607 = vmatmul.mubr.msk.bf16.gmra.mxu0 %vm496_vm3, %v1774_v8  ;;  %4544 = vmatprep.mubr.msk.bf16.mxu1 %vm5002_vm1, %v6776_v12  ;;  %v817_v41 = vadd.f32 %v816_v55, %v5482_v51 }
 0x134   : > { %v5692_v49 = vadd.f32 %v1073_v11, %v809_v29  ;;  %4610 = vmatprep.mubr.msk.bf16.mxu0 %vm5002_vm1, %v6776_v12  ;;  %v1449_v11 = vrot.slane %v6758_v50, 1  ;;  %v4374_v58 = vpop.f32.mrf.mxu1  ;;  %v1776_v29 = vsel %vm933_vm4, %v1773_v15, %v1775_v16  ;;  %v1777_v15 = vrot.slane %v5682_v14, 1 }
 0x135   : > { %v4440_v33 = vpop.f32.mrf.mxu0 }
 0x136   : > { %6777 = vst [vmem:[#allocation4_spill] sm:$0xff] %v5692_v49  ;;  %v819_v56 = vpop.f32.mrf.mxu1  ;;  %v1450_v4 = vsel %vm355_vm2, %v1445_v57, %v1449_v11  ;;  %v5730_v57 = vld [vmem:[%s5055_s22 + $0x80] sm:$0xff]  }
 0x137   : > { %v1076_v32 = vpop.f32.mrf.mxu0  ;;  %v820_v55 = vadd.f32 %v819_v56, %v5502_v63 }
 0x138   : > { %v5708_v8 = vadd.f32 %v1076_v32, %v812_v46  ;;  %v4375_v50 = vpop.f32.mrf.mxu1 }
 0x139   : > { %v4441_v33 = vpop.f32.mrf.mxu0  ;;  %v1453_v50 = vor.u32 %v6759_v1, %v1449_v11  ;;  %v6761_v11 = vshrl.u32 %v5706_v39, 16  ;;  %v6762_v1 = vshll.u32 %v5730_v57, 16 }
 0x13a   : > { %v824_v46 = vpop.f32.mrf.mxu1  ;;  %4545 = vmatmul.mubr.msk.bf16.gmra.mxu1 %vm496_vm3, %v1450_v4 }
 0x13b   : > { %v1081_v49 = vpop.f32.mrf.mxu0  ;;  %4611 = vmatmul.mubr.msk.bf16.gmra.mxu0 %vm496_vm3, %v1776_v29  ;;  %4548 = vmatprep.mubr.msk.bf16.mxu1 %vm5002_vm1, %v6776_v12  ;;  %v825_v63 = vadd.f32 %v824_v46, %v5512_v5 }
 0x13c   : > { %v5716_v58 = vadd.f32 %v1081_v49, %v817_v41  ;;  %4614 = vmatprep.mubr.msk.bf16.mxu0 %vm5002_vm1, %v6776_v12  ;;  %v1457_v49 = vrot.slane %v6760_v18, 1  ;;  %v4378_v32 = vpop.f32.mrf.mxu1  ;;  %v1778_v41 = vsel %vm933_vm4, %v1775_v16, %v1777_v15  ;;  %v1779_v16 = vrot.slane %v5706_v39, 1 }
 0x13d   : > { %v4444_v51 = vpop.f32.mrf.mxu0 }
 0x13e   : > { %6778 = vst [vmem:[#allocation5_spill] sm:$0xff] %v5716_v58  ;;  %v827_v4 = vpop.f32.mrf.mxu1  ;;  %v1458_v56 = vsel %vm355_vm2, %v1453_v50, %v1457_v49  ;;  %v5754_v50 = vld [vmem:[%s5055_s22 + $0x88] sm:$0xff]  }
 0x13f   : > { %v1084_v29 = vpop.f32.mrf.mxu0  ;;  %v828_v46 = vadd.f32 %v827_v4, %v5534_v19  ;;  %6780 = vst [vmem:[#allocation7_spill] sm:$0xff] %v5754_v50 }
 0x140   : > { %v5732_v33 = vadd.f32 %v1084_v29, %v820_v55  ;;  %v4379_v18 = vpop.f32.mrf.mxu1 }
 0x141   : > { %v4445_v51 = vpop.f32.mrf.mxu0  ;;  %v1461_v18 = vor.u32 %v6761_v11, %v1457_v49  ;;  %v6763_v49 = vshrl.u32 %v5730_v57, 16  ;;  %v6764_v11 = vshll.u32 %v5754_v50, 16 }
 0x142   : > { %v832_v55 = vpop.f32.mrf.mxu1  ;;  %4549 = vmatmul.mubr.msk.bf16.gmra.mxu1 %vm496_vm3, %v1458_v56 }
 0x143   : > { %v1089_v58 = vpop.f32.mrf.mxu0  ;;  %4615 = vmatmul.mubr.msk.bf16.gmra.mxu0 %vm496_vm3, %v1778_v41  ;;  %4552 = vmatprep.mubr.msk.bf16.mxu1 %vm5002_vm1, %v6776_v12  ;;  %v833_v19 = vadd.f32 %v832_v55, %v5542_v37 }
 0x144   : > { %v5740_v32 = vadd.f32 %v1089_v58, %v825_v63  ;;  %4618 = vmatprep.mubr.msk.bf16.mxu0 %vm5002_vm1, %v6776_v12  ;;  %v1465_v58 = vrot.slane %v6762_v1, 1  ;;  %v4382_v29 = vpop.f32.mrf.mxu1  ;;  %v1780_v63 = vsel %vm933_vm4, %v1777_v15, %v1779_v16  ;;  %v1781_v15 = vrot.slane %v5730_v57, 1 }
 0x145   : > { %v4448_v5 = vpop.f32.mrf.mxu0 }
 0x146   : > { %6779 = vst [vmem:[#allocation6_spill] sm:$0xff] %v5740_v32  ;;  %v835_v56 = vpop.f32.mrf.mxu1  ;;  %v1466_v4 = vsel %vm355_vm2, %v1461_v18, %v1465_v58  ;;  %v5778_v18 = vld [vmem:[%s5055_s22 + $0x90] sm:$0xff]  }
 0x147   : > { %v1092_v41 = vpop.f32.mrf.mxu0  ;;  %v836_v55 = vadd.f32 %v835_v56, %v5560_v47 }
 0x148   : > { %v5756_v51 = vadd.f32 %v1092_v41, %v828_v46  ;;  %v4383_v1 = vpop.f32.mrf.mxu1 }
 0x149   : > { %v4449_v5 = vpop.f32.mrf.mxu0  ;;  %v1469_v1 = vor.u32 %v6763_v49, %v1465_v58  ;;  %v6767_v58 = vshrl.u32 %v5754_v50, 16  ;;  %v6768_v49 = vshll.u32 %v5778_v18, 16 }
 0x14a   : > { %v840_v46 = vpop.f32.mrf.mxu1  ;;  %4553 = vmatmul.mubr.msk.bf16.gmra.mxu1 %vm496_vm3, %v1466_v4 }
 0x14b   : > { %v1097_v32 = vpop.f32.mrf.mxu0  ;;  %4619 = vmatmul.mubr.msk.bf16.gmra.mxu0 %vm496_vm3, %v1780_v63  ;;  %4556 = vmatprep.mubr.msk.bf16.mxu1 %vm5002_vm1, %v6776_v12  ;;  %v841_v47 = vadd.f32 %v840_v46, %v5568_v0 }
 0x14c   : > { %v5764_v29 = vadd.f32 %v1097_v32, %v833_v19  ;;  %4622 = vmatprep.mubr.msk.bf16.mxu0 %vm5002_vm1, %v6776_v12  ;;  %v1473_v32 = vrot.slane %v6764_v11, 1  ;;  %v4386_v41 = vpop.f32.mrf.mxu1  ;;  %v1782_v19 = vsel %vm933_vm4, %v1779_v16, %v1781_v15  ;;  %v1783_v16 = vrot.slane %v5754_v50, 1 }
 0x14d   : > { %v4452_v37 = vpop.f32.mrf.mxu0 }
 0x14e   : > { %6781 = vst [vmem:[#allocation8_spill] sm:$0xff] %v5764_v29  ;;  %v843_v4 = vpop.f32.mrf.mxu1  ;;  %v1474_v56 = vsel %vm355_vm2, %v1469_v1, %v1473_v32  ;;  %v4971_v1 = vld [vmem:[%s5055_s22 + $0x98] ss:$0 sps:$4 sm:$0x11]  }
 0x14f   : > { %v1100_v63 = vpop.f32.mrf.mxu0  ;;  %v844_v46 = vadd.f32 %v843_v4, %v5586_v13  ;;  %v6769_v13 = vshrl.u32 %v5778_v18, 16  ;;  %v1487_v50 = vshll.u32 %v4971_v1, 16 }
 0x150   : > { %v5780_v5 = vadd.f32 %v1100_v63, %v836_v55  ;;  %v4387_v11 = vpop.f32.mrf.mxu1 }
 0x151   : > { %v4453_v37 = vpop.f32.mrf.mxu0  ;;  %v1477_v11 = vor.u32 %v6767_v58, %v1473_v32 }
 0x152   : > { %v848_v55 = vpop.f32.mrf.mxu1  ;;  %4557 = vmatmul.mubr.msk.bf16.gmra.mxu1 %vm496_vm3, %v1474_v56 }
 0x153   : > { %v1105_v29 = vpop.f32.mrf.mxu0  ;;  %4623 = vmatmul.mubr.msk.bf16.gmra.mxu0 %vm496_vm3, %v1782_v19  ;;  %4560 = vmatprep.mubr.msk.bf16.mxu1 %vm5002_vm1, %v6776_v12  ;;  %v849_v4 = vadd.f32 %v848_v55, %v5594_v38 }
 0x154   : > { %v5788_v41 = vadd.f32 %v1105_v29, %v841_v47  ;;  %4626 = vmatprep.mubr.msk.bf16.mxu0 %vm5002_vm1, %v6776_v12  ;;  %v1481_v29 = vrot.slane %v6768_v49, 1  ;;  %v4390_v63 = vpop.f32.mrf.mxu1  ;;  %v1784_v47 = vsel %vm933_vm4, %v1781_v15, %v1783_v16  ;;  %v1785_v15 = vrot.slane %v5778_v18, 1 }
 0x155   : > { %v4456_v0 = vpop.f32.mrf.mxu0 }
 0x156   : > { %6782 = vst [vmem:[#allocation9_spill] sm:$0xff] %v5788_v41  ;;  %v851_v56 = vpop.f32.mrf.mxu1  ;;  %v1482_v41 = vsel %vm355_vm2, %v1477_v11, %v1481_v29  ;;  %v1485_v38 = vor.u32 %v6769_v13, %v1481_v29  ;;  %v1489_v11 = vrot.slane %v1487_v50, 1 }
 0x157   : > { %v1108_v19 = vpop.f32.mrf.mxu0  ;;  %v852_v55 = vadd.f32 %v851_v56, %v5612_v17 }
 0x158   : > { %v5802_v37 = vadd.f32 %v1108_v19, %v844_v46  ;;  %v4391_v32 = vpop.f32.mrf.mxu1  ;;  %v2057_v19 = vshll.u32 %v5422_v3, 16  ;;  %v1490_v56 = vsel %vm355_vm2, %v1485_v38, %v1489_v11 }
 0x159   : > { %v4457_v0 = vpop.f32.mrf.mxu0 }
 0x15a   : > { %v856_v46 = vpop.f32.mrf.mxu1  ;;  %4561 = vmatmul.mubr.msk.bf16.gmra.mxu1 %vm496_vm3, %v1482_v41  ;;  %v1786_v41 = vsel %vm933_vm4, %v1783_v16, %v1785_v15  ;;  %v2059_v50 = vrot.slane %v2057_v19, 2  ;;  %v1787_v16 = vrot.slane %v4971_v1, 1  ;;  %v4085_v1 = vld [vmem:[%s6734_s1 + $0xe] sm:$0x3] }
 0x15b   : > { %v1113_v58 = vpop.f32.mrf.mxu0  ;;  %4627 = vmatmul.mubr.msk.bf16.gmra.mxu0 %vm496_vm3, %v1784_v47  ;;  %4564 = vmatprep.mubr.msk.bf16.mxu1 %vm5002_vm1, %v6776_v12  ;;  %v857_v17 = vadd.f32 %v856_v46, %v5620_v60  ;;  %v2391_v60 = vld [vmem:[%s5055_s22 + $0x18] sm:$0xe]  ;;  %v5835_v46 = vld [vmem:[%s5055_s22 + $0x1c] sm:$0xf] }
 0x15c   : > { %v5809_v49 = vadd.f32 %v1113_v58, %v849_v4  ;;  %4630 = vmatprep.mubr.msk.bf16.mxu0 %vm5002_vm1, %v6776_v12  ;;  %v2054_v58 = vshrl.u32 %v5422_v3, 16  ;;  %v4394_v47 = vpop.f32.mrf.mxu1  ;;  %v1788_v19 = vsel %vm933_vm4, %v1785_v15, %v1787_v16  ;;  %v3027_v15 = vsel %vm548_vm0, %v4085_v1, 0 }
 0x15d   : > { %v4460_v63 = vpop.f32.mrf.mxu0 }
 0x15e   : > { %6783 = vst [vmem:[#allocation10_spill] sm:$0xff] %v5809_v49  ;;  %v859_v32 = vpop.f32.mrf.mxu1  ;;  %v2056_v63 = vrot.slane %v2054_v58, 1 }
 0x15f   : > { %v1116_v0 = vpop.f32.mrf.mxu0  ;;  %v860_v38 = vadd.f32 %v859_v32, %v5636_v36 }
 0x160   : > { %v5822_v4 = vadd.f32 %v1116_v0, %v852_v55  ;;  %v4395_v13 = vpop.f32.mrf.mxu1  ;;  %v5847_v0 = vcombine.low %v2391_v60, %v5835_v46  ;;  %v4104_v60 = vld [vmem:[%s6734_s1 + $0x10] sm:$0x3] }
 0x161   : > { %v4461_v29 = vpop.f32.mrf.mxu0  ;;  %v2060_v13 = vor.u32 %v2059_v50, %v2056_v63 }
 0x162   : > { %v864_v55 = vpop.f32.mrf.mxu1  ;;  %4565 = vmatmul.mubr.msk.bf16.gmra.mxu1 %vm496_vm3, %v1490_v56  ;;  %v2516_v16 = vrot.slane %v5847_v0, 1 }
 0x163   : > { %v1121_v49 = vpop.f32.mrf.mxu0  ;;  %4631 = vmatmul.mubr.msk.bf16.gmra.mxu0 %vm496_vm3, %v1786_v41  ;;  %4640 = vmatprep.mubr.msk.bf16.mxu1 %vm5002_vm1, %v6776_v12  ;;  %v5850_v41 = vld [vmem:[%s5055_s22 + $0x20] sm:$0xff]   ;;  %v865_v29 = vadd.f32 %v864_v55, %v5404_v59 }
 0x164   : > { %v5828_v3 = vadd.f32 %v1121_v49, %v857_v17  ;;  %4634 = vmatprep.mubr.msk.bf16.mxu0 %vm5002_vm1, %v6776_v12  ;;  %v4398_v49 = vpop.f32.mrf.mxu1  ;;  %v2064_v17 = vsel %vm2052_vm5, %v2060_v13, %v5276_v26 }
 0x165   : > { %v4464_v47 = vpop.f32.mrf.mxu0 }
 0x166   : > { %v867_v36 = vpop.f32.mrf.mxu1  ;;  %v2517_v47 = vrot.slane %v5850_v41, 1 }
 0x167   : > { %v1124_v11 = vpop.f32.mrf.mxu0  ;;  %v868_v55 = vadd.f32 %v867_v36, %v5424_v7  ;;  %v3326_v7 = vsel %vm548_vm0, %v4104_v60, 0 }
 0x168   : > { %v5840_v58 = vadd.f32 %v1124_v11, %v860_v38  ;;  %v4399_v56 = vpop.f32.mrf.mxu1  ;;  %v2518_v11 = vsel %vm933_vm4, %v2516_v16, %v2517_v47 }
 0x169   : > { %v4465_v32 = vpop.f32.mrf.mxu0 }
 0x16a   : > { %v872_v59 = vpop.f32.mrf.mxu1  ;;  %4641 = vmatmul.mubr.msk.bf16.vlgmr.msra.gmra.mxu1 %vm496_vm3, %v2064_v17 }
 0x16b   : > { %v1129_v63 = vpop.f32.mrf.mxu0  ;;  %4635 = vmatmul.mubr.msk.bf16.gmra.mxu0 %vm496_vm3, %v1788_v19  ;;  %4779 = vmatpush3.bf16.msra.mxu1 %v3027_v15  ;;  %v5874_v19 = vld [vmem:[%s5055_s22 + $0x28] sm:$0xff]   ;;  %v873_v36 = vadd.f32 %v872_v59, %v5436_v20 }
 0x16c   : > { %v5857_v50 = vadd.f32 %v1129_v63, %v865_v29  ;;  %4710 = vmatprep.mubr.msk.bf16.mxu0 %vm5002_vm1, %v6776_v12  ;;  %4644 = vmatprep.mubr.msk.bf16.mxu1 %vm5002_vm1, %v6776_v12  ;;  %v4402_v38 = vpop.f32.mrf.mxu1  ;;  %v2519_v63 = vrot.slane %v5874_v19, 1 }
 0x16d   : > { %v4468_v26 = vpop.f32.mrf.mxu0  ;;  %v5893_v38 = vld [vmem:[%s5055_s22 + $0x30] sm:$0xff]  }
 0x16e   : > { %v875_v1 = vpop.f32.mrf.mxu1  ;;  %v2520_v60 = vsel %vm933_vm4, %v2517_v47, %v2519_v63  ;;  %v2521_v47 = vrot.slane %v5893_v38, 1 }
 0x16f   : > { %v1132_v13 = vpop.f32.mrf.mxu0  ;;  %v876_v20 = vadd.f32 %v875_v1, %v5453_v35  ;;  %v6785_v35 = vshll.u32 %v5472_v40, 16 }
 0x170   : > { %v5870_v49 = vadd.f32 %v1132_v13, %v868_v55  ;;  %v4403_v29 = vpop.f32.mrf.mxu1 }
 0x171   : > { %v4469_v32 = vpop.f32.mrf.mxu0  ;;  %v2074_v1 = vrot.slane %v6785_v35, 2 }
 0x172   : > { %v880_v15 = vpop.f32.mrf.mxu1  ;;  %4645 = vmatmul.mubr.msk.bf16.gmra.mxu1 %vm496_vm3, %v5490_v52  ;;  %v6784_v52 = vshrl.u32 %v5472_v40, 16 }
 0x173   : > { %v1137_v17 = vpop.f32.mrf.mxu0  ;;  %4711 = vmatmul.mubr.msk.bf16.vlgmr.msra.gmra.mxu0 %vm496_vm3, %v2518_v11  ;;  %4648 = vmatprep.mubr.msk.bf16.mxu1 %vm5002_vm1, %v6776_v12  ;;  %v881_v32 = vadd.f32 %v880_v15, %v5465_v34 }
 0x174   : > { %v5879_v56 = vadd.f32 %v1137_v17, %v873_v36  ;;  %4849 = vmatpush3.bf16.msra.mxu0 %v3326_v7  ;;  %4714 = vmatprep.mubr.msk.bf16.mxu0 %vm5002_vm1, %v6776_v12  ;;  %v4406_v59 = vpop.f32.mrf.mxu1  ;;  %v2073_v7 = vrot.slane %v6784_v52, 1 }
 0x175   : > { %v4472_v16 = vpop.f32.mrf.mxu0 }
 0x176   : > { %v883_v13 = vpop.f32.mrf.mxu1  ;;  %v2075_v15 = vor.u32 %v2074_v1, %v2073_v7  ;;  %v6787_v7 = vshll.u32 %v5500_v61, 16 }
 0x177   : > { %v1140_v26 = vpop.f32.mrf.mxu0  ;;  %v884_v40 = vadd.f32 %v883_v13, %v5477_v42  ;;  %v6786_v42 = vshrl.u32 %v5500_v61, 16 }
 0x178   : > { %v5889_v55 = vadd.f32 %v1140_v26, %v876_v20  ;;  %v4407_v36 = vpop.f32.mrf.mxu1  ;;  %v2078_v1 = vrot.slane %v6787_v7, 2 }
 0x179   : > { %v4473_v11 = vpop.f32.mrf.mxu0  ;;  %v2077_v13 = vrot.slane %v6786_v42, 1 }
 0x17a   : > { %v888_v16 = vpop.f32.mrf.mxu1  ;;  %4649 = vmatmul.mubr.msk.bf16.gmra.mxu1 %vm496_vm3, %v5520_v6  ;;  %v5915_v11 = vld [vmem:[%s5055_s22 + $0x38] sm:$0xff]   ;;  %v2076_v6 = vsel %vm2052_vm5, %v5510_v23, %v2075_v15 }
 0x17b   : > { %v1145_v29 = vpop.f32.mrf.mxu0  ;;  %4715 = vmatmul.mubr.msk.bf16.gmra.mxu0 %vm496_vm3, %v2520_v60  ;;  %4652 = vmatprep.mubr.msk.bf16.mxu1 %vm5002_vm1, %v6776_v12  ;;  %v2522_v60 = vsel %vm933_vm4, %v2519_v63, %v2521_v47  ;;  %v889_v35 = vadd.f32 %v888_v16, %v5492_v54  ;;  %v2523_v54 = vrot.slane %v5915_v11, 1  ;;  %v2079_v61 = vor.u32 %v2078_v1, %v2077_v13 }
 0x17c   : > { %v5901_v17 = vadd.f32 %v1145_v29, %v881_v32  ;;  %4718 = vmatprep.mubr.msk.bf16.mxu0 %vm5002_vm1, %v6776_v12  ;;  %v4410_v20 = vpop.f32.mrf.mxu1 }
 0x17d   : > { %v4476_v34 = vpop.f32.mrf.mxu0 }
 0x17e   : > { %v891_v32 = vpop.f32.mrf.mxu1 }
 0x17f   : > { %v1148_v59 = vpop.f32.mrf.mxu0  ;;  %v892_v34 = vadd.f32 %v891_v32, %v5505_v28  ;;  %v6788_v28 = vshrl.u32 %v5532_v30, 16 }
 0x180   : > { %v5911_v26 = vadd.f32 %v1148_v59, %v884_v40  ;;  %v4411_v36 = vpop.f32.mrf.mxu1 }
 0x181   : > { %v4477_v52 = vpop.f32.mrf.mxu0  ;;  %v2081_v32 = vrot.slane %v6788_v28, 1  ;;  %v6789_v36 = vshll.u32 %v5532_v30, 16 }
 0x182   : > { %v896_v16 = vpop.f32.mrf.mxu1  ;;  %4653 = vmatmul.mubr.msk.bf16.gmra.mxu1 %vm496_vm3, %v2076_v6  ;;  %v5938_v52 = vld [vmem:[%s5055_s22 + $0x40] sm:$0xff]   ;;  %v2080_v6 = vsel %vm2052_vm5, %v2075_v15, %v2079_v61 }
 0x183   : > { %v1153_v29 = vpop.f32.mrf.mxu0  ;;  %4719 = vmatmul.mubr.msk.bf16.gmra.mxu0 %vm496_vm3, %v2522_v60  ;;  %4656 = vmatprep.mubr.msk.bf16.mxu1 %vm5002_vm1, %v6776_v12  ;;  %v2524_v60 = vsel %vm933_vm4, %v2521_v47, %v2523_v54  ;;  %v897_v7 = vadd.f32 %v896_v16, %v5522_v24  ;;  %v2082_v13 = vrot.slane %v6789_v36, 2  ;;  %v2525_v24 = vrot.slane %v5938_v52, 1 }
 0x184   : > { %v5925_v63 = vadd.f32 %v1153_v29, %v889_v35  ;;  %4722 = vmatprep.mubr.msk.bf16.mxu0 %vm5002_vm1, %v6776_v12  ;;  %v4414_v40 = vpop.f32.mrf.mxu1 }
 0x185   : > { %v4480_v23 = vpop.f32.mrf.mxu0  ;;  %v2083_v30 = vor.u32 %v2082_v13, %v2081_v32 }
 0x186   : > { %v899_v35 = vpop.f32.mrf.mxu1 }
 0x187   : > { %v1156_v20 = vpop.f32.mrf.mxu0  ;;  %v900_v23 = vadd.f32 %v899_v35, %v5537_v45  ;;  %v6790_v45 = vshrl.u32 %v5558_v43, 16 }
 0x188   : > { %v5934_v59 = vadd.f32 %v1156_v20, %v892_v34  ;;  %v4415_v1 = vpop.f32.mrf.mxu1 }
 0x189   : > { %v4481_v42 = vpop.f32.mrf.mxu0  ;;  %v2085_v35 = vrot.slane %v6790_v45, 1  ;;  %v6791_v1 = vshll.u32 %v5558_v43, 16 }
 0x18a   : > { %v904_v16 = vpop.f32.mrf.mxu1  ;;  %4657 = vmatmul.mubr.msk.bf16.gmra.mxu1 %vm496_vm3, %v2080_v6  ;;  %v5960_v42 = vld [vmem:[%s5055_s22 + $0x48] sm:$0xff]   ;;  %v2084_v6 = vsel %vm2052_vm5, %v2079_v61, %v2083_v30 }
 0x18b   : > { %v1161_v29 = vpop.f32.mrf.mxu0  ;;  %4723 = vmatmul.mubr.msk.bf16.gmra.mxu0 %vm496_vm3, %v2524_v60  ;;  %4660 = vmatprep.mubr.msk.bf16.mxu1 %vm5002_vm1, %v6776_v12  ;;  %v2526_v60 = vsel %vm933_vm4, %v2523_v54, %v2525_v24  ;;  %v905_v36 = vadd.f32 %v904_v16, %v5548_v10  ;;  %v2086_v32 = vrot.slane %v6791_v1, 2  ;;  %v2527_v10 = vrot.slane %v5960_v42, 1 }
 0x18c   : > { %v5947_v47 = vadd.f32 %v1161_v29, %v897_v7  ;;  %4726 = vmatprep.mubr.msk.bf16.mxu0 %vm5002_vm1, %v6776_v12  ;;  %v4418_v34 = vpop.f32.mrf.mxu1 }
 0x18d   : > { %v4484_v15 = vpop.f32.mrf.mxu0  ;;  %v2087_v43 = vor.u32 %v2086_v32, %v2085_v35 }
 0x18e   : > { %v907_v7 = vpop.f32.mrf.mxu1 }
 0x18f   : > { %v1164_v40 = vpop.f32.mrf.mxu0  ;;  %v908_v15 = vadd.f32 %v907_v7, %v5563_v53  ;;  %v6792_v53 = vshrl.u32 %v5584_v25, 16 }
 0x190   : > { %v5956_v20 = vadd.f32 %v1164_v40, %v900_v23  ;;  %v4419_v13 = vpop.f32.mrf.mxu1 }
 0x191   : > { %v4485_v28 = vpop.f32.mrf.mxu0  ;;  %v2089_v7 = vrot.slane %v6792_v53, 1  ;;  %v6793_v13 = vshll.u32 %v5584_v25, 16 }
 0x192   : > { %v912_v16 = vpop.f32.mrf.mxu1  ;;  %4661 = vmatmul.mubr.msk.bf16.gmra.mxu1 %vm496_vm3, %v2084_v6  ;;  %v5982_v28 = vld [vmem:[%s5055_s22 + $0x50] sm:$0xff]   ;;  %v2088_v6 = vsel %vm2052_vm5, %v2083_v30, %v2087_v43 }
 0x193   : > { %v1169_v29 = vpop.f32.mrf.mxu0  ;;  %4727 = vmatmul.mubr.msk.bf16.gmra.mxu0 %vm496_vm3, %v2526_v60  ;;  %4664 = vmatprep.mubr.msk.bf16.mxu1 %vm5002_vm1, %v6776_v12  ;;  %v2528_v60 = vsel %vm933_vm4, %v2525_v24, %v2527_v10  ;;  %v913_v1 = vadd.f32 %v912_v16, %v5574_v9  ;;  %v2090_v35 = vrot.slane %v6793_v13, 2  ;;  %v2529_v9 = vrot.slane %v5982_v28, 1 }
 0x194   : > { %v5969_v54 = vadd.f32 %v1169_v29, %v905_v36  ;;  %4730 = vmatprep.mubr.msk.bf16.mxu0 %vm5002_vm1, %v6776_v12  ;;  %v4422_v23 = vpop.f32.mrf.mxu1 }
 0x195   : > { %v4488_v61 = vpop.f32.mrf.mxu0  ;;  %v2091_v25 = vor.u32 %v2090_v35, %v2089_v7 }
 0x196   : > { %v915_v36 = vpop.f32.mrf.mxu1 }
 0x197   : > { %v1172_v34 = vpop.f32.mrf.mxu0  ;;  %v916_v61 = vadd.f32 %v915_v36, %v5589_v22  ;;  %v6794_v22 = vshrl.u32 %v5610_v62, 16 }
 0x198   : > { %v5978_v40 = vadd.f32 %v1172_v34, %v908_v15  ;;  %v4423_v32 = vpop.f32.mrf.mxu1 }
 0x199   : > { %v4489_v45 = vpop.f32.mrf.mxu0  ;;  %v2093_v36 = vrot.slane %v6794_v22, 1  ;;  %v6795_v32 = vshll.u32 %v5610_v62, 16 }
 0x19a   : > { %v920_v16 = vpop.f32.mrf.mxu1  ;;  %4665 = vmatmul.mubr.msk.bf16.gmra.mxu1 %vm496_vm3, %v2088_v6  ;;  %v6004_v45 = vld [vmem:[%s5055_s22 + $0x58] sm:$0xff]   ;;  %v2092_v6 = vsel %vm2052_vm5, %v2087_v43, %v2091_v25 }
 0x19b   : > { %v1177_v29 = vpop.f32.mrf.mxu0  ;;  %4731 = vmatmul.mubr.msk.bf16.gmra.mxu0 %vm496_vm3, %v2528_v60  ;;  %4668 = vmatprep.mubr.msk.bf16.mxu1 %vm5002_vm1, %v6776_v12  ;;  %v2530_v60 = vsel %vm933_vm4, %v2527_v10, %v2529_v9  ;;  %v921_v13 = vadd.f32 %v920_v16, %v5600_v44  ;;  %v2094_v7 = vrot.slane %v6795_v32, 2  ;;  %v2531_v44 = vrot.slane %v6004_v45, 1 }
 0x19c   : > { %v5991_v24 = vadd.f32 %v1177_v29, %v913_v1  ;;  %4734 = vmatprep.mubr.msk.bf16.mxu0 %vm5002_vm1, %v6776_v12  ;;  %v4426_v15 = vpop.f32.mrf.mxu1 }
 0x19d   : > { %v4492_v30 = vpop.f32.mrf.mxu0 }
 0x19e   : > { %v923_v1 = vpop.f32.mrf.mxu1 }
 0x19f   : > { %v1180_v23 = vpop.f32.mrf.mxu0  ;;  %v924_v30 = vadd.f32 %v923_v1, %v5615_v31  ;;  %v6796_v1 = vld [vmem:[#allocation2_spill] sm:$0xff] }
 0x1a0   : > { %v6000_v34 = vadd.f32 %v1180_v23, %v916_v61  ;;  %v4427_v35 = vpop.f32.mrf.mxu1  ;;  %v2095_v61 = vor.u32 %v2094_v7, %v2093_v36 }
 0x1a1   : > { %v4493_v53 = vpop.f32.mrf.mxu0 }
 0x1a2   : > { %v1579_v16 = vpop.f32.mrf.mxu1  ;;  %4669 = vmatmul.mubr.msk.bf16.gmra.mxu1 %vm496_vm3, %v2092_v6  ;;  %v2532_v53 = vsel %vm933_vm4, %v2529_v9, %v2531_v44  ;;  %v2096_v31 = vsel %vm2052_vm5, %v2091_v25, %v2095_v61 }
 0x1a3   : > { %v1185_v29 = vpop.f32.mrf.mxu0  ;;  %4735 = vmatmul.mubr.msk.bf16.gmra.mxu0 %vm496_vm3, %v2530_v60  ;;  %v1714_v62 = vadd.f32 %v1579_v16, %v5644_v27  ;;  %4672 = vmatprep.mubr.msk.bf16.mxu1 %vm5002_vm1, %v6776_v12  ;;  %v6797_v27 = vshrl.u32 %v6796_v1, 16 }
 0x1a4   : > { %v6013_v10 = vadd.f32 %v1185_v29, %v921_v13  ;;  %4738 = vmatprep.mubr.msk.bf16.mxu0 %vm5002_vm1, %v6776_v12  ;;  %v4502_v15 = vpop.f32.mrf.mxu1  ;;  %v6027_v13 = vld [vmem:[%s5055_s22 + $0x60] sm:$0xff]   ;;  %v6798_v29 = vshll.u32 %v6796_v1, 16  ;;  %v6049_v1 = vld [vmem:[%s5055_s22 + $0x68] sm:$0xff]  }
 0x1a5   : > { %v4496_v43 = vpop.f32.mrf.mxu0  ;;  %v2097_v35 = vrot.slane %v6797_v27, 1 }
 0x1a6   : > { %v1582_v22 = vpop.f32.mrf.mxu1  ;;  %v2098_v36 = vrot.slane %v6798_v29, 2 }
 0x1a7   : > { %v1188_v23 = vpop.f32.mrf.mxu0  ;;  %v1715_v6 = vadd.f32 %v1582_v22, %v5660_v48  ;;  %v2533_v48 = vrot.slane %v6027_v13, 1 }
 0x1a8   : > { %v6023_v60 = vadd.f32 %v1188_v23, %v924_v30  ;;  %v4503_v7 = vpop.f32.mrf.mxu1  ;;  %v6799_v30 = vld [vmem:[#allocation3_spill] sm:$0xff]  ;;  %v2099_v23 = vor.u32 %v2098_v36, %v2097_v35 }
 0x1a9   : > { %v4497_v32 = vpop.f32.mrf.mxu0 }
 0x1aa   : > { %v1587_v43 = vpop.f32.mrf.mxu1  ;;  %4673 = vmatmul.mubr.msk.bf16.gmra.mxu1 %vm496_vm3, %v2096_v31  ;;  %v2100_v31 = vsel %vm2052_vm5, %v2095_v61, %v2099_v23 }
 0x1ab   : > { %v1877_v16 = vpop.f32.mrf.mxu0  ;;  %4739 = vmatmul.mubr.msk.bf16.gmra.mxu0 %vm496_vm3, %v2532_v53  ;;  %v1716_v15 = vadd.f32 %v1587_v43, %v6799_v30  ;;  %4676 = vmatprep.mubr.msk.bf16.mxu1 %vm5002_vm1, %v6776_v12 }
 0x1ac   : > { %v6036_v9 = vadd.f32 %v1877_v16, %v1714_v62  ;;  %4742 = vmatprep.mubr.msk.bf16.mxu0 %vm5002_vm1, %v6776_v12  ;;  %v4506_v22 = vpop.f32.mrf.mxu1  ;;  %v2534_v62 = vsel %vm933_vm4, %v2531_v44, %v2533_v48  ;;  %v6800_v16 = vshrl.u32 %v5658_v21, 16 }
 0x1ad   : > { %v4572_v25 = vpop.f32.mrf.mxu0  ;;  %v6802_v22 = vld [vmem:[#allocation4_spill] sm:$0xff] }
 0x1ae   : > { %v1590_v27 = vpop.f32.mrf.mxu1  ;;  %v2101_v43 = vrot.slane %v6800_v16, 1  ;;  %v6801_v25 = vshll.u32 %v5658_v21, 16  ;;  %v6071_v16 = vld [vmem:[%s5055_s22 + $0x70] sm:$0xff]  }
 0x1af   : > { %v1880_v32 = vpop.f32.mrf.mxu0  ;;  %v1717_v7 = vadd.f32 %v1590_v27, %v5684_v2  ;;  %v2535_v2 = vrot.slane %v6049_v1, 1 }
 0x1b0   : > { %v6045_v53 = vadd.f32 %v1880_v32, %v1715_v6  ;;  %v2102_v35 = vrot.slane %v6801_v25, 2  ;;  %v4507_v36 = vpop.f32.mrf.mxu1 }
 0x1b1   : > { %v4573_v29 = vpop.f32.mrf.mxu0 }
 0x1b2   : > { %v1595_v30 = vpop.f32.mrf.mxu1  ;;  %4677 = vmatmul.mubr.msk.bf16.gmra.mxu1 %vm496_vm3, %v2100_v31  ;;  %v2103_v21 = vor.u32 %v2102_v35, %v2101_v43 }
 0x1b3   : > { %v1885_v6 = vpop.f32.mrf.mxu0  ;;  %4743 = vmatmul.mubr.msk.bf16.gmra.mxu0 %vm496_vm3, %v2534_v62  ;;  %v1718_v32 = vadd.f32 %v1595_v30, %v6802_v22  ;;  %4680 = vmatprep.mubr.msk.bf16.mxu1 %vm5002_vm1, %v6776_v12  ;;  %v6803_v30 = vshrl.u32 %v5682_v14, 16  ;;  %v6804_v22 = vshll.u32 %v5682_v14, 16 }
 0x1b4   : > { %v6058_v44 = vadd.f32 %v1885_v6, %v1716_v15  ;;  %4746 = vmatprep.mubr.msk.bf16.mxu0 %vm5002_vm1, %v6776_v12  ;;  %v4510_v27 = vpop.f32.mrf.mxu1  ;;  %v2536_v15 = vsel %vm933_vm4, %v2533_v48, %v2535_v2  ;;  %v2104_v31 = vsel %vm2052_vm5, %v2099_v23, %v2103_v21 }
 0x1b5   : > { %v4576_v61 = vpop.f32.mrf.mxu0  ;;  %v2106_v43 = vrot.slane %v6804_v22, 2  ;;  %v6093_v22 = vld [vmem:[%s5055_s22 + $0x78] sm:$0xff]  }
 0x1b6   : > { %v1598_v25 = vpop.f32.mrf.mxu1  ;;  %v2105_v61 = vrot.slane %v6803_v30, 1 }
 0x1b7   : > { %v1888_v29 = vpop.f32.mrf.mxu0  ;;  %v1719_v6 = vadd.f32 %v1598_v25, %v5708_v8  ;;  %v2537_v8 = vrot.slane %v6071_v16, 1 }
 0x1b8   : > { %v6067_v62 = vadd.f32 %v1888_v29, %v1717_v7  ;;  %v4511_v35 = vpop.f32.mrf.mxu1  ;;  %v6806_v29 = vld [vmem:[#allocation5_spill] sm:$0xff]  ;;  %v2107_v14 = vor.u32 %v2106_v43, %v2105_v61 }
 0x1b9   : > { %v4577_v36 = vpop.f32.mrf.mxu0 }
 0x1ba   : > { %v1603_v27 = vpop.f32.mrf.mxu1  ;;  %4681 = vmatmul.mubr.msk.bf16.gmra.mxu1 %vm496_vm3, %v2104_v31  ;;  %v2108_v31 = vsel %vm2052_vm5, %v2103_v21, %v2107_v14 }
 0x1bb   : > { %v1893_v7 = vpop.f32.mrf.mxu0  ;;  %4747 = vmatmul.mubr.msk.bf16.gmra.mxu0 %vm496_vm3, %v2536_v15  ;;  %v1720_v25 = vadd.f32 %v1603_v27, %v6806_v29  ;;  %4684 = vmatprep.mubr.msk.bf16.mxu1 %vm5002_vm1, %v6776_v12  ;;  %v6807_v27 = vshrl.u32 %v5706_v39, 16  ;;  %v6808_v29 = vshll.u32 %v5706_v39, 16 }
 0x1bc   : > { %v6080_v48 = vadd.f32 %v1893_v7, %v1718_v32  ;;  %4750 = vmatprep.mubr.msk.bf16.mxu0 %vm5002_vm1, %v6776_v12  ;;  %v4514_v36 = vpop.f32.mrf.mxu1  ;;  %v2538_v32 = vsel %vm933_vm4, %v2535_v2, %v2537_v8 }
 0x1bd   : > { %v4580_v23 = vpop.f32.mrf.mxu0  ;;  %v2110_v61 = vrot.slane %v6808_v29, 2 }
 0x1be   : > { %6805 = vst [vmem:[#allocation2_spill] sm:$0xff] %v6080_v48  ;;  %v1606_v35 = vpop.f32.mrf.mxu1  ;;  %v2109_v23 = vrot.slane %v6807_v27, 1  ;;  %v195_v27 = vld [vmem:[%s6736_s3] sm:$0xff] }
 0x1bf   : > { %v1896_v30 = vpop.f32.mrf.mxu0  ;;  %v1721_v48 = vadd.f32 %v1606_v35, %v5732_v33  ;;  %v2539_v33 = vrot.slane %v6093_v22, 1 }
 0x1c0   : > { %v6089_v15 = vadd.f32 %v1896_v30, %v1719_v6  ;;  %v4515_v43 = vpop.f32.mrf.mxu1  ;;  %v6810_v30 = vld [vmem:[#allocation6_spill] sm:$0xff]  ;;  %v2111_v39 = vor.u32 %v2110_v61, %v2109_v23 }
 0x1c1   : > { %v4581_v7 = vpop.f32.mrf.mxu0  ;;  %v6118_v43 = vld [vmem:[%s5055_s22 + $0x80] sm:$0xff]  }
 0x1c2   : > { %v1611_v2 = vpop.f32.mrf.mxu1  ;;  %4685 = vmatmul.mubr.msk.bf16.gmra.mxu1 %vm496_vm3, %v2108_v31  ;;  %v2540_v31 = vsel %vm933_vm4, %v2537_v8, %v2539_v33  ;;  %v2112_v61 = vsel %vm2052_vm5, %v2107_v14, %v2111_v39  ;;  %v197_v8 = vld [vmem:[%s6736_s3 + $0x10] sm:$0xff] }
 0x1c3   : > { %v1901_v36 = vpop.f32.mrf.mxu0  ;;  %4751 = vmatmul.mubr.msk.bf16.gmra.mxu0 %vm496_vm3, %v2538_v32  ;;  %v1722_v35 = vadd.f32 %v1611_v2, %v6810_v30  ;;  %4688 = vmatprep.mubr.msk.bf16.mxu1 %vm5002_vm1, %v6776_v12 }
 0x1c4   : > { %v6102_v6 = vadd.f32 %v1901_v36, %v1720_v25  ;;  %4754 = vmatprep.mubr.msk.bf16.mxu0 %vm5002_vm1, %v6776_v12  ;;  %v4518_v7 = vpop.f32.mrf.mxu1  ;;  %v5003_v25 = vmov 0  }
 0x1c5   : > { %v4584_v21 = vpop.f32.mrf.mxu0  ;;  %4932 = vset.pattern.permute.xlu0 %v5003_v25  ;;  %4933 = vset.pattern.permute.xlu1 %v5003_v25  ;;  %v6813_v7 = vshll.u32 %v5730_v57, 16 }
 0x1c6   : > { %6809 = vst [vmem:[#allocation3_spill] sm:$0xff] %v6102_v6  ;;  %3608 = vperm.xlu0 %4932, %v195_v27   ;;  %v1614_v36 = vpop.f32.mrf.mxu1  ;;  %v6812_v21 = vshrl.u32 %v5730_v57, 16  ;;  %v2541_v57 = vrot.slane %v6118_v43, 1  ;;  %3618 = vperm.xlu1 %4933, %v197_v8   ;;  %v6152_v8 = vld [vmem:[%s5055_s22 + $0x88] sm:$0xff]  }
 0x1c7   : > { %v1904_v32 = vpop.f32.mrf.mxu0  ;;  %v1723_v23 = vadd.f32 %v1614_v36, %v5756_v51  ;;  %v2114_v6 = vrot.slane %v6813_v7, 2  ;;  %v196_v51 = vld [vmem:[%s6736_s3 + $0x8] sm:$0xff]  ;;  %v198_v7 = vld [vmem:[%s6736_s3 + $0x18] sm:$0xff] }
 0x1c8   : > { %v6114_v29 = vadd.f32 %v1904_v32, %v1721_v48  ;;  %v2113_v30 = vrot.slane %v6812_v21, 1  ;;  %v4519_v25 = vpop.f32.mrf.mxu1 }
 0x1c9   : > { %v4585_v2 = vpop.f32.mrf.mxu0  ;;  %v199_v25 = vld [vmem:[%s6736_s3 + $0x20] sm:$0xff] }
 0x1ca   : > { %6811 = vst [vmem:[#allocation4_spill] sm:$0xff] %v6114_v29  ;;  %v1619_v14 = vpop.f32.mrf.mxu1  ;;  %4689 = vmatmul.mubr.msk.bf16.gmra.mxu1 %vm496_vm3, %v2112_v61  ;;  %3613 = vperm.xlu0 %4932, %v196_v51   ;;  %v2115_v2 = vor.u32 %v2114_v6, %v2113_v30  ;;  %v2542_v61 = vsel %vm933_vm4, %v2539_v33, %v2541_v57  ;;  %v200_v33 = vld [vmem:[%s6736_s3 + $0x28] sm:$0xff] }
 0x1cb   : > { %v1909_v48 = vpop.f32.mrf.mxu0  ;;  %4755 = vmatmul.mubr.msk.bf16.gmra.mxu0 %vm496_vm3, %v2540_v31  ;;  %v6815_v31 = vld [vmem:[#allocation8_spill] sm:$0xff]  ;;  %4692 = vmatprep.mubr.msk.bf16.mxu1 %vm5002_vm1, %v6776_v12 }
 0x1cc   : > { %v6133_v32 = vadd.f32 %v1909_v48, %v1722_v35  ;;  %4758 = vmatprep.mubr.msk.bf16.mxu0 %vm5002_vm1, %v6776_v12  ;;  %v1724_v36 = vadd.f32 %v1619_v14, %v6815_v31  ;;  %v4522_v35 = vpop.f32.mrf.mxu1  ;;  %3623 = vperm.xlu1 %4933, %v198_v7   ;;  %v2116_v30 = vsel %vm2052_vm5, %v2111_v39, %v2115_v2  ;;  %v2543_v39 = vrot.slane %v6152_v8, 1 }
 0x1cd   : > { %v4588_v27 = vpop.f32.mrf.mxu0 }
 0x1ce   : > { %6814 = vst [vmem:[#allocation5_spill] sm:$0xff] %v6133_v32  ;;  %v1622_v51 = vpop.f32.mrf.mxu1  ;;  %3628 = vperm.xlu0 %4932, %v199_v25   ;;  %v6817_v27 = vld [vmem:[#allocation7_spill] sm:$0xff] }
 0x1cf   : > { %v1912_v21 = vpop.f32.mrf.mxu0  ;;  %v1725_v6 = vadd.f32 %v1622_v51, %v5780_v5  ;;  %v6818_v31 = vshrl.u32 %v6817_v27, 16  ;;  %v6819_v32 = vshll.u32 %v6817_v27, 16  ;;  %v201_v5 = vld [vmem:[%s6736_s3 + $0x30] sm:$0xff] }
 0x1d0   : > { %v6148_v48 = vadd.f32 %v1912_v21, %v1723_v23  ;;  %v4523_v23 = vpop.f32.mrf.mxu1  ;;  %3633 = vperm.xlu1 %4933, %v200_v33   ;;  %v6186_v33 = vld [vmem:[%s5055_s22 + $0x90] sm:$0xff]  }
 0x1d1   : > { %v4589_v14 = vpop.f32.mrf.mxu0  ;;  %v2117_v35 = vrot.slane %v6818_v31, 1  ;;  %v2118_v29 = vrot.slane %v6819_v32, 2  ;;  %v202_v31 = vld [vmem:[%s6736_s3 + $0x38] sm:$0xff]  ;;  %v203_v23 = vld [vmem:[%s6736_s3 + $0x40] sm:$0xff] }
 0x1d2   : > { %6816 = vst [vmem:[#allocation6_spill] sm:$0xff] %v6148_v48  ;;  %v1627_v32 = vpop.f32.mrf.mxu1  ;;  %4693 = vmatmul.mubr.msk.bf16.gmra.mxu1 %vm496_vm3, %v2116_v30  ;;  %3638 = vperm.xlu0 %4932, %v201_v5  }
 0x1d3   : > { %v1917_v21 = vpop.f32.mrf.mxu0  ;;  %4759 = vmatmul.mubr.msk.bf16.gmra.mxu0 %vm496_vm3, %v2542_v61  ;;  %v6821_v61 = vld [vmem:[#allocation9_spill] sm:$0xff]  ;;  %4696 = vmatprep.mubr.msk.bf16.mxu1 %vm5002_vm1, %v6776_v12  ;;  %v2119_v14 = vor.u32 %v2118_v29, %v2117_v35 }
 0x1d4   : > { %v6167_v7 = vadd.f32 %v1917_v21, %v1724_v36  ;;  %4762 = vmatprep.mubr.msk.bf16.mxu0 %vm5002_vm1, %v6776_v12  ;;  %v1726_v51 = vadd.f32 %v1627_v32, %v6821_v61  ;;  %v4526_v36 = vpop.f32.mrf.mxu1  ;;  %v2544_v21 = vsel %vm933_vm4, %v2541_v57, %v2543_v39  ;;  %6823 = vst [vmem:[#allocation9_spill] sm:$0xff] %v6186_v33  ;;  %v204_v57 = vld [vmem:[%s6736_s3 + $0x48] sm:$0xff] }
 0x1d5   : > { %v4592_v25 = vpop.f32.mrf.mxu0  ;;  %3643 = vperm.xlu1 %4933, %v202_v31   ;;  %v2120_v32 = vsel %vm2052_vm5, %v2115_v2, %v2119_v14  ;;  %v6825_v36 = vshll.u32 %v5778_v18, 16 }
 0x1d6   : > { %6820 = vst [vmem:[#allocation8_spill] sm:$0xff] %v6167_v7  ;;  %v1630_v5 = vpop.f32.mrf.mxu1  ;;  %3648 = vperm.xlu0 %4932, %v203_v23   ;;  %v6824_v25 = vshrl.u32 %v5778_v18, 16  ;;  %v2545_v18 = vrot.slane %v6186_v33, 1 }
 0x1d7   : > { %v1920_v27 = vpop.f32.mrf.mxu0  ;;  %v1727_v35 = vadd.f32 %v1630_v5, %v5802_v37  ;;  %v2122_v7 = vrot.slane %v6825_v36, 2  ;;  %v205_v37 = vld [vmem:[%s6736_s3 + $0x50] sm:$0xff] }
 0x1d8   : > { %v6182_v30 = vadd.f32 %v1920_v27, %v1725_v6  ;;  %v2121_v61 = vrot.slane %v6824_v25, 1  ;;  %v4988_v6 = vld [vmem:[%s5055_s22 + $0x98] ss:$0 sps:$4 sm:$0x33]   ;;  %v4527_v27 = vpop.f32.mrf.mxu1 }
 0x1d9   : > { %v4593_v29 = vpop.f32.mrf.mxu0  ;;  %3653 = vperm.xlu1 %4933, %v204_v57   ;;  %v206_v27 = vld [vmem:[%s6736_s3 + $0x58] sm:$0xff] }
 0x1da   : > { %6822 = vst [vmem:[#allocation7_spill] sm:$0xff] %v6182_v30  ;;  %v1635_v31 = vpop.f32.mrf.mxu1  ;;  %4697 = vmatmul.mubr.msk.bf16.gmra.mxu1 %vm496_vm3, %v2120_v32  ;;  %3658 = vperm.xlu0 %4932, %v205_v37   ;;  %v2123_v29 = vor.u32 %v2122_v7, %v2121_v61  ;;  %v207_v32 = vld [vmem:[%s6736_s3 + $0x60] sm:$0xff]  ;;  %v2546_v37 = vsel %vm933_vm4, %v2543_v39, %v2545_v18  ;;  %v208_v39 = vld [vmem:[%s6736_s3 + $0x68] sm:$0xff] }
 0x1db   : > { %v1925_v30 = vpop.f32.mrf.mxu0  ;;  %4763 = vmatmul.mubr.msk.bf16.gmra.mxu0 %vm496_vm3, %v2544_v21  ;;  %v6827_v21 = vld [vmem:[#allocation10_spill] sm:$0xff]  ;;  %4700 = vmatprep.mubr.msk.bf16.mxu1 %vm5002_vm1, %v6776_v12 }
 0x1dc   : > { %v6202_v2 = vadd.f32 %v1925_v30, %v1726_v51  ;;  %4766 = vmatprep.mubr.msk.bf16.mxu0 %vm5002_vm1, %v6776_v12  ;;  %v1728_v5 = vadd.f32 %v1635_v31, %v6827_v21  ;;  %v2126_v51 = vshrl.u32 %v4988_v6, 16  ;;  %v2129_v30 = vshll.u32 %v4988_v6, 16  ;;  %v4530_v25 = vpop.f32.mrf.mxu1  ;;  %v6221_v31 = vld [vmem:[%s5055_s22 + $0x98] sm:$0xff]  }
 0x1dd   : > { %v4596_v23 = vpop.f32.mrf.mxu0  ;;  %6829 = vst [vmem:[#allocation12_spill] sm:$0xff] %v6221_v31  ;;  %3663 = vperm.xlu1 %4933, %v206_v27  }
 0x1de   : > { %6826 = vst [vmem:[#allocation11_spill] sm:$0xff] %v6202_v2  ;;  %v1638_v7 = vpop.f32.mrf.mxu1  ;;  %3668 = vperm.xlu0 %4932, %v207_v32   ;;  %v2124_v23 = vsel %vm2052_vm5, %v2119_v14, %v2123_v29  ;;  %v2128_v21 = vrot.slane %v2126_v51, 1  ;;  %v2131_v25 = vrot.slane %v2129_v30, 2  ;;  %v2815_v51 = vshrl.u32 %v5847_v0, 16 }
 0x1df   : > { %v1928_v36 = vpop.f32.mrf.mxu0  ;;  %v1729_v6 = vadd.f32 %v1638_v7, %v5822_v4  ;;  %v2547_v4 = vrot.slane %v6221_v31, 1  ;;  %v2818_v30 = vshll.u32 %v5847_v0, 16  ;;  %v2826_v32 = vshll.u32 %v5850_v41, 16  ;;  %v211_v0 = vld [vmem:[%s6736_s3 + $0x80] sm:$0xff] }
 0x1e0   : > { %v6217_v57 = vadd.f32 %v1928_v36, %v1727_v35  ;;  %v4531_v2 = vpop.f32.mrf.mxu1  ;;  %v209_v35 = vld [vmem:[%s6736_s3 + $0x70] sm:$0xff] }
 0x1e1   : > { %v4597_v61 = vpop.f32.mrf.mxu0  ;;  %3673 = vperm.xlu1 %4933, %v208_v39   ;;  %v4990_v39 = vld [vmem:[%s5055_s22 + $0xa0] ss:$0 sps:$4 sm:$0x11]  }
 0x1e2   : > { %6828 = vst [vmem:[#allocation10_spill] sm:$0xff] %v6217_v57  ;;  %v1643_v14 = vpop.f32.mrf.mxu1  ;;  %4701 = vmatmul.mubr.msk.bf16.gmra.mxu1 %vm496_vm3, %v2124_v23  ;;  %3678 = vperm.xlu0 %4932, %v209_v35   ;;  %v210_v61 = vld [vmem:[%s6736_s3 + $0x78] sm:$0xff]  ;;  %v2817_v35 = vrot.slane %v2815_v51, 1  ;;  %v2828_v57 = vrot.slane %v2826_v32, 2 }
 0x1e3   : > { %v1933_v33 = vpop.f32.mrf.mxu0  ;;  %4767 = vmatmul.mubr.msk.bf16.gmra.mxu0 %vm496_vm3, %v2546_v37  ;;  %v1730_v27 = vadd.f32 %v1643_v14, %v5828_v3  ;;  %4704 = vmatprep.mubr.msk.bf16.mxu1 %vm5002_vm1, %v6776_v12  ;;  %v2548_v3 = vsel %vm933_vm4, %v2545_v18, %v2547_v4  ;;  %v2820_v14 = vrot.slane %v2818_v30, 2  ;;  %v212_v18 = vld [vmem:[%s6736_s3 + $0x88] sm:$0xff] }
 0x1e4   : > { %v6232_v36 = vadd.f32 %v1933_v33, %v1728_v5  ;;  %4770 = vmatprep.mubr.msk.bf16.mxu0 %vm5002_vm1, %v6776_v12  ;;  %v2132_v33 = vor.u32 %v2131_v25, %v2128_v21  ;;  %v2823_v5 = vshrl.u32 %v5850_v41, 16  ;;  %v4534_v37 = vpop.f32.mrf.mxu1 }
 0x1e5   : > { %v4600_v2 = vpop.f32.mrf.mxu0  ;;  %3683 = vperm.xlu1 %4933, %v210_v61   ;;  %v2821_v30 = vor.u32 %v2820_v14, %v2817_v35 }
 0x1e6   : > { %6830 = vst [vmem:[#allocation13_spill] sm:$0xff] %v6232_v36  ;;  %v1646_v21 = vpop.f32.mrf.mxu1  ;;  %3688 = vperm.xlu0 %4932, %v211_v0   ;;  %v2133_v37 = vsel %vm2052_vm5, %v2123_v29, %v2132_v33  ;;  %v2825_v36 = vrot.slane %v2823_v5, 1  ;;  %v3232_v33 = vld [vmem:[%s5055_s22 + $0x18] sm:$0xc] }
 0x1e7   : > { %v1936_v7 = vpop.f32.mrf.mxu0  ;;  %v1731_v2 = vadd.f32 %v1646_v21, %v5840_v58  ;;  %v2549_v58 = vrot.slane %v4990_v39, 1  ;;  %v214_v0 = vld [vmem:[%s6736_s3 + $0x98] sm:$0xff] }
 0x1e8   : > { %v6251_v23 = vadd.f32 %v1936_v7, %v1729_v6  ;;  %v4535_v31 = vpop.f32.mrf.mxu1  ;;  %v213_v6 = vld [vmem:[%s6736_s3 + $0x90] sm:$0xff]  ;;  %v2829_v32 = vor.u32 %v2828_v57, %v2825_v36  ;;  %v4105_v57 = vcombine.low %v3232_v33, %v5835_v46 }
 0x1e9   : > { %v4601_v25 = vpop.f32.mrf.mxu0  ;;  %3693 = vperm.xlu1 %4933, %v212_v18   ;;  %v217_v46 = vld [vmem:[%s6736_s3 + $0xb0] sm:$0xff] }
 0x1ea   : > { %v1651_v29 = vpop.f32.mrf.mxu1  ;;  %4705 = vmatmul.mubr.msk.bf16.gmra.mxu1 %vm496_vm3, %v2133_v37  ;;  %3698 = vperm.xlu0 %4932, %v213_v6   ;;  %v2830_v35 = vsel %vm2052_vm5, %v2821_v30, %v2829_v32 }
 0x1eb   : > { %v1941_v48 = vpop.f32.mrf.mxu0  ;;  %4771 = vmatmul.mubr.msk.bf16.gmra.mxu0 %vm496_vm3, %v2548_v3  ;;  %v1732_v5 = vadd.f32 %v1651_v29, %v5857_v50  ;;  %4780 = vmatprep.mubr.msk.bf16.mxu1 %vm5002_vm1, %v6776_v12  ;;  %v215_v3 = vld [vmem:[%s6736_s3 + $0xa0] sm:$0xff]  ;;  %v2550_v50 = vsel %vm933_vm4, %v2547_v4, %v2549_v58  ;;  %v216_v4 = vld [vmem:[%s6736_s3 + $0xa8] sm:$0xff]  ;;  %v3240_v58 = vrot.slane %v5850_v41, 2  ;;  %v218_v41 = vld [vmem:[%s6736_s3 + $0xb8] sm:$0xff] }
 0x1ec   : > { %v6264_v51 = vadd.f32 %v1941_v48, %v1730_v27  ;;  %4774 = vmatprep.mubr.msk.bf16.mxu0 %vm5002_vm1, %v6776_v12  ;;  %v2832_v48 = vshrl.u32 %v5874_v19, 16  ;;  %v2835_v27 = vshll.u32 %v5874_v19, 16  ;;  %v4538_v7 = vpop.f32.mrf.mxu1 }
 0x1ed   : > { %v4604_v31 = vpop.f32.mrf.mxu0  ;;  %3703 = vperm.xlu1 %4933, %v214_v0  }
 0x1ee   : > { %v1654_v36 = vpop.f32.mrf.mxu1  ;;  %3708 = vperm.xlu0 %4932, %v215_v3   ;;  %v2834_v14 = vrot.slane %v2832_v48, 1  ;;  %v2837_v37 = vrot.slane %v2835_v27, 2  ;;  %v2844_v48 = vshll.u32 %v5893_v38, 16 }
 0x1ef   : > { %v1944_v61 = vpop.f32.mrf.mxu0  ;;  %v1733_v25 = vadd.f32 %v1654_v36, %v5870_v49  ;;  %v3239_v49 = vrot.slane %v4105_v57, 2 }
 0x1f0   : > { %v6281_v39 = vadd.f32 %v1944_v61, %v1731_v2  ;;  %v4539_v18 = vpop.f32.mrf.mxu1  ;;  %v2838_v33 = vor.u32 %v2837_v37, %v2834_v14  ;;  %v219_v61 = vld [vmem:[%s6736_s3 + $0xc0] sm:$0xff] }
 0x1f1   : > { %v4605_v21 = vpop.f32.mrf.mxu0  ;;  %3713 = vperm.xlu1 %4933, %v216_v4   ;;  %v221_v18 = vld [vmem:[%s6736_s3 + $0xd0] sm:$0xff] }
 0x1f2   : > { %v1659_v29 = vpop.f32.mrf.mxu1  ;;  %4781 = vmatmul.mubr.msk.bf16.vlgmr.msra.gmra.mxu1 %vm496_vm3, %v2830_v35  ;;  %3718 = vperm.xlu0 %4932, %v217_v46   ;;  %v2839_v36 = vsel %vm2052_vm5, %v2829_v32, %v2838_v33  ;;  %v2846_v35 = vrot.slane %v2844_v48, 2  ;;  %v223_v48 = vld [vmem:[%s6736_s3 + $0xe0] sm:$0xff] }
 0x1f3   : > { %v1949_v6 = vpop.f32.mrf.mxu0  ;;  %4775 = vmatmul.mubr.msk.bf16.gmra.mxu0 %vm496_vm3, %v2550_v50  ;;  %v1734_v30 = vadd.f32 %v1659_v29, %v5879_v56  ;;  %4784 = vmatprep.mubr.msk.bf16.mxu1 %vm5002_vm1, %v6776_v12  ;;  %v3241_v56 = vsel %vm3238_vm6, %v3239_v49, %v3240_v58  ;;  %v2850_v29 = vshrl.u32 %v5915_v11, 16 }
 0x1f4   : > { %v6294_v2 = vadd.f32 %v1949_v6, %v1732_v5  ;;  %4850 = vmatprep.mubr.msk.bf16.mxu0 %vm5002_vm1, %v6776_v12  ;;  %v2841_v5 = vshrl.u32 %v5893_v38, 16  ;;  %v4542_v27 = vpop.f32.mrf.mxu1 }
 0x1f5   : > { %v4608_v31 = vpop.f32.mrf.mxu0  ;;  %3723 = vperm.xlu1 %4933, %v218_v41  }
 0x1f6   : > { %v1662_v3 = vpop.f32.mrf.mxu1  ;;  %3728 = vperm.xlu0 %4932, %v219_v61   ;;  %v2843_v21 = vrot.slane %v2841_v5, 1  ;;  %v2853_v31 = vshll.u32 %v5915_v11, 16 }
 0x1f7   : > { %v1952_v7 = vpop.f32.mrf.mxu0  ;;  %v1735_v57 = vadd.f32 %v1662_v3, %v5889_v55  ;;  %v3242_v55 = vrot.slane %v5874_v19, 2  ;;  %v222_v19 = vld [vmem:[%s6736_s3 + $0xd8] sm:$0xff]  ;;  %v2852_v3 = vrot.slane %v2850_v29, 1  ;;  %v227_v29 = vld [vmem:[%s6736_s3 + $0x100] sm:$0xff] }
 0x1f8   : > { %v6311_v0 = vadd.f32 %v1952_v7, %v1733_v25  ;;  %v4543_v14 = vpop.f32.mrf.mxu1  ;;  %v220_v25 = vld [vmem:[%s6736_s3 + $0xc8] sm:$0xff]  ;;  %v2847_v49 = vor.u32 %v2846_v35, %v2843_v21 }
 0x1f9   : > { %v4609_v50 = vpop.f32.mrf.mxu0  ;;  %3733 = vperm.xlu1 %4933, %v220_v25  }
 0x1fa   : > { %v1667_v32 = vpop.f32.mrf.mxu1  ;;  %4785 = vmatmul.mubr.msk.bf16.gmra.mxu1 %vm496_vm3, %v2839_v36  ;;  %3738 = vperm.xlu0 %4932, %v221_v18   ;;  %v2855_v50 = vrot.slane %v2853_v31, 2  ;;  %v2859_v18 = vshrl.u32 %v5938_v52, 16 }
 0x1fb   : > { %v1957_v37 = vpop.f32.mrf.mxu0  ;;  %4851 = vmatmul.mubr.msk.bf16.vlgmr.msra.gmra.mxu0 %vm496_vm3, %v3241_v56  ;;  %v1736_v46 = vadd.f32 %v1667_v32, %v5901_v17  ;;  %4788 = vmatprep.mubr.msk.bf16.mxu1 %vm5002_vm1, %v6776_v12  ;;  %v3243_v17 = vsel %vm3238_vm6, %v3240_v58, %v3242_v55  ;;  %v2848_v56 = vsel %vm2052_vm5, %v2838_v33, %v2847_v49  ;;  %v225_v58 = vld [vmem:[%s6736_s3 + $0xf0] sm:$0xff]  ;;  %v2862_v32 = vshll.u32 %v5938_v52, 16 }
 0x1fc   : > { %v6323_v6 = vadd.f32 %v1957_v37, %v1734_v30  ;;  %4854 = vmatprep.mubr.msk.bf16.mxu0 %vm5002_vm1, %v6776_v12  ;;  %v4546_v30 = vpop.f32.mrf.mxu1  ;;  %v2856_v25 = vor.u32 %v2855_v50, %v2852_v3 }
 0x1fd   : > { %v4612_v4 = vpop.f32.mrf.mxu0  ;;  %3743 = vperm.xlu1 %4933, %v222_v19  }
 0x1fe   : > { %v1670_v7 = vpop.f32.mrf.mxu1  ;;  %3748 = vperm.xlu0 %4932, %v223_v48   ;;  %v2857_v48 = vsel %vm2052_vm5, %v2847_v49, %v2856_v25 }
 0x1ff   : > { %v1960_v5 = vpop.f32.mrf.mxu0  ;;  %v1737_v61 = vadd.f32 %v1670_v7, %v5911_v26  ;;  %v3244_v26 = vrot.slane %v5893_v38, 2  ;;  %v226_v38 = vld [vmem:[%s6736_s3 + $0xf8] sm:$0xff]  ;;  %v2864_v7 = vrot.slane %v2862_v32, 2 }
 0x200   : > { %v6340_v27 = vadd.f32 %v1960_v5, %v1735_v57  ;;  %v4547_v36 = vpop.f32.mrf.mxu1  ;;  %v224_v57 = vld [vmem:[%s6736_s3 + $0xe8] sm:$0xff] }
 0x201   : > { %v4613_v41 = vpop.f32.mrf.mxu0  ;;  %3753 = vperm.xlu1 %4933, %v224_v57   ;;  %v2871_v57 = vshll.u32 %v5960_v42, 16 }
 0x202   : > { %v1675_v33 = vpop.f32.mrf.mxu1  ;;  %4789 = vmatmul.mubr.msk.bf16.gmra.mxu1 %vm496_vm3, %v2848_v56  ;;  %3758 = vperm.xlu0 %4932, %v225_v58  }
 0x203   : > { %v1965_v21 = vpop.f32.mrf.mxu0  ;;  %4855 = vmatmul.mubr.msk.bf16.gmra.mxu0 %vm496_vm3, %v3243_v17  ;;  %v1738_v37 = vadd.f32 %v1675_v33, %v5925_v63  ;;  %4792 = vmatprep.mubr.msk.bf16.mxu1 %vm5002_vm1, %v6776_v12  ;;  %v3245_v63 = vsel %vm3238_vm6, %v3242_v55, %v3244_v26  ;;  %v2861_v17 = vrot.slane %v2859_v18, 1  ;;  %v3246_v55 = vrot.slane %v5915_v11, 2 }
 0x204   : > { %v6352_v35 = vadd.f32 %v1965_v21, %v1736_v46  ;;  %4858 = vmatprep.mubr.msk.bf16.mxu0 %vm5002_vm1, %v6776_v12  ;;  %v4550_v4 = vpop.f32.mrf.mxu1  ;;  %v2868_v21 = vshrl.u32 %v5960_v42, 16 }
 0x205   : > { %v4616_v14 = vpop.f32.mrf.mxu0  ;;  %3763 = vperm.xlu1 %4933, %v226_v38   ;;  %v2865_v36 = vor.u32 %v2864_v7, %v2861_v17  ;;  %v3247_v11 = vsel %vm3238_vm6, %v3244_v26, %v3246_v55 }
 0x206   : > { %v1678_v30 = vpop.f32.mrf.mxu1  ;;  %3768 = vperm.xlu0 %4932, %v227_v29   ;;  %v2870_v4 = vrot.slane %v2868_v21, 1 }
 0x207   : > { %v1968_v46 = vpop.f32.mrf.mxu0  ;;  %v1739_v19 = vadd.f32 %v1678_v30, %v5934_v59  ;;  %v3248_v30 = vrot.slane %v5938_v52, 2 }
 0x208   : > { %v6369_v31 = vadd.f32 %v1968_v46, %v1737_v61  ;;  %v4551_v41 = vpop.f32.mrf.mxu1  ;;  %v228_v61 = vld [vmem:[%s6736_s3 + $0x108] sm:$0xff]  ;;  %v2873_v46 = vrot.slane %v2871_v57, 2 }
 0x209   : > { %v4617_v5 = vpop.f32.mrf.mxu0  ;;  %3773 = vperm.xlu1 %4933, %v228_v61   ;;  %v3249_v52 = vsel %vm3238_vm6, %v3246_v55, %v3248_v30 }
 0x20a   : > { %v1683_v59 = vpop.f32.mrf.mxu1  ;;  %4793 = vmatmul.mubr.msk.bf16.gmra.mxu1 %vm496_vm3, %v2857_v48  ;;  %v2880_v48 = vshll.u32 %v5982_v28, 16 }
 0x20b   : > { %v1973_v56 = vpop.f32.mrf.mxu0  ;;  %4859 = vmatmul.mubr.msk.bf16.gmra.mxu0 %vm496_vm3, %v3245_v63  ;;  %v1740_v50 = vadd.f32 %v1683_v59, %v5947_v47  ;;  %4796 = vmatprep.mubr.msk.bf16.mxu1 %vm5002_vm1, %v6776_v12  ;;  %v2866_v47 = vsel %vm2052_vm5, %v2856_v25, %v2865_v36  ;;  %v2874_v25 = vor.u32 %v2873_v46, %v2870_v4 }
 0x20c   : > { %v6378_v3 = vadd.f32 %v1973_v56, %v1738_v37  ;;  %4862 = vmatprep.mubr.msk.bf16.mxu0 %vm5002_vm1, %v6776_v12  ;;  %v4554_v58 = vpop.f32.mrf.mxu1 }
 0x20d   : > { %v4620_v49 = vpop.f32.mrf.mxu0 }
 0x20e   : > { %v1686_v37 = vpop.f32.mrf.mxu1 }
 0x20f   : > { %v1976_v33 = vpop.f32.mrf.mxu0  ;;  %v1741_v32 = vadd.f32 %v1686_v37, %v5956_v20  ;;  %v2886_v37 = vshrl.u32 %v6004_v45, 16 }
 0x210   : > { %v6389_v14 = vadd.f32 %v1976_v33, %v1739_v19  ;;  %v4555_v38 = vpop.f32.mrf.mxu1  ;;  %v2877_v19 = vshrl.u32 %v5982_v28, 16  ;;  %v3250_v33 = vrot.slane %v5960_v42, 2 }
 0x211   : > { %v4621_v18 = vpop.f32.mrf.mxu0 }
 0x212   : > { %v1691_v26 = vpop.f32.mrf.mxu1  ;;  %4797 = vmatmul.mubr.msk.bf16.gmra.mxu1 %vm496_vm3, %v2866_v47  ;;  %v2879_v49 = vrot.slane %v2877_v19, 1  ;;  %v2889_v18 = vshll.u32 %v6004_v45, 16  ;;  %v3251_v42 = vsel %vm3238_vm6, %v3248_v30, %v3250_v33 }
 0x213   : > { %v1981_v29 = vpop.f32.mrf.mxu0  ;;  %4863 = vmatmul.mubr.msk.bf16.gmra.mxu0 %vm496_vm3, %v3247_v11  ;;  %v1742_v20 = vadd.f32 %v1691_v26, %v5969_v54  ;;  %4800 = vmatprep.mubr.msk.bf16.mxu1 %vm5002_vm1, %v6776_v12  ;;  %v2875_v54 = vsel %vm2052_vm5, %v2865_v36, %v2874_v25  ;;  %v2888_v26 = vrot.slane %v2886_v37, 1 }
 0x214   : > { %v6395_v63 = vadd.f32 %v1981_v29, %v1740_v50  ;;  %4866 = vmatprep.mubr.msk.bf16.mxu0 %vm5002_vm1, %v6776_v12  ;;  %v4558_v17 = vpop.f32.mrf.mxu1  ;;  %v2882_v50 = vrot.slane %v2880_v48, 2 }
 0x215   : > { %v4624_v5 = vpop.f32.mrf.mxu0  ;;  %v3252_v17 = vrot.slane %v5982_v28, 2 }
 0x216   : > { %v1694_v56 = vpop.f32.mrf.mxu1  ;;  %v2883_v36 = vor.u32 %v2882_v50, %v2879_v49  ;;  %v2891_v5 = vrot.slane %v2889_v18, 2  ;;  %v3254_v18 = vrot.slane %v6004_v45, 2 }
 0x217   : > { %v1984_v7 = vpop.f32.mrf.mxu0  ;;  %v1743_v59 = vadd.f32 %v1694_v56, %v5978_v40  ;;  %v2898_v56 = vshll.u32 %v6027_v13, 16  ;;  %v3253_v28 = vsel %vm3238_vm6, %v3250_v33, %v3252_v17 }
 0x218   : > { %v6406_v41 = vadd.f32 %v1984_v7, %v1741_v32  ;;  %v4559_v21 = vpop.f32.mrf.mxu1  ;;  %v3255_v45 = vsel %vm3238_vm6, %v3252_v17, %v3254_v18 }
 0x219   : > { %v4625_v61 = vpop.f32.mrf.mxu0 }
 0x21a   : > { %v1699_v55 = vpop.f32.mrf.mxu1  ;;  %4801 = vmatmul.mubr.msk.bf16.gmra.mxu1 %vm496_vm3, %v2875_v54 }
 0x21b   : > { %v1989_v57 = vpop.f32.mrf.mxu0  ;;  %4867 = vmatmul.mubr.msk.bf16.gmra.mxu0 %vm496_vm3, %v3249_v52  ;;  %v1744_v40 = vadd.f32 %v1699_v55, %v5991_v24  ;;  %4804 = vmatprep.mubr.msk.bf16.mxu1 %vm5002_vm1, %v6776_v12  ;;  %v2884_v24 = vsel %vm2052_vm5, %v2874_v25, %v2883_v36  ;;  %v2892_v25 = vor.u32 %v2891_v5, %v2888_v26  ;;  %v2895_v52 = vshrl.u32 %v6027_v13, 16 }
 0x21c   : > { %v6412_v58 = vadd.f32 %v1989_v57, %v1742_v20  ;;  %4870 = vmatprep.mubr.msk.bf16.mxu0 %vm5002_vm1, %v6776_v12  ;;  %v4562_v32 = vpop.f32.mrf.mxu1  ;;  %v2900_v55 = vrot.slane %v2898_v56, 2 }
 0x21d   : > { %v4628_v11 = vpop.f32.mrf.mxu0  ;;  %v2897_v57 = vrot.slane %v2895_v52, 1  ;;  %v3256_v52 = vrot.slane %v6027_v13, 2 }
 0x21e   : > { %v1702_v46 = vpop.f32.mrf.mxu1 }
 0x21f   : > { %v1992_v47 = vpop.f32.mrf.mxu0  ;;  %v1745_v29 = vadd.f32 %v1702_v46, %v6000_v34  ;;  %v3257_v13 = vsel %vm3238_vm6, %v3254_v18, %v3256_v52 }
 0x220   : > { %v6423_v4 = vadd.f32 %v1992_v47, %v1743_v59  ;;  %v4563_v20 = vpop.f32.mrf.mxu1  ;;  %v2904_v47 = vshrl.u32 %v6049_v1, 16 }
 0x221   : > { %v4629_v38 = vpop.f32.mrf.mxu0 }
 0x222   : > { %v1707_v30 = vpop.f32.mrf.mxu1  ;;  %4805 = vmatmul.mubr.msk.bf16.gmra.mxu1 %vm496_vm3, %v2884_v24  ;;  %v2906_v20 = vrot.slane %v2904_v47, 1 }
 0x223   : > { %v1997_v19 = vpop.f32.mrf.mxu0  ;;  %4871 = vmatmul.mubr.msk.bf16.gmra.mxu0 %vm496_vm3, %v3251_v42  ;;  %v1746_v34 = vadd.f32 %v1707_v30, %v6013_v10  ;;  %4808 = vmatprep.mubr.msk.bf16.mxu1 %vm5002_vm1, %v6776_v12  ;;  %v2893_v10 = vsel %vm2052_vm5, %v2883_v36, %v2892_v25  ;;  %v2901_v36 = vor.u32 %v2900_v55, %v2897_v57  ;;  %v2907_v42 = vshll.u32 %v6049_v1, 16 }
 0x224   : > { %v6429_v48 = vadd.f32 %v1997_v19, %v1744_v40  ;;  %4874 = vmatprep.mubr.msk.bf16.mxu0 %vm5002_vm1, %v6776_v12  ;;  %v4566_v61 = vpop.f32.mrf.mxu1 }
 0x225   : > { %v4632_v7 = vpop.f32.mrf.mxu0  ;;  %v2909_v19 = vrot.slane %v2907_v42, 2  ;;  %v2913_v61 = vshrl.u32 %v6071_v16, 16 }
 0x226   : > { %v1710_v49 = vpop.f32.mrf.mxu1 }
 0x227   : > { %v2000_v59 = vpop.f32.mrf.mxu0  ;;  %v1747_v21 = vadd.f32 %v1710_v49, %v6023_v60  ;;  %v2915_v55 = vrot.slane %v2913_v61, 1  ;;  %v3260_v61 = vrot.slane %v6071_v16, 2 }
 0x228   : > { %v6440_v54 = vadd.f32 %v2000_v59, %v1745_v29  ;;  %v4567_v11 = vpop.f32.mrf.mxu1  ;;  %v2916_v59 = vshll.u32 %v6071_v16, 16 }
 0x229   : > { %v4633_v50 = vpop.f32.mrf.mxu0 }
 0x22a   : > { %v2222_v33 = vpop.f32.mrf.mxu1  ;;  %4809 = vmatmul.mubr.msk.bf16.gmra.mxu1 %vm496_vm3, %v2893_v10  ;;  %v2918_v11 = vrot.slane %v2916_v59, 2 }
 0x22b   : > { %v2005_v40 = vpop.f32.mrf.mxu0  ;;  %4875 = vmatmul.mubr.msk.bf16.gmra.mxu0 %vm496_vm3, %v3253_v28  ;;  %v2357_v60 = vadd.f32 %v2222_v33, %v6036_v9  ;;  %4812 = vmatprep.mubr.msk.bf16.mxu1 %vm5002_vm1, %v6776_v12  ;;  %v2902_v9 = vsel %vm2052_vm5, %v2892_v25, %v2901_v36  ;;  %v2910_v25 = vor.u32 %v2909_v19, %v2906_v20 }
 0x22c   : > { %v6446_v37 = vadd.f32 %v2005_v40, %v1746_v34  ;;  %4878 = vmatprep.mubr.msk.bf16.mxu0 %vm5002_vm1, %v6776_v12  ;;  %v4642_v46 = vpop.f32.mrf.mxu1 }
 0x22d   : > { %v4636_v32 = vpop.f32.mrf.mxu0  ;;  %v2922_v46 = vshrl.u32 %v6093_v22, 16 }
 0x22e   : > { %v2225_v24 = vpop.f32.mrf.mxu1 }
 0x22f   : > { %v2008_v38 = vpop.f32.mrf.mxu0  ;;  %v2358_v5 = vadd.f32 %v2225_v24, %v6045_v53 }
 0x230   : > { %v6457_v29 = vadd.f32 %v2008_v38, %v1747_v21  ;;  %v4643_v30 = vpop.f32.mrf.mxu1  ;;  %v2925_v38 = vshll.u32 %v6093_v22, 16 }
 0x231   : > { %v4637_v26 = vpop.f32.mrf.mxu0  ;;  %v2924_v30 = vrot.slane %v2922_v46, 1 }
 0x232   : > { %v2230_v17 = vpop.f32.mrf.mxu1  ;;  %4813 = vmatmul.mubr.msk.bf16.gmra.mxu1 %vm496_vm3, %v2902_v9 }
 0x233   : > { %v2639_v7 = vpop.f32.mrf.mxu0  ;;  %4879 = vmatmul.mubr.msk.bf16.gmra.mxu0 %vm496_vm3, %v3255_v45  ;;  %v2359_v53 = vadd.f32 %v2230_v17, %v6058_v44  ;;  %4816 = vmatprep.mubr.msk.bf16.mxu1 %vm5002_vm1, %v6776_v12  ;;  %v2911_v44 = vsel %vm2052_vm5, %v2901_v36, %v2910_v25  ;;  %v2919_v36 = vor.u32 %v2918_v11, %v2915_v55  ;;  %v6833_v11 = vld [vmem:[#allocation4_spill] sm:$0xff] }
 0x234   : > { %v6463_v34 = vadd.f32 %v2639_v7, %v2357_v60  ;;  %4882 = vmatprep.mubr.msk.bf16.mxu0 %vm5002_vm1, %v6776_v12  ;;  %v4646_v28 = vpop.f32.mrf.mxu1  ;;  %v3258_v60 = vrot.slane %v6049_v1, 2  ;;  %v2927_v7 = vrot.slane %v2925_v38, 2  ;;  %v3262_v38 = vrot.slane %v6093_v22, 2 }
 0x235   : > { %v4712_v56 = vpop.f32.mrf.mxu0  ;;  %v2920_v19 = vsel %vm2052_vm5, %v2910_v25, %v2919_v36 }
 0x236   : > { %v2233_v21 = vpop.f32.mrf.mxu1  ;;  %v3259_v1 = vsel %vm3238_vm6, %v3256_v52, %v3258_v60  ;;  %v2928_v25 = vor.u32 %v2927_v7, %v2924_v30  ;;  %v3261_v16 = vsel %vm3238_vm6, %v3258_v60, %v3260_v61  ;;  %v3263_v22 = vsel %vm3238_vm6, %v3260_v61, %v3262_v38 }
 0x237   : > { %v2642_v49 = vpop.f32.mrf.mxu0  ;;  %v2360_v57 = vadd.f32 %v2233_v21, %v6067_v62  ;;  %v6831_v62 = vld [vmem:[#allocation2_spill] sm:$0xff] }
 0x238   : > { %v6474_v50 = vadd.f32 %v2642_v49, %v2358_v5  ;;  %v4647_v40 = vpop.f32.mrf.mxu1  ;;  %v2931_v49 = vshrl.u32 %v6118_v43, 16 }
 0x239   : > { %v4713_v10 = vpop.f32.mrf.mxu0 }
 0x23a   : > { %v2238_v18 = vpop.f32.mrf.mxu1  ;;  %4817 = vmatmul.mubr.msk.bf16.gmra.mxu1 %vm496_vm3, %v2911_v44 }
 0x23b   : > { %v2647_v33 = vpop.f32.mrf.mxu0  ;;  %4883 = vmatmul.mubr.msk.bf16.gmra.mxu0 %vm496_vm3, %v3257_v13  ;;  %v2361_v42 = vadd.f32 %v2238_v18, %v6831_v62  ;;  %4820 = vmatprep.mubr.msk.bf16.mxu1 %vm5002_vm1, %v6776_v12  ;;  %v2934_v13 = vshll.u32 %v6118_v43, 16  ;;  %v2933_v18 = vrot.slane %v2931_v49, 1 }
 0x23c   : > { %v6480_v32 = vadd.f32 %v2647_v33, %v2359_v53  ;;  %4886 = vmatprep.mubr.msk.bf16.mxu0 %vm5002_vm1, %v6776_v12  ;;  %v4650_v45 = vpop.f32.mrf.mxu1  ;;  %v2929_v33 = vsel %vm2052_vm5, %v2919_v36, %v2928_v25 }
 0x23d   : > { %v4716_v47 = vpop.f32.mrf.mxu0 }
 0x23e   : > { %v2241_v5 = vpop.f32.mrf.mxu1  ;;  %v2936_v47 = vrot.slane %v2934_v13, 2 }
 0x23f   : > { %v2650_v24 = vpop.f32.mrf.mxu0  ;;  %v2362_v20 = vadd.f32 %v2241_v5, %v6089_v15  ;;  %v6832_v15 = vld [vmem:[#allocation3_spill] sm:$0xff]  ;;  %v2940_v5 = vshrl.u32 %v6152_v8, 16 }
 0x240   : > { %v6491_v26 = vadd.f32 %v2650_v24, %v2360_v57  ;;  %v4651_v17 = vpop.f32.mrf.mxu1  ;;  %v6834_v24 = vld [vmem:[#allocation5_spill] sm:$0xff]  ;;  %v2937_v36 = vor.u32 %v2936_v47, %v2933_v18 }
 0x241   : > { %v4717_v9 = vpop.f32.mrf.mxu0 }
 0x242   : > { %v2246_v52 = vpop.f32.mrf.mxu1  ;;  %4821 = vmatmul.mubr.msk.bf16.gmra.mxu1 %vm496_vm3, %v2920_v19  ;;  %v2943_v9 = vshll.u32 %v6152_v8, 16 }
 0x243   : > { %v2655_v56 = vpop.f32.mrf.mxu0  ;;  %4887 = vmatmul.mubr.msk.bf16.gmra.mxu0 %vm496_vm3, %v3259_v1  ;;  %v2363_v28 = vadd.f32 %v2246_v52, %v6832_v15  ;;  %4824 = vmatprep.mubr.msk.bf16.mxu1 %vm5002_vm1, %v6776_v12  ;;  %v2942_v15 = vrot.slane %v2940_v5, 1 }
 0x244   : > { %v6497_v53 = vadd.f32 %v2655_v56, %v2361_v42  ;;  %4890 = vmatprep.mubr.msk.bf16.mxu0 %vm5002_vm1, %v6776_v12  ;;  %v4654_v21 = vpop.f32.mrf.mxu1  ;;  %v6835_v56 = vld [vmem:[#allocation6_spill] sm:$0xff] }
 0x245   : > { %v4720_v59 = vpop.f32.mrf.mxu0 }
 0x246   : > { %v2249_v44 = vpop.f32.mrf.mxu1  ;;  %v2938_v59 = vsel %vm2052_vm5, %v2928_v25, %v2937_v36 }
 0x247   : > { %v2658_v10 = vpop.f32.mrf.mxu0  ;;  %v2364_v40 = vadd.f32 %v2249_v44, %v6833_v11  ;;  %v6836_v44 = vld [vmem:[#allocation8_spill] sm:$0xff]  ;;  %v6837_v11 = vld [vmem:[#allocation9_spill] sm:$0xff] }
 0x248   : > { %v6508_v57 = vadd.f32 %v2658_v10, %v2362_v20  ;;  %v4655_v62 = vpop.f32.mrf.mxu1  ;;  %v3264_v10 = vrot.slane %v6118_v43, 2 }
 0x249   : > { %v4721_v55 = vpop.f32.mrf.mxu0 }
 0x24a   : > { %v2254_v60 = vpop.f32.mrf.mxu1  ;;  %4825 = vmatmul.mubr.msk.bf16.gmra.mxu1 %vm496_vm3, %v2929_v33  ;;  %v2952_v33 = vshll.u32 %v6837_v11, 16  ;;  %v3265_v43 = vsel %vm3238_vm6, %v3262_v38, %v3264_v10 }
 0x24b   : > { %v2663_v42 = vpop.f32.mrf.mxu0  ;;  %4891 = vmatmul.mubr.msk.bf16.gmra.mxu0 %vm496_vm3, %v3261_v16  ;;  %v2365_v1 = vadd.f32 %v2254_v60, %v6834_v24  ;;  %4828 = vmatprep.mubr.msk.bf16.mxu1 %vm5002_vm1, %v6776_v12 }
 0x24c   : > { %v6514_v46 = vadd.f32 %v2663_v42, %v2363_v28  ;;  %4894 = vmatprep.mubr.msk.bf16.mxu0 %vm5002_vm1, %v6776_v12  ;;  %v4658_v20 = vpop.f32.mrf.mxu1  ;;  %v2945_v28 = vrot.slane %v2943_v9, 2  ;;  %v2954_v9 = vrot.slane %v2952_v33, 2 }
 0x24d   : > { %v4724_v45 = vpop.f32.mrf.mxu0 }
 0x24e   : > { %v2257_v7 = vpop.f32.mrf.mxu1  ;;  %v2946_v25 = vor.u32 %v2945_v28, %v2942_v15  ;;  %v6838_v45 = vld [vmem:[#allocation7_spill] sm:$0xff] }
 0x24f   : > { %v2666_v19 = vpop.f32.mrf.mxu0  ;;  %v2366_v52 = vadd.f32 %v2257_v7, %v6835_v56  ;;  %v3266_v7 = vrot.slane %v6152_v8, 2  ;;  %v6839_v56 = vld [vmem:[#allocation11_spill] sm:$0xff] }
 0x250   : > { %v6525_v30 = vadd.f32 %v2666_v19, %v2364_v40  ;;  %v4659_v49 = vpop.f32.mrf.mxu1  ;;  %v2949_v40 = vshrl.u32 %v6837_v11, 16 }
 0x251   : > { %v4725_v17 = vpop.f32.mrf.mxu0  ;;  %v3267_v8 = vsel %vm3238_vm6, %v3264_v10, %v3266_v7  ;;  %v3268_v10 = vrot.slane %v6837_v11, 2 }
 0x252   : > { %v2262_v61 = vpop.f32.mrf.mxu1  ;;  %4829 = vmatmul.mubr.msk.bf16.gmra.mxu1 %vm496_vm3, %v2938_v59  ;;  %v2951_v5 = vrot.slane %v2949_v40, 1  ;;  %v6840_v59 = vld [vmem:[#allocation12_spill] sm:$0xff] }
 0x253   : > { %v2671_v13 = vpop.f32.mrf.mxu0  ;;  %4895 = vmatmul.mubr.msk.bf16.gmra.mxu0 %vm496_vm3, %v3263_v22  ;;  %v2367_v55 = vadd.f32 %v2262_v61, %v6836_v44  ;;  %4832 = vmatprep.mubr.msk.bf16.mxu1 %vm5002_vm1, %v6776_v12  ;;  %v2958_v15 = vshrl.u32 %v6840_v59, 16  ;;  %v2961_v28 = vshll.u32 %v6840_v59, 16 }
 0x254   : > { %v6531_v21 = vadd.f32 %v2671_v13, %v2365_v1  ;;  %4898 = vmatprep.mubr.msk.bf16.mxu0 %vm5002_vm1, %v6776_v12  ;;  %v4662_v18 = vpop.f32.mrf.mxu1  ;;  %v2947_v1 = vsel %vm2052_vm5, %v2937_v36, %v2946_v25 }
 0x255   : > { %v4728_v16 = vpop.f32.mrf.mxu0  ;;  %v2960_v18 = vrot.slane %v2958_v15, 1 }
 0x256   : > { %v2265_v42 = vpop.f32.mrf.mxu1 }
 0x257   : > { %v2674_v47 = vpop.f32.mrf.mxu0  ;;  %v2368_v24 = vadd.f32 %v2265_v42, %v6838_v45 }
 0x258   : > { %v6542_v62 = vadd.f32 %v2674_v47, %v2366_v52  ;;  %v4663_v20 = vpop.f32.mrf.mxu1  ;;  %v2955_v52 = vor.u32 %v2954_v9, %v2951_v5  ;;  %v2963_v47 = vrot.slane %v2961_v28, 2  ;;  %v6842_v5 = vld [vmem:[#allocation13_spill] sm:$0xff] }
 0x259   : > { %v4729_v60 = vpop.f32.mrf.mxu0 }
 0x25a   : > { %v2270_v38 = vpop.f32.mrf.mxu1  ;;  %4833 = vmatmul.mubr.msk.bf16.gmra.mxu1 %vm496_vm3, %v2947_v1  ;;  %v2956_v33 = vsel %vm2052_vm5, %v2946_v25, %v2955_v52  ;;  %v2964_v9 = vor.u32 %v2963_v47, %v2960_v18 }
 0x25b   : > { %v2679_v19 = vpop.f32.mrf.mxu0  ;;  %4899 = vmatmul.mubr.msk.bf16.gmra.mxu0 %vm496_vm3, %v3265_v43  ;;  %v2369_v36 = vadd.f32 %v2270_v38, %v6839_v56  ;;  %4836 = vmatprep.mubr.msk.bf16.mxu1 %vm5002_vm1, %v6776_v12  ;;  %v4992_v43 = vld [vmem:[%s5055_s22 + $0xa0] ss:$0 sps:$4 sm:$0x33]  }
 0x25c   : > { %v6548_v22 = vadd.f32 %v2679_v19, %v2367_v55  ;;  %4902 = vmatprep.mubr.msk.bf16.mxu0 %vm5002_vm1, %v6776_v12  ;;  %v4666_v49 = vpop.f32.mrf.mxu1  ;;  %v6841_v55 = vld [vmem:[#allocation10_spill] sm:$0xff]  ;;  %v2967_v20 = vshrl.u32 %v4992_v43, 16  ;;  %v2970_v19 = vshll.u32 %v4992_v43, 16 }
 0x25d   : > { %v4732_v17 = vpop.f32.mrf.mxu0  ;;  %v2965_v49 = vsel %vm2052_vm5, %v2955_v52, %v2964_v9 }
 0x25e   : > { %v2273_v16 = vpop.f32.mrf.mxu1 }
 0x25f   : > { %v2682_v13 = vpop.f32.mrf.mxu0  ;;  %v2370_v40 = vadd.f32 %v2273_v16, %v6841_v55 }
 0x260   : > { %v6559_v61 = vadd.f32 %v2682_v13, %v2368_v24  ;;  %v4667_v42 = vpop.f32.mrf.mxu1  ;;  %v2969_v13 = vrot.slane %v2967_v20, 1 }
 0x261   : > { %v4733_v44 = vpop.f32.mrf.mxu0 }
 0x262   : > { %v2278_v24 = vpop.f32.mrf.mxu1  ;;  %4837 = vmatmul.mubr.msk.bf16.gmra.mxu1 %vm496_vm3, %v2956_v33 }
 0x263   : > { %v2687_v60 = vpop.f32.mrf.mxu0  ;;  %4903 = vmatmul.mubr.msk.bf16.gmra.mxu0 %vm496_vm3, %v3267_v8  ;;  %v2371_v25 = vadd.f32 %v2278_v24, %v6842_v5  ;;  %4840 = vmatprep.mubr.msk.bf16.mxu1 %vm5002_vm1, %v6776_v12  ;;  %v2972_v8 = vrot.slane %v2970_v19, 2  ;;  %v3272_v19 = vrot.slane %v4992_v43, 2 }
 0x264   : > { %v6566_v45 = vadd.f32 %v2687_v60, %v2369_v36  ;;  %4906 = vmatprep.mubr.msk.bf16.mxu0 %vm5002_vm1, %v6776_v12  ;;  %v4670_v38 = vpop.f32.mrf.mxu1  ;;  %v3269_v36 = vsel %vm3238_vm6, %v3266_v7, %v3268_v10 }
 0x265   : > { %v4736_v1 = vpop.f32.mrf.mxu0  ;;  %v2973_v52 = vor.u32 %v2972_v8, %v2969_v13 }
 0x266   : > { %v2281_v15 = vpop.f32.mrf.mxu1 }
 0x267   : > { %v2690_v17 = vpop.f32.mrf.mxu0  ;;  %v2372_v28 = vadd.f32 %v2281_v15, %v6251_v23  ;;  %v2974_v5 = vsel %vm2052_vm5, %v2964_v9, %v2973_v52 }
 0x268   : > { %v6575_v56 = vadd.f32 %v2690_v17, %v2370_v40  ;;  %v4671_v16 = vpop.f32.mrf.mxu1  ;;  %v3270_v40 = vrot.slane %v6840_v59, 2 }
 0x269   : > { %v4737_v11 = vpop.f32.mrf.mxu0 }
 0x26a   : > { %v2286_v7 = vpop.f32.mrf.mxu1  ;;  %4841 = vmatmul.mubr.msk.bf16.gmra.mxu1 %vm496_vm3, %v2965_v49  ;;  %v3271_v60 = vsel %vm3238_vm6, %v3268_v10, %v3270_v40  ;;  %v3273_v9 = vsel %vm3238_vm6, %v3270_v40, %v3272_v19 }
 0x26b   : > { %v2695_v44 = vpop.f32.mrf.mxu0  ;;  %4907 = vmatmul.mubr.msk.bf16.gmra.mxu0 %vm496_vm3, %v3269_v36  ;;  %v2373_v23 = vadd.f32 %v2286_v7, %v6264_v51  ;;  %4844 = vmatprep.mubr.msk.bf16.mxu1 %vm5002_vm1, %v6776_v12 }
 0x26c   : > { %v6581_v55 = vadd.f32 %v2695_v44, %v2371_v25  ;;  %4910 = vmatprep.mubr.msk.bf16.mxu0 %vm5002_vm1, %v6776_v12  ;;  %v4674_v18 = vpop.f32.mrf.mxu1 }
 0x26d   : > { %v4740_v33 = vpop.f32.mrf.mxu0 }
 0x26e   : > { %v2289_v24 = vpop.f32.mrf.mxu1 }
 0x26f   : > { %v2698_v47 = vpop.f32.mrf.mxu0  ;;  %v2374_v59 = vadd.f32 %v2289_v24, %v6281_v39 }
 0x270   : > { %v6590_v42 = vadd.f32 %v2698_v47, %v2372_v28  ;;  %v4675_v25 = vpop.f32.mrf.mxu1 }
 0x271   : > { %v4741_v1 = vpop.f32.mrf.mxu0 }
 0x272   : > { %v2294_v38 = vpop.f32.mrf.mxu1  ;;  %4845 = vmatmul.mubr.msk.bf16.gmra.mxu1 %vm496_vm3, %v2974_v5 }
 0x273   : > { %v2703_v20 = vpop.f32.mrf.mxu0  ;;  %4911 = vmatmul.mubr.msk.bf16.gmra.mxu0 %vm496_vm3, %v3271_v60  ;;  %v2375_v17 = vadd.f32 %v2294_v38, %v6294_v2 }
 0x274   : > { %v6596_v51 = vadd.f32 %v2703_v20, %v2373_v23  ;;  %4914 = vmatprep.mubr.msk.bf16.mxu0 %vm5002_vm1, %v6776_v12  ;;  %v4678_v36 = vpop.f32.mrf.mxu1 }
 0x275   : > { %v4744_v10 = vpop.f32.mrf.mxu0 }
 0x276   : > { %v2297_v11 = vpop.f32.mrf.mxu1 }
 0x277   : > { %v2706_v39 = vpop.f32.mrf.mxu0  ;;  %v2376_v49 = vadd.f32 %v2297_v11, %v6311_v0 }
 0x278   : > { %v6602_v15 = vadd.f32 %v2706_v39, %v2374_v59  ;;  %v4679_v13 = vpop.f32.mrf.mxu1 }
 0x279   : > { %v4745_v28 = vpop.f32.mrf.mxu0 }
 0x27a   : > { %v2302_v43 = vpop.f32.mrf.mxu1 }
 0x27b   : > { %v2711_v8 = vpop.f32.mrf.mxu0  ;;  %4915 = vmatmul.mubr.msk.bf16.gmra.mxu0 %vm496_vm3, %v3273_v9  ;;  %v2377_v2 = vadd.f32 %v2302_v43, %v6323_v6 }
 0x27c   : > { %v6607_v12 = vadd.f32 %v2711_v8, %v2375_v17  ;;  %v4682_v44 = vpop.f32.mrf.mxu1 }
 0x27d   : > { %v4748_v16 = vpop.f32.mrf.mxu0 }
 0x27e   : > { %v2305_v23 = vpop.f32.mrf.mxu1 }
 0x27f   : > { %v2714_v7 = vpop.f32.mrf.mxu0  ;;  %v2378_v52 = vadd.f32 %v2305_v23, %v6340_v27 }
 0x280   : > { %v6610_v33 = vadd.f32 %v2714_v7, %v2376_v49  ;;  %v4683_v18 = vpop.f32.mrf.mxu1 }
 0x281   : > { %v4749_v40 = vpop.f32.mrf.mxu0 }
 0x282   : > { %v2310_v60 = vpop.f32.mrf.mxu1 }
 0x283   : > { %v2719_v0 = vpop.f32.mrf.mxu0  ;;  %v2379_v1 = vadd.f32 %v2310_v60, %v6352_v35 }
 0x284   : > { %v6613_v47 = vadd.f32 %v2719_v0, %v2377_v2  ;;  %v4686_v59 = vpop.f32.mrf.mxu1 }
 0x285   : > { %v4752_v24 = vpop.f32.mrf.mxu0 }
 0x286   : > { %v2313_v6 = vpop.f32.mrf.mxu1 }
 0x287   : > { %v2722_v5 = vpop.f32.mrf.mxu0  ;;  %v2380_v19 = vadd.f32 %v2313_v6, %v6369_v31 }
 0x288   : > { %v6616_v25 = vadd.f32 %v2722_v5, %v2378_v52  ;;  %v4687_v38 = vpop.f32.mrf.mxu1 }
 0x289   : > { %v4753_v20 = vpop.f32.mrf.mxu0 }
 0x28a   : > { %v2318_v27 = vpop.f32.mrf.mxu1 }
 0x28b   : > { %v2727_v10 = vpop.f32.mrf.mxu0  ;;  %v2381_v39 = vadd.f32 %v2318_v27, %v6378_v3 }
 0x28c   : > { %v6619_v17 = vadd.f32 %v2727_v10, %v2379_v1  ;;  %v4690_v9 = vpop.f32.mrf.mxu1 }
 0x28d   : > { %v4756_v36 = vpop.f32.mrf.mxu0 }
 0x28e   : > { %v2321_v35 = vpop.f32.mrf.mxu1 }
 0x28f   : > { %v2730_v11 = vpop.f32.mrf.mxu0  ;;  %v2382_v13 = vadd.f32 %v2321_v35, %v6389_v14 }
 0x290   : > { %v6622_v28 = vadd.f32 %v2730_v11, %v2380_v19  ;;  %v4691_v8 = vpop.f32.mrf.mxu1 }
 0x291   : > { %v4757_v49 = vpop.f32.mrf.mxu0 }
 0x292   : > { %v2326_v31 = vpop.f32.mrf.mxu1 }
 0x293   : > { %v2735_v43 = vpop.f32.mrf.mxu0  ;;  %v2383_v44 = vadd.f32 %v2326_v31, %v6395_v63 }
 0x294   : > { %v6625_v16 = vadd.f32 %v2735_v43, %v2381_v39  ;;  %v4694_v7 = vpop.f32.mrf.mxu1 }
 0x295   : > { %v4760_v2 = vpop.f32.mrf.mxu0 }
 0x296   : > { %v2329_v3 = vpop.f32.mrf.mxu1 }
 0x297   : > { %v2738_v23 = vpop.f32.mrf.mxu0  ;;  %v2384_v18 = vadd.f32 %v2329_v3, %v6406_v41 }
 0x298   : > { %v6628_v40 = vadd.f32 %v2738_v23, %v2382_v13  ;;  %v4695_v0 = vpop.f32.mrf.mxu1 }
 0x299   : > { %v4761_v52 = vpop.f32.mrf.mxu0 }
 0x29a   : > { %v2334_v14 = vpop.f32.mrf.mxu1 }
 0x29b   : > { %v2743_v60 = vpop.f32.mrf.mxu0  ;;  %v2385_v59 = vadd.f32 %v2334_v14, %v6412_v58 }
 0x29c   : > { %v6631_v24 = vadd.f32 %v2743_v60, %v2383_v44  ;;  %v4698_v5 = vpop.f32.mrf.mxu1 }
 0x29d   : > { %v4764_v1 = vpop.f32.mrf.mxu0 }
 0x29e   : > { %v2337_v63 = vpop.f32.mrf.mxu1 }
 0x29f   : > { %v2746_v6 = vpop.f32.mrf.mxu0  ;;  %v2386_v38 = vadd.f32 %v2337_v63, %v6423_v4 }
 0x2a0   : > { %v6634_v20 = vadd.f32 %v2746_v6, %v2384_v18  ;;  %v4699_v10 = vpop.f32.mrf.mxu1 }
 0x2a1   : > { %v4765_v19 = vpop.f32.mrf.mxu0 }
 0x2a2   : > { %v2342_v41 = vpop.f32.mrf.mxu1 }
 0x2a3   : > { %v2751_v27 = vpop.f32.mrf.mxu0  ;;  %v2387_v9 = vadd.f32 %v2342_v41, %v6429_v48 }
 0x2a4   : > { %v6637_v36 = vadd.f32 %v2751_v27, %v2385_v59  ;;  %v4702_v11 = vpop.f32.mrf.mxu1 }
 0x2a5   : > { %v4768_v39 = vpop.f32.mrf.mxu0 }
 0x2a6   : > { %v2345_v58 = vpop.f32.mrf.mxu1 }
 0x2a7   : > { %v2754_v35 = vpop.f32.mrf.mxu0  ;;  %v2388_v8 = vadd.f32 %v2345_v58, %v6440_v54 }
 0x2a8   : > { %v6640_v49 = vadd.f32 %v2754_v35, %v2386_v38  ;;  %v4703_v43 = vpop.f32.mrf.mxu1 }
 0x2a9   : > { %v4769_v13 = vpop.f32.mrf.mxu0 }
 0x2aa   : > { %v2350_v4 = vpop.f32.mrf.mxu1 }
 0x2ab   : > { %v2759_v31 = vpop.f32.mrf.mxu0  ;;  %v2389_v7 = vadd.f32 %v2350_v4, %v6446_v37 }
 0x2ac   : > { %v6643_v2 = vadd.f32 %v2759_v31, %v2387_v9  ;;  %v4706_v23 = vpop.f32.mrf.mxu1  ;;  %v3609_v9 = vpop.permute.xlu0 %3608 }
 0x2ad   : > { %v4772_v44 = vpop.f32.mrf.mxu0 }
 0x2ae   : > { %v2353_v48 = vpop.f32.mrf.mxu1 }
 0x2af   : > { %v2762_v3 = vpop.f32.mrf.mxu0  ;;  %v2390_v0 = vadd.f32 %v2353_v48, %v6457_v29  ;;  %v6658_v29 = vld [vmem:[%s6735_s2] ss:$0 sm:$0xff] }
 0x2b0   : > { %v6646_v52 = vadd.f32 %v2762_v3, %v2388_v8  ;;  %v4707_v60 = vpop.f32.mrf.mxu1  ;;  %v3614_v23 = vpop.permute.xlu0 %3613 }
 0x2b1   : > { %v4773_v18 = vpop.f32.mrf.mxu0 }
 0x2b2   : > { %v3063_v54 = vpop.f32.mrf.mxu1 }
 0x2b3   : > { %v2767_v14 = vpop.f32.mrf.mxu0  ;;  %v3198_v5 = vadd.f32 %v3063_v54, %v6463_v34 }
 0x2b4   : > { %v6649_v1 = vadd.f32 %v2767_v14, %v2389_v7  ;;  %v4782_v6 = vpop.f32.mrf.mxu1 }
 0x2b5   : > { %v4776_v59 = vpop.f32.mrf.mxu0 }
 0x2b6   : > { %v3066_v37 = vpop.f32.mrf.mxu1  ;;  %v3619_v59 = vpop.permute.xlu1 %3618 }
 0x2b7   : > { %v2770_v63 = vpop.f32.mrf.mxu0  ;;  %v3199_v10 = vadd.f32 %v3066_v37, %v6474_v50 }
 0x2b8   : > { %v6652_v19 = vadd.f32 %v2770_v63, %v2390_v0  ;;  %v4783_v27 = vpop.f32.mrf.mxu1 }
 0x2b9   : > { %v4777_v38 = vpop.f32.mrf.mxu0 }
 0x2ba   : > { %v3071_v11 = vpop.f32.mrf.mxu1 }
 0x2bb   : > { %v3362_v41 = vpop.f32.mrf.mxu0  ;;  %v3200_v34 = vadd.f32 %v3071_v11, %v6480_v32 }
 0x2bc   : > { %v3497_v39 = vadd.f32 %v3362_v41, %v3198_v5  ;;  %v4786_v13 = vpop.f32.mrf.mxu1 }
 0x2bd   : > { %v4852_v35 = vpop.f32.mrf.mxu0 }
 0x2be   : > { %v3538_v58 = vadd.f32 %v6658_v29, %v3497_v39  ;;  %v3074_v31 = vpop.f32.mrf.mxu1 }
 0x2bf   : > { %v3365_v8 = vpop.f32.mrf.mxu0  ;;  %v3201_v4 = vadd.f32 %v3074_v31, %v6491_v26 }
 0x2c0   : > { %v3498_v43 = vadd.f32 %v3365_v8, %v3199_v10  ;;  %v3572_v7 = vmax.f32 %v3538_v58, 0.0  ;;  %v4787_v3 = vpop.f32.mrf.mxu1  ;;  %v3624_v58 = vpop.permute.xlu1 %3623 }
 0x2c1   : > { %v4853_v50 = vpop.f32.mrf.mxu0 }
 0x2c2   : > { %v3539_v44 = vadd.f32 %v6658_v29, %v3498_v43  ;;  %v3079_v60 = vpop.f32.mrf.mxu1  ;;  %v3776_v32 = vmul.f32 %v3609_v9, %v3572_v7 }
 0x2c3   : > { %v3370_v48 = vpop.f32.mrf.mxu0  ;;  %v3202_v41 = vadd.f32 %v3079_v60, %v6497_v53  ;;  %v3629_v53 = vpop.permute.xlu0 %3628 }
 0x2c4   : > { %v3499_v18 = vadd.f32 %v3370_v48, %v3200_v34  ;;  %v3573_v0 = vmax.f32 %v3539_v44, 0.0  ;;  %v4790_v6 = vpop.f32.mrf.mxu1 }
 0x2c5   : > { %v4856_v14 = vpop.f32.mrf.mxu0 }
 0x2c6   : > { %v3540_v54 = vadd.f32 %v6658_v29, %v3499_v18  ;;  %v3777_v5 = vmul.f32 %v3614_v23, %v3573_v0  ;;  %v3082_v10 = vpop.f32.mrf.mxu1 }
 0x2c7   : > { %v3373_v63 = vpop.f32.mrf.mxu0  ;;  %v3203_v50 = vadd.f32 %v3082_v10, %v6508_v57  ;;  %v3634_v57 = vpop.permute.xlu1 %3633 }
 0x2c8   : > { %v3574_v37 = vmax.f32 %v3540_v54, 0.0  ;;  %v3810_v38 = vadd.f32 %v3777_v5, %v3776_v32  ;;  %v3500_v26 = vadd.f32 %v3373_v63, %v3201_v4  ;;  %v4791_v35 = vpop.f32.mrf.mxu1 }
 0x2c9   : > { %v4857_v27 = vpop.f32.mrf.mxu0  ;;  %v3639_v35 = vpop.permute.xlu0 %3638 }
 0x2ca   : > { %v3778_v39 = vmul.f32 %v3619_v59, %v3574_v37  ;;  %v3541_v11 = vadd.f32 %v6658_v29, %v3500_v26  ;;  %v3087_v43 = vpop.f32.mrf.mxu1 }
 0x2cb   : > { %v3378_v34 = vpop.f32.mrf.mxu0  ;;  %v3204_v14 = vadd.f32 %v3087_v43, %v6514_v46 }
 0x2cc   : > { %v3575_v9 = vmax.f32 %v3541_v11, 0.0  ;;  %v3811_v13 = vadd.f32 %v3810_v38, %v3778_v39  ;;  %v3501_v8 = vadd.f32 %v3378_v34, %v3202_v41  ;;  %v4794_v7 = vpop.f32.mrf.mxu1 }
 0x2cd   : > { %v4860_v31 = vpop.f32.mrf.mxu0 }
 0x2ce   : > { %v3779_v44 = vmul.f32 %v3624_v58, %v3575_v9  ;;  %v3542_v4 = vadd.f32 %v6658_v29, %v3501_v8  ;;  %v3090_v0 = vpop.f32.mrf.mxu1 }
 0x2cf   : > { %v3381_v23 = vpop.f32.mrf.mxu0  ;;  %v3205_v10 = vadd.f32 %v3090_v0, %v6525_v30 }
 0x2d0   : > { %v3812_v3 = vadd.f32 %v3811_v13, %v3779_v44  ;;  %v3576_v48 = vmax.f32 %v3542_v4, 0.0  ;;  %v3502_v18 = vadd.f32 %v3381_v23, %v3203_v50  ;;  %v4795_v59 = vpop.f32.mrf.mxu1  ;;  %v3644_v4 = vpop.permute.xlu1 %3643 }
 0x2d1   : > { %v4861_v60 = vpop.f32.mrf.mxu0 }
 0x2d2   : > { %v3780_v32 = vmul.f32 %v3629_v53, %v3576_v48  ;;  %v3543_v54 = vadd.f32 %v6658_v29, %v3502_v18  ;;  %v3095_v38 = vpop.f32.mrf.mxu1 }
 0x2d3   : > { %v3386_v5 = vpop.f32.mrf.mxu0  ;;  %v3206_v8 = vadd.f32 %v3095_v38, %v6531_v21 }
 0x2d4   : > { %v3813_v6 = vadd.f32 %v3812_v3, %v3780_v32  ;;  %v3577_v63 = vmax.f32 %v3543_v54, 0.0  ;;  %v3503_v37 = vadd.f32 %v3386_v5, %v3204_v14  ;;  %v4798_v39 = vpop.f32.mrf.mxu1  ;;  %v3649_v32 = vpop.permute.xlu0 %3648 }
 0x2d5   : > { %v4864_v26 = vpop.f32.mrf.mxu0 }
 0x2d6   : > { %v3781_v27 = vmul.f32 %v3634_v57, %v3577_v63  ;;  %v3544_v41 = vadd.f32 %v6658_v29, %v3503_v37  ;;  %v3098_v9 = vpop.f32.mrf.mxu1 }
 0x2d7   : > { %v3389_v11 = vpop.f32.mrf.mxu0  ;;  %v3207_v48 = vadd.f32 %v3098_v9, %v6542_v62 }
 0x2d8   : > { %v3814_v46 = vadd.f32 %v3813_v6, %v3781_v27  ;;  %v3578_v34 = vmax.f32 %v3544_v41, 0.0  ;;  %v3504_v58 = vadd.f32 %v3389_v11, %v3205_v10  ;;  %v4799_v50 = vpop.f32.mrf.mxu1  ;;  %v3654_v10 = vpop.permute.xlu1 %3653 }
 0x2d9   : > { %v4865_v13 = vpop.f32.mrf.mxu0 }
 0x2da   : > { %v3782_v43 = vmul.f32 %v3639_v35, %v3578_v34  ;;  %v3545_v31 = vadd.f32 %v6658_v29, %v3504_v58  ;;  %v3103_v3 = vpop.f32.mrf.mxu1  ;;  %v3659_v13 = vpop.permute.xlu0 %3658 }
 0x2db   : > { %v3394_v44 = vpop.f32.mrf.mxu0  ;;  %v3208_v57 = vadd.f32 %v3103_v3, %v6548_v22 }
 0x2dc   : > { %v3815_v30 = vadd.f32 %v3814_v46, %v3782_v43  ;;  %v3579_v7 = vmax.f32 %v3545_v31, 0.0  ;;  %v3505_v23 = vadd.f32 %v3394_v44, %v3206_v8  ;;  %v4802_v60 = vpop.f32.mrf.mxu1  ;;  %v3664_v3 = vpop.permute.xlu1 %3663 }
 0x2dd   : > { %v4868_v53 = vpop.f32.mrf.mxu0 }
 0x2de   : > { %v3783_v18 = vmul.f32 %v3644_v4, %v3579_v7  ;;  %v3546_v0 = vadd.f32 %v6658_v29, %v3505_v23  ;;  %v3106_v5 = vpop.f32.mrf.mxu1 }
 0x2df   : > { %v3397_v14 = vpop.f32.mrf.mxu0  ;;  %v3209_v35 = vadd.f32 %v3106_v5, %v6559_v61 }
 0x2e0   : > { %v3816_v21 = vadd.f32 %v3815_v30, %v3783_v18  ;;  %v3580_v54 = vmax.f32 %v3546_v0, 0.0  ;;  %v3506_v59 = vadd.f32 %v3397_v14, %v3207_v48  ;;  %v4803_v38 = vpop.f32.mrf.mxu1 }
 0x2e1   : > { %v4869_v6 = vpop.f32.mrf.mxu0 }
 0x2e2   : > { %v3784_v63 = vmul.f32 %v3649_v32, %v3580_v54  ;;  %v3547_v37 = vadd.f32 %v6658_v29, %v3506_v59  ;;  %v3111_v39 = vpop.f32.mrf.mxu1  ;;  %v3669_v59 = vpop.permute.xlu0 %3668 }
 0x2e3   : > { %v3402_v26 = vpop.f32.mrf.mxu0  ;;  %v3210_v44 = vadd.f32 %v3111_v39, %v6566_v45 }
 0x2e4   : > { %v3817_v62 = vadd.f32 %v3816_v21, %v3784_v63  ;;  %v3581_v27 = vmax.f32 %v3547_v37, 0.0  ;;  %v3507_v41 = vadd.f32 %v3402_v26, %v3208_v57  ;;  %v4806_v58 = vpop.f32.mrf.mxu1 }
 0x2e5   : > { %v4872_v11 = vpop.f32.mrf.mxu0 }
 0x2e6   : > { %v3785_v46 = vmul.f32 %v3654_v10, %v3581_v27  ;;  %v3548_v34 = vadd.f32 %v6658_v29, %v3507_v41  ;;  %v3114_v31 = vpop.f32.mrf.mxu1  ;;  %v3674_v27 = vpop.permute.xlu1 %3673 }
 0x2e7   : > { %v3405_v9 = vpop.f32.mrf.mxu0  ;;  %v3211_v60 = vadd.f32 %v3114_v31, %v6575_v56 }
 0x2e8   : > { %v3818_v22 = vadd.f32 %v3817_v62, %v3785_v46  ;;  %v3582_v8 = vmax.f32 %v3548_v34, 0.0  ;;  %v3508_v43 = vadd.f32 %v3405_v9, %v3209_v35  ;;  %v4807_v7 = vpop.f32.mrf.mxu1 }
 0x2e9   : > { %v4873_v50 = vpop.f32.mrf.mxu0 }
 0x2ea   : > { %v3786_v4 = vmul.f32 %v3659_v13, %v3582_v8  ;;  %v3549_v30 = vadd.f32 %v6658_v29, %v3508_v43  ;;  %v3119_v18 = vpop.f32.mrf.mxu1 }
 0x2eb   : > { %v3410_v23 = vpop.f32.mrf.mxu0  ;;  %v3212_v37 = vadd.f32 %v3119_v18, %v6581_v55 }
 0x2ec   : > { %v3819_v61 = vadd.f32 %v3818_v22, %v3786_v4  ;;  %v3583_v53 = vmax.f32 %v3549_v30, 0.0  ;;  %v3509_v48 = vadd.f32 %v3410_v23, %v3210_v44  ;;  %v4810_v21 = vpop.f32.mrf.mxu1  ;;  %v3679_v22 = vpop.permute.xlu0 %3678 }
 0x2ed   : > { %v4876_v0 = vpop.f32.mrf.mxu0 }
 0x2ee   : > { %v3787_v14 = vmul.f32 %v3664_v3, %v3583_v53  ;;  %v3550_v32 = vadd.f32 %v6658_v29, %v3509_v48  ;;  %v3122_v57 = vpop.f32.mrf.mxu1  ;;  %v3684_v3 = vpop.permute.xlu1 %3683 }
 0x2ef   : > { %v3413_v54 = vpop.f32.mrf.mxu0  ;;  %v3213_v46 = vadd.f32 %v3122_v57, %v6590_v42 }
 0x2f0   : > { %v3820_v45 = vadd.f32 %v3819_v61, %v3787_v14  ;;  %v3584_v5 = vmax.f32 %v3550_v32, 0.0  ;;  %v3510_v6 = vadd.f32 %v3413_v54, %v3211_v60  ;;  %v4811_v10 = vpop.f32.mrf.mxu1  ;;  %v3689_v54 = vpop.permute.xlu0 %3688 }
 0x2f1   : > { %v4877_v63 = vpop.f32.mrf.mxu0 }
 0x2f2   : > { %v3788_v38 = vmul.f32 %v3669_v59, %v3584_v5  ;;  %v3551_v26 = vadd.f32 %v6658_v29, %v3510_v6  ;;  %v3127_v11 = vpop.f32.mrf.mxu1  ;;  %v3694_v10 = vpop.permute.xlu1 %3693 }
 0x2f3   : > { %v3418_v62 = vpop.f32.mrf.mxu0  ;;  %v3214_v44 = vadd.f32 %v3127_v11, %v6596_v51 }
 0x2f4   : > { %v3821_v56 = vadd.f32 %v3820_v45, %v3788_v38  ;;  %v3585_v41 = vmax.f32 %v3551_v26, 0.0  ;;  %v3511_v39 = vadd.f32 %v3418_v62, %v3212_v37  ;;  %v4814_v9 = vpop.f32.mrf.mxu1 }
 0x2f5   : > { %v4880_v35 = vpop.f32.mrf.mxu0 }
 0x2f6   : > { %v3789_v34 = vmul.f32 %v3674_v27, %v3585_v41  ;;  %v3552_v58 = vadd.f32 %v6658_v29, %v3511_v39  ;;  %v3130_v31 = vpop.f32.mrf.mxu1 }
 0x2f7   : > { %v3421_v13 = vpop.f32.mrf.mxu0  ;;  %v3215_v0 = vadd.f32 %v3130_v31, %v6602_v15 }
 0x2f8   : > { %v3822_v55 = vadd.f32 %v3821_v56, %v3789_v34  ;;  %v3586_v8 = vmax.f32 %v3552_v58, 0.0  ;;  %v3512_v43 = vadd.f32 %v3421_v13, %v3213_v46  ;;  %v4815_v7 = vpop.f32.mrf.mxu1  ;;  %v3699_v58 = vpop.permute.xlu0 %3698 }
 0x2f9   : > { %v4881_v50 = vpop.f32.mrf.mxu0 }
 0x2fa   : > { %v3790_v4 = vmul.f32 %v3679_v22, %v3586_v8  ;;  %v3553_v30 = vadd.f32 %v6658_v29, %v3512_v43  ;;  %v3135_v48 = vpop.f32.mrf.mxu1 }
 0x2fb   : > { %v3426_v23 = vpop.f32.mrf.mxu0  ;;  %v3216_v57 = vadd.f32 %v3135_v48, %v6607_v12 }
 0x2fc   : > { %v3823_v42 = vadd.f32 %v3822_v55, %v3790_v4  ;;  %v3587_v61 = vmax.f32 %v3553_v30, 0.0  ;;  %v3513_v53 = vadd.f32 %v3426_v23, %v3214_v44  ;;  %v4818_v32 = vpop.f32.mrf.mxu1  ;;  %v3704_v4 = vpop.permute.xlu1 %3703 }
 0x2fd   : > { %v4884_v18 = vpop.f32.mrf.mxu0 }
 0x2fe   : > { %v3791_v60 = vmul.f32 %v3684_v3, %v3587_v61  ;;  %v3554_v14 = vadd.f32 %v6658_v29, %v3513_v53  ;;  %v3138_v5 = vpop.f32.mrf.mxu1 }
 0x2ff   : > { %v3429_v21 = vpop.f32.mrf.mxu0  ;;  %v3217_v39 = vadd.f32 %v3138_v5, %v6610_v33 }
 0x300   : > { %v3824_v51 = vadd.f32 %v3823_v42, %v3791_v60  ;;  %v3588_v59 = vmax.f32 %v3554_v14, 0.0  ;;  %v3514_v45 = vadd.f32 %v3429_v21, %v3215_v0  ;;  %v4819_v38 = vpop.f32.mrf.mxu1  ;;  %v3709_v0 = vpop.permute.xlu0 %3708 }
 0x301   : > { %v4885_v6 = vpop.f32.mrf.mxu0 }
 0x302   : > { %v3792_v63 = vmul.f32 %v3689_v54, %v3588_v59  ;;  %v3555_v37 = vadd.f32 %v6658_v29, %v3514_v45  ;;  %v3143_v56 = vpop.f32.mrf.mxu1  ;;  %v3714_v6 = vpop.permute.xlu1 %3713 }
 0x303   : > { %v3434_v26 = vpop.f32.mrf.mxu0  ;;  %v3218_v8 = vadd.f32 %v3143_v56, %v6613_v47 }
 0x304   : > { %v3825_v15 = vadd.f32 %v3824_v51, %v3792_v63  ;;  %v3589_v62 = vmax.f32 %v3555_v37, 0.0  ;;  %v3515_v27 = vadd.f32 %v3434_v26, %v3216_v57  ;;  %v4822_v46 = vpop.f32.mrf.mxu1  ;;  %v3719_v56 = vpop.permute.xlu0 %3718 }
 0x305   : > { %v4888_v41 = vpop.f32.mrf.mxu0 }
 0x306   : > { %v3793_v11 = vmul.f32 %v3694_v10, %v3589_v62  ;;  %v3556_v35 = vadd.f32 %v6658_v29, %v3515_v27  ;;  %v3146_v22 = vpop.f32.mrf.mxu1 }
 0x307   : > { %v3437_v34 = vpop.f32.mrf.mxu0  ;;  %v3219_v42 = vadd.f32 %v3146_v22, %v6616_v25 }
 0x308   : > { %v3826_v12 = vadd.f32 %v3825_v15, %v3793_v11  ;;  %v3590_v9 = vmax.f32 %v3556_v35, 0.0  ;;  %v3516_v13 = vadd.f32 %v3437_v34, %v3217_v39  ;;  %v4823_v50 = vpop.f32.mrf.mxu1 }
 0x309   : > { %v4889_v55 = vpop.f32.mrf.mxu0 }
 0x30a   : > { %v3794_v43 = vmul.f32 %v3699_v58, %v3590_v9  ;;  %v3557_v31 = vadd.f32 %v6658_v29, %v3516_v13  ;;  %v3151_v23 = vpop.f32.mrf.mxu1  ;;  %v3724_v13 = vpop.permute.xlu1 %3723 }
 0x30b   : > { %v3442_v44 = vpop.f32.mrf.mxu0  ;;  %v3220_v54 = vadd.f32 %v3151_v23, %v6619_v17 }
 0x30c   : > { %v3827_v33 = vadd.f32 %v3826_v12, %v3794_v43  ;;  %v3591_v30 = vmax.f32 %v3557_v31, 0.0  ;;  %v3517_v7 = vadd.f32 %v3442_v44, %v3218_v8  ;;  %v4826_v48 = vpop.f32.mrf.mxu1 }
 0x30d   : > { %v4892_v3 = vpop.f32.mrf.mxu0 }
 0x30e   : > { %v3795_v61 = vmul.f32 %v3704_v4, %v3591_v30  ;;  %v3558_v53 = vadd.f32 %v6658_v29, %v3517_v7  ;;  %v3154_v32 = vpop.f32.mrf.mxu1  ;;  %v3729_v30 = vpop.permute.xlu0 %3728 }
 0x30f   : > { %v3445_v18 = vpop.f32.mrf.mxu0  ;;  %v3221_v26 = vadd.f32 %v3154_v32, %v6622_v28 }
 0x310   : > { %v3828_v47 = vadd.f32 %v3827_v33, %v3795_v61  ;;  %v3592_v60 = vmax.f32 %v3558_v53, 0.0  ;;  %v3518_v14 = vadd.f32 %v3445_v18, %v3219_v42  ;;  %v4827_v45 = vpop.f32.mrf.mxu1 }
 0x311   : > { %v4893_v21 = vpop.f32.mrf.mxu0 }
 0x312   : > { %v3796_v51 = vmul.f32 %v3709_v0, %v3592_v60  ;;  %v3559_v59 = vadd.f32 %v6658_v29, %v3518_v14  ;;  %v3159_v37 = vpop.f32.mrf.mxu1 }
 0x313   : > { %v3450_v5 = vpop.f32.mrf.mxu0  ;;  %v3222_v46 = vadd.f32 %v3159_v37, %v6625_v16 }
 0x314   : > { %v3829_v25 = vadd.f32 %v3828_v47, %v3796_v51  ;;  %v3593_v57 = vmax.f32 %v3559_v59, 0.0  ;;  %v3519_v63 = vadd.f32 %v3450_v5, %v3220_v54  ;;  %v4830_v62 = vpop.f32.mrf.mxu1  ;;  %v3734_v47 = vpop.permute.xlu1 %3733 }
 0x315   : > { %v4896_v38 = vpop.f32.mrf.mxu0 }
 0x316   : > { %v3797_v10 = vmul.f32 %v3714_v6, %v3593_v57  ;;  %v3560_v15 = vadd.f32 %v6658_v29, %v3519_v63  ;;  %v3162_v11 = vpop.f32.mrf.mxu1  ;;  %v3739_v6 = vpop.permute.xlu0 %3738 }
 0x317   : > { %v3453_v27 = vpop.f32.mrf.mxu0  ;;  %v3223_v31 = vadd.f32 %v3162_v11, %v6628_v40 }
 0x318   : > { %v3830_v17 = vadd.f32 %v3829_v25, %v3797_v10  ;;  %v3594_v41 = vmax.f32 %v3560_v15, 0.0  ;;  %v3520_v39 = vadd.f32 %v3453_v27, %v3221_v26  ;;  %v4831_v12 = vpop.f32.mrf.mxu1  ;;  %v3744_v27 = vpop.permute.xlu1 %3743 }
 0x319   : > { %v4897_v35 = vpop.f32.mrf.mxu0 }
 0x31a   : > { %v3798_v34 = vmul.f32 %v3719_v56, %v3594_v41  ;;  %v3561_v58 = vadd.f32 %v6658_v29, %v3520_v39  ;;  %v3167_v8 = vpop.f32.mrf.mxu1  ;;  %v3749_v12 = vpop.permute.xlu0 %3748 }
 0x31b   : > { %v3458_v9 = vpop.f32.mrf.mxu0  ;;  %v3224_v61 = vadd.f32 %v3167_v8, %v6631_v24 }
 0x31c   : > { %v3831_v28 = vadd.f32 %v3830_v17, %v3798_v34  ;;  %v3595_v22 = vmax.f32 %v3561_v58, 0.0  ;;  %v3521_v55 = vadd.f32 %v3458_v9, %v3222_v46  ;;  %v4834_v4 = vpop.f32.mrf.mxu1 }
 0x31d   : > { %v4900_v43 = vpop.f32.mrf.mxu0 }
 0x31e   : > { %v3799_v50 = vmul.f32 %v3724_v13, %v3595_v22  ;;  %v3562_v44 = vadd.f32 %v6658_v29, %v3521_v55  ;;  %v3170_v3 = vpop.f32.mrf.mxu1 }
 0x31f   : > { %v3461_v33 = vpop.f32.mrf.mxu0  ;;  %v3225_v54 = vadd.f32 %v3170_v3, %v6634_v20 }
 0x320   : > { %v3832_v16 = vadd.f32 %v3831_v28, %v3799_v50  ;;  %v3596_v7 = vmax.f32 %v3562_v44, 0.0  ;;  %v3522_v23 = vadd.f32 %v3461_v33, %v3223_v31  ;;  %v4835_v18 = vpop.f32.mrf.mxu1  ;;  %v3754_v44 = vpop.permute.xlu1 %3753 }
 0x321   : > { %v4901_v42 = vpop.f32.mrf.mxu0 }
 0x322   : > { %v3800_v53 = vmul.f32 %v3729_v30, %v3596_v7  ;;  %v3563_v48 = vadd.f32 %v6658_v29, %v3522_v23  ;;  %v3175_v32 = vpop.f32.mrf.mxu1 }
 0x323   : > { %v3466_v0 = vpop.f32.mrf.mxu0  ;;  %v3226_v38 = vadd.f32 %v3175_v32, %v6637_v36 }
 0x324   : > { %v3833_v40 = vadd.f32 %v3832_v16, %v3800_v53  ;;  %v3597_v60 = vmax.f32 %v3563_v48, 0.0  ;;  %v3523_v14 = vadd.f32 %v3466_v0, %v3224_v61  ;;  %v4838_v45 = vpop.f32.mrf.mxu1  ;;  %v3759_v53 = vpop.permute.xlu0 %3758 }
 0x325   : > { %v4904_v21 = vpop.f32.mrf.mxu0 }
 0x326   : > { %v3801_v51 = vmul.f32 %v3734_v47, %v3597_v60  ;;  %v3564_v59 = vadd.f32 %v6658_v29, %v3523_v14  ;;  %v3178_v63 = vpop.f32.mrf.mxu1 }
 0x327   : > { %v3469_v5 = vpop.f32.mrf.mxu0  ;;  %v3227_v11 = vadd.f32 %v3178_v63, %v6640_v49 }
 0x328   : > { %v3834_v24 = vadd.f32 %v3833_v40, %v3801_v51  ;;  %v3598_v25 = vmax.f32 %v3564_v59, 0.0  ;;  %v3524_v57 = vadd.f32 %v3469_v5, %v3225_v54  ;;  %v4839_v15 = vpop.f32.mrf.mxu1  ;;  %v3764_v59 = vpop.permute.xlu1 %3763 }
 0x329   : > { %v4905_v37 = vpop.f32.mrf.mxu0 }
 0x32a   : > { %v3802_v26 = vmul.f32 %v3739_v6, %v3598_v25  ;;  %v3565_v10 = vadd.f32 %v6658_v29, %v3524_v57  ;;  %v3183_v41 = vpop.f32.mrf.mxu1  ;;  %v3769_v37 = vpop.permute.xlu0 %3768 }
 0x32b   : > { %v3474_v62 = vpop.f32.mrf.mxu0  ;;  %v3228_v55 = vadd.f32 %v3183_v41, %v6643_v2 }
 0x32c   : > { %v3835_v20 = vadd.f32 %v3834_v24, %v3802_v26  ;;  %v3599_v56 = vmax.f32 %v3565_v10, 0.0  ;;  %v3525_v17 = vadd.f32 %v3474_v62, %v3226_v38  ;;  %v4842_v34 = vpop.f32.mrf.mxu1 }
 0x32d   : > { %v4908_v39 = vpop.f32.mrf.mxu0 }
 0x32e   : > { %v3803_v35 = vmul.f32 %v3744_v27, %v3599_v56  ;;  %v3566_v46 = vadd.f32 %v6658_v29, %v3525_v17  ;;  %v3186_v28 = vpop.f32.mrf.mxu1  ;;  %v3774_v27 = vpop.permute.xlu1 %3773 }
 0x32f   : > { %v3477_v58 = vpop.f32.mrf.mxu0  ;;  %v3229_v7 = vadd.f32 %v3186_v28, %v6646_v52 }
 0x330   : > { %v3836_v36 = vadd.f32 %v3835_v20, %v3803_v35  ;;  %v3600_v9 = vmax.f32 %v3566_v46, 0.0  ;;  %v3526_v13 = vadd.f32 %v3477_v58, %v3227_v11  ;;  %v4843_v31 = vpop.f32.mrf.mxu1 }
 0x331   : > { %v4909_v22 = vpop.f32.mrf.mxu0 }
 0x332   : > { %v3804_v8 = vmul.f32 %v3749_v12, %v3600_v9  ;;  %v3567_v43 = vadd.f32 %v6658_v29, %v3526_v13  ;;  %v3191_v30 = vpop.f32.mrf.mxu1 }
 0x333   : > { %v3482_v50 = vpop.f32.mrf.mxu0  ;;  %v3230_v40 = vadd.f32 %v3191_v30, %v6649_v1 }
 0x334   : > { %v3837_v49 = vadd.f32 %v3836_v36, %v3804_v8  ;;  %v3601_v4 = vmax.f32 %v3567_v43, 0.0  ;;  %v3527_v33 = vadd.f32 %v3482_v50, %v3228_v55  ;;  %v4846_v42 = vpop.f32.mrf.mxu1 }
 0x335   : > { %v4912_v16 = vpop.f32.mrf.mxu0 }
 0x336   : > { %v3805_v23 = vmul.f32 %v3754_v44, %v3601_v4  ;;  %v3568_v3 = vadd.f32 %v6658_v29, %v3527_v33  ;;  %v3194_v0 = vpop.f32.mrf.mxu1 }
 0x337   : > { %v3485_v61 = vpop.f32.mrf.mxu0  ;;  %v3231_v5 = vadd.f32 %v3194_v0, %v6652_v19 }
 0x338   : > { %v3838_v2 = vadd.f32 %v3837_v49, %v3805_v23  ;;  %v3602_v48 = vmax.f32 %v3568_v3, 0.0  ;;  %v3528_v18 = vadd.f32 %v3485_v61, %v3229_v7  ;;  %v4847_v32 = vpop.f32.mrf.mxu1 }
 0x339   : > { %v4913_v47 = vpop.f32.mrf.mxu0 }
 0x33a   : > { %v3806_v60 = vmul.f32 %v3759_v53, %v3602_v48  ;;  %v3569_v14 = vadd.f32 %v6658_v29, %v3528_v18 }
 0x33b   : > { %v3490_v21 = vpop.f32.mrf.mxu0 }
 0x33c   : > { %v3839_v54 = vadd.f32 %v3838_v2, %v3806_v60  ;;  %v3603_v52 = vmax.f32 %v3569_v14, 0.0  ;;  %v3529_v51 = vadd.f32 %v3490_v21, %v3230_v40 }
 0x33d   : > { %v4916_v45 = vpop.f32.mrf.mxu0 }
 0x33e   : > { %v3807_v6 = vmul.f32 %v3764_v59, %v3603_v52  ;;  %v3570_v24 = vadd.f32 %v6658_v29, %v3529_v51 }
 0x33f   : > { %v3493_v25 = vpop.f32.mrf.mxu0 }
 0x340   : > { %v3840_v57 = vadd.f32 %v3839_v54, %v3807_v6  ;;  %v3604_v63 = vmax.f32 %v3570_v24, 0.0  ;;  %v3530_v1 = vadd.f32 %v3493_v25, %v3231_v5 }
 0x341   : > { %v4917_v38 = vpop.f32.mrf.mxu0 }
 0x342   : > { %v3808_v26 = vmul.f32 %v3769_v37, %v3604_v63  ;;  %v3571_v10 = vadd.f32 %v6658_v29, %v3530_v1 }
 0x344   : > { %v3841_v15 = vadd.f32 %v3840_v57, %v3808_v26  ;;  %v3605_v62 = vmax.f32 %v3571_v10, 0.0 }
 0x346   : > { %v3809_v20 = vmul.f32 %v3774_v27, %v3605_v62 }
 0x348   : > { %v3842_v56 = vadd.f32 %v3841_v15, %v3809_v20 }
 0x34a   : > { %v3843_v17 = vrot.slane %v3842_v56, 4 }
 0x34c   : > { %v3844_v19 = vadd.f32 %v3843_v17, %v3842_v56 }
 0x34e   : > { %v3845_v41 = vrot.slane %v3844_v19, 2 }
 0x350   : > { %v3846_v39 = vadd.f32 %v3845_v41, %v3844_v19 }
 0x352   : > { %v3847_v11 = vrot.slane %v3846_v39, 1 }
 0x354   : > { %v3848_v35 = vadd.f32 %v3847_v11, %v3846_v39 }
 0x356   : > { %3849 = vst [vmem:[%s193_s17] sm:$0x1] %v3848_v35 }
 0x357 PF: > { %s14_s15 = sadd.s32 1, %s4999_s15  }
 0x358   : > { %p11_p4 = scmp.ge.s32.totalorder %s14_s15, 4  }
 0x35a   :  { %13 = sbr.rel (!%p11_p4) target bundleno = 1 (0x1), region = 74 }

</bundles_post_ra>
